<compile_context>
chip_gen: v5e
topology: v5e:2x2
jax: 0.10.0
libtpu: 0.0.40
codegen_flags: <defaults>
</compile_context>

<pallas_src>
import jax
import jax.numpy as jnp
from jax import lax
from jax.experimental import pallas as pl
from jax.experimental.pallas import tpu as pltpu

NEG_INF = -1e30
LEAKY_SLOPE = 0.01        # torch nn.LeakyReLU() default negative_slope
F_SIZE = 60               # GAT feature size (fixed by the module)
K_HEADS = 2
HEAD_SIZE = F_SIZE // K_HEADS
F_PAD = 64                # padded feature width (h in cols 0..59, a1 in cols 60..61)
N_CLASSES = 10
N_LAYERS = 3

# Slab block indices: 0..2 = [W | Wa1] per layer, 3..5 = misc per layer,
# 6..8 = Wf split per layer, 9 = bf.
_MISC0, _CLS0, _BF = 3, 6, 9
# Misc block row offsets (8-aligned so in-kernel sublane slices start aligned).
_ROW_BIAS, _ROW_WA2T, _ROW_BA2 = 0, 8, 16


# --------------------------------------------------------------------------
# Fused Pallas kernel
# --------------------------------------------------------------------------
def _gat_layer(x, mask_bias, wa, bias_row, wa2t, ba2, head_masks):
    """One 2-head GAT layer on VMEM values.

    x:         [BN, 64]  node features (cols >= 60 are zero)
    mask_bias: [BN, BN]  0.0 on edges, -1e30 elsewhere
    wa:        [64, 64]  cols 0..59 = W, cols 60..61 = W @ A1 (folded a_1)
    bias_row:  [1, 64]   cols 0..59 = b, cols 60..61 = b @ A1 + a1_b
    wa2t:      [2, 64]   (W @ A2)^T (folded a_2, row layout -> no transpose needed)
    ba2:       [2, 1]    b @ A2 + a2_b
    returns:   relu(concat_heads(att_h @ h_h)) : [BN, 64] (cols >= 60 zero)
    """
    # One matmul yields h (cols 0..59) and a_1 scores (cols 60..61).
    hw = jnp.dot(x, wa, preferred_element_type=jnp.float32) + bias_row        # [BN, 64]
    # a_2 scores directly in row layout [2, BN] via an NT dot (no [N,1]->[1,N] relayout).
    a2 = lax.dot_general(wa2t, x, (((1,), (1,)), ((), ())),
                         preferred_element_type=jnp.float32) + ba2            # [2, BN]

    out = None
    for hh in range(K_HEADS):
        s = hw[:, F_SIZE + hh:F_SIZE + hh + 1] + a2[hh:hh + 1, :]             # [BN, BN]
        s = jnp.where(s >= 0.0, s, LEAKY_SLOPE * s)                           # LeakyReLU
        s = s + mask_bias                                                     # sparsity
        m = jnp.max(s, axis=-1, keepdims=True)
        p = jnp.exp(s - m)                          # masked entries underflow to exactly 0
        att = p / jnp.sum(p, axis=-1, keepdims=True)       # exact row softmax
        # Lane-masked full-width matmul instead of a lane-offset-30 slice + concat:
        # head hh's contribution lands in its own 30 output columns, others stay 0.
        contrib = jnp.dot(att, hw * head_masks[hh], preferred_element_type=jnp.float32)
        out = contrib if out is None else out + contrib
    return jnp.maximum(out, 0.0)                                              # F.relu(cat)


def superpixel_gat_kernel(x_ref, maskb_ref, pool_ref, slab_ref, out_ref):
    # Per-head 0/1 lane masks (computed once, reused by all three layers; they also
    # zero the a_1 columns 60..63 so layer outputs stay zero-padded to width 64).
    col = lax.broadcasted_iota(jnp.int32, (1, F_PAD), 1)
    head_masks = [
        (col < HEAD_SIZE).astype(jnp.float32),
        ((col >= HEAD_SIZE) & (col < F_SIZE)).astype(jnp.float32),
    ]

    x = x_ref[...]                       # [BN, 64]
    maskb = maskb_ref[...]               # [BN, BN]
    pool = pool_ref[...]                 # [BG, BN]

    logits = jnp.zeros((pool.shape[0], F_PAD), jnp.float32)
    for l in range(N_LAYERS):
        wa = slab_ref[l]                                  # [64, 64]
        misc = slab_ref[_MISC0 + l]                       # [64, 64]
        bias_row = misc[_ROW_BIAS:_ROW_BIAS + 1, :]       # [1, 64]
        wa2t = misc[_ROW_WA2T:_ROW_WA2T + K_HEADS, :]     # [2, 64]
        ba2 = misc[_ROW_BA2:_ROW_BA2 + K_HEADS, 0:1]      # [2, 1]
        x = _gat_layer(x, maskb, wa, bias_row, wa2t, ba2, head_masks)
        # global_mean_pool of this layer's features, classifier accumulated per layer
        # (equivalent to concat([x1,x2,x3]) @ Wf with Wf split row-wise host-side).
        pooled = jnp.dot(pool, x, preferred_element_type=jnp.float32)         # [BG, 64]
        logits = logits + jnp.dot(pooled, slab_ref[_CLS0 + l],
                                  preferred_element_type=jnp.float32)         # [BG, 64]

    logits = logits + slab_ref[_BF][0:1, :]               # bf (zero-padded to 64)
    logits = logits[:, :N_CLASSES]
    m = jnp.max(logits, axis=-1, keepdims=True)
    e = jnp.exp(logits - m)
    out_ref[...] = e / jnp.sum(e, axis=-1, keepdims=True)  # exact softmax


# --------------------------------------------------------------------------
# Wrapper: one pallas_call, grid over graph-blocks (parallel -> v7x megacore)
# --------------------------------------------------------------------------
def superpixel_gat_forward(x0_pad, maskb_blocks, pool_blocks, slab):
    nb, bg, bn = pool_blocks.shape
    out = pl.pallas_call(
        superpixel_gat_kernel,
        out_shape=jax.ShapeDtypeStruct((nb, bg, N_CLASSES), jnp.float32),
        grid=(nb,),
        in_specs=[
            pl.BlockSpec((bn, F_PAD), lambda i: (i, 0)),          # x0 rows of this block
            pl.BlockSpec((None, bn, bn), lambda i: (i, 0, 0)),    # diagonal mask block
            pl.BlockSpec((None, bg, bn), lambda i: (i, 0, 0)),    # pooling rows
            pl.BlockSpec(slab.shape, lambda i: (0, 0, 0)),        # weight slab (resident)
        ],
        out_specs=pl.BlockSpec((None, bg, N_CLASSES), lambda i: (i, 0, 0)),
        compiler_params=pltpu.CompilerParams(dimension_semantics=("parallel",)),
    )(x0_pad, maskb_blocks, pool_blocks, slab)
    return out.reshape(nb * bg, N_CLASSES)


# --------------------------------------------------------------------------
# Host-side packing of all parameters into one slab [10, 64, 64]
# --------------------------------------------------------------------------
def pack_params(gat_layers, Wf, bf):
    slab = jnp.zeros((10, F_PAD, F_PAD), jnp.float32)
    for l, heads in enumerate(gat_layers):
        fin = heads[0][0].shape[0]
        Wl = jnp.concatenate([p[0] for p in heads], axis=1)               # [fin, 60]
        bl = jnp.concatenate([p[1] for p in heads]).reshape(1, F_SIZE)    # [1, 60]
        A1 = jnp.zeros((F_SIZE, K_HEADS), jnp.float32)
        A2 = jnp.zeros((F_SIZE, K_HEADS), jnp.float32)
        a1b = jnp.zeros((K_HEADS,), jnp.float32)
        a2b = jnp.zeros((K_HEADS,), jnp.float32)
        for h, (_, _, a1w_h, a1b_h, a2w_h, a2b_h) in enumerate(heads):
            A1 = A1.at[h * HEAD_SIZE:(h + 1) * HEAD_SIZE, h].set(a1w_h[:, 0])
            A2 = A2.at[h * HEAD_SIZE:(h + 1) * HEAD_SIZE, h].set(a2w_h[:, 0])
            a1b = a1b.at[h].set(a1b_h[0])
            a2b = a2b.at[h].set(a2b_h[0])
        Wa1 = Wl @ A1                                  # [fin, 2] (folded a_1)
        Wa2 = Wl @ A2                                  # [fin, 2] (folded a_2)
        ba1 = (bl @ A1)[0] + a1b                       # [2]
        ba2 = (bl @ A2)[0] + a2b                       # [2]
        slab = slab.at[l, :fin, :F_SIZE].set(Wl)
        slab = slab.at[l, :fin, F_SIZE:F_SIZE + K_HEADS].set(Wa1)
        slab = slab.at[_MISC0 + l, _ROW_BIAS, :F_SIZE].set(bl[0])
        slab = slab.at[_MISC0 + l, _ROW_BIAS, F_SIZE:F_SIZE + K_HEADS].set(ba1)
        slab = slab.at[_MISC0 + l, _ROW_WA2T:_ROW_WA2T + K_HEADS, :fin].set(Wa2.T)
        slab = slab.at[_MISC0 + l, _ROW_BA2:_ROW_BA2 + K_HEADS, 0].set(ba2)
    for l in range(N_LAYERS):
        slab = slab.at[_CLS0 + l, :F_SIZE, :N_CLASSES].set(Wf[l * F_SIZE:(l + 1) * F_SIZE, :])
    slab = slab.at[_BF, 0, :N_CLASSES].set(bf)
    return slab


# --------------------------------------------------------------------------
# Pure-JAX reference (mirrors the PyTorch module, unfused) for validation
# --------------------------------------------------------------------------
def _gat_layer_ref(x, mask, head_params):
    outs = []
    for (W, b, a1w, a1b, a2w, a2b) in head_params:
        h = x @ W + b
        a1 = h @ a1w + a1b
        a2 = h @ a2w + a2b
        s = a1 + a2.T
        s = jnp.where(s >= 0.0, s, LEAKY_SLOPE * s)
        s = jnp.where(mask > 0.0, s, NEG_INF)
        att = jax.nn.softmax(s, axis=1)
        outs.append(att @ h)
    return jax.nn.relu(jnp.concatenate(outs, axis=1))


def forward_ref(x0, mask, pool_mat, gat1, gat2, gat3, Wf, bf):
    x1 = _gat_layer_ref(x0, mask, gat1)
    x2 = _gat_layer_ref(x1, mask, gat2)
    x3 = _gat_layer_ref(x2, mask, gat3)
    x = jnp.concatenate([x1, x2, x3], axis=1)
    pooled = pool_mat @ x
    return jax.nn.softmax(pooled @ Wf + bf, axis=1)


# --------------------------------------------------------------------------
# Deterministic parameter init (PyTorch nn.Linear default: U(-1/sqrt(fan_in), ...))
# --------------------------------------------------------------------------
def linear_init(key, fan_in, fan_out):
    kw, kb = jax.random.split(key)
    bound = 1.0 / (fan_in ** 0.5)
    W = jax.random.uniform(kw, (fan_in, fan_out), jnp.float32, -bound, bound)
    b = jax.random.uniform(kb, (fan_out,), jnp.float32, -bound, bound)
    return W, b


def gat_layer_params(key, fin, fout):
    k1, k2, k3 = jax.random.split(key, 3)
    W, b = linear_init(k1, fin, fout)          # self.layer
    a1w, a1b = linear_init(k2, fout, 1)        # self.a_1
    a2w, a2b = linear_init(k3, fout, 1)        # self.a_2
    return (W, b, a1w, a1b, a2w, a2b)


# --------------------------------------------------------------------------
# Main
# --------------------------------------------------------------------------
if __name__ == "__main__":
    input_size = 4       # superpixel node feature dim
    n_graphs = 4
    nodes_per_graph = 32
    N = n_graphs * nodes_per_graph       # 128 nodes -> full MXU row tile per call
    NB = 2                               # graph-blocks (grid; one per v7x TensorCore)
    BN = N // NB                         # nodes per block
    BG = n_graphs // NB                  # graphs per block

    key = jax.random.PRNGKey(0)
    keys = jax.random.split(key, 16)

    # --- node features X0 : [N, input_size] ---
    X0 = jax.random.normal(keys[0], (N, input_size), jnp.float32)

    # --- batch assignment (node -> graph id) ---
    batch = jnp.repeat(jnp.arange(n_graphs), nodes_per_graph)   # [N]

    # --- L0 sparsity pattern: block-diagonal per graph, symmetric, self loops ---
    A = (jax.random.uniform(keys[1], (N, N)) < 0.3).astype(jnp.float32)
    A = jnp.maximum(A, A.T)
    same_graph = (batch[:, None] == batch[None, :]).astype(jnp.float32)
    A = A * same_graph
    mask = jnp.maximum(A, jnp.eye(N, dtype=jnp.float32))        # [N, N]

    # --- normalized pooling matrix for global_mean_pool: [n_graphs, N] ---
    pool_mat = (batch[None, :] == jnp.arange(n_graphs)[:, None]).astype(jnp.float32)
    pool_mat = pool_mat / jnp.sum(pool_mat, axis=1, keepdims=True)

    # --- parameters (per head) + final linear, packed into one slab ---
    gat1 = [gat_layer_params(keys[2 + h], input_size, HEAD_SIZE) for h in range(K_HEADS)]
    gat2 = [gat_layer_params(keys[4 + h], F_SIZE, HEAD_SIZE) for h in range(K_HEADS)]
    gat3 = [gat_layer_params(keys[6 + h], F_SIZE, HEAD_SIZE) for h in range(K_HEADS)]
    Wf, bf = linear_init(keys[8], 3 * F_SIZE, N_CLASSES)
    slab = pack_params([gat1, gat2, gat3], Wf, bf)

    # --- host-side prep: padded features, additive mask bias blocks, pool blocks ---
    x0_pad = jnp.pad(X0, ((0, 0), (0, F_PAD - input_size)))                   # [N, 64]
    mask_bias = jnp.where(mask > 0.0, 0.0, NEG_INF)                           # [N, N]
    maskb_blocks = jnp.stack(
        [mask_bias[i * BN:(i + 1) * BN, i * BN:(i + 1) * BN] for i in range(NB)])
    pool_blocks = jnp.stack(
        [pool_mat[i * BG:(i + 1) * BG, i * BN:(i + 1) * BN] for i in range(NB)])

    out = superpixel_gat_forward(x0_pad, maskb_blocks, pool_blocks, slab)
    out = jax.block_until_ready(out)

    # sanity checks
    assert out.shape == (n_graphs, N_CLASSES)
    assert bool(jnp.all(jnp.isfinite(out)))
    assert bool(jnp.allclose(jnp.sum(out, axis=1), 1.0, atol=1e-4))

    # compare against the unfused pure-JAX reference
    ref = forward_ref(X0, mask, pool_mat, gat1, gat2, gat3, Wf, bf)
    assert bool(jnp.allclose(out, ref, atol=1e-3, rtol=0.0))

    print("KERNEL_OK")
</pallas_src>

<mosaic_0001>
module attributes {stable_mosaic.version = 11 : i64} {
  func.func @superpixel_gat_kernel(%arg0: i32, %arg1: memref<64x64xf32, #tpu.memory_space<vmem>>, %arg2: memref<1x64x64xf32, #tpu.memory_space<vmem>>, %arg3: memref<1x2x64xf32, #tpu.memory_space<vmem>>, %arg4: memref<10x64x64xf32, #tpu.memory_space<vmem>>, %arg5: memref<1x2x10xf32, #tpu.memory_space<vmem>>) attributes {dimension_semantics = [#tpu.dimension_semantics<parallel>], iteration_bounds = array<i64: 2>, scalar_prefetch = 0 : i64, scratch_operands = 0 : i64, tpu.core_type = #tpu.core_type<tc>, window_params = [{transform_indices = @transform_0, window_bounds = array<i64: 64, 64>}, {transform_indices = @transform_1, window_bounds = array<i64: 1, 64, 64>}, {transform_indices = @transform_2, window_bounds = array<i64: 1, 2, 64>}, {pipeline_mode = #tpu.pipeline_mode<synchronous>, transform_indices = @transform_3, window_bounds = array<i64: 10, 64, 64>}, {transform_indices = @transform_4, window_bounds = array<i64: 1, 2, 10>}]} {
    %0 = tpu.iota {dimensions = array<i32: 1>} : vector<1x64xi32>
    %c30_i32 = arith.constant 30 : i32
    %1 = vector.broadcast %c30_i32 : i32 to vector<1x64xi32>
    %2 = arith.cmpi slt, %0, %1 : vector<1x64xi32>
    %3 = arith.extui %2 : vector<1x64xi1> to vector<1x64xi32>
    %4 = arith.sitofp %3 : vector<1x64xi32> to vector<1x64xf32>
    %c30_i32_0 = arith.constant 30 : i32
    %5 = vector.broadcast %c30_i32_0 : i32 to vector<1x64xi32>
    %6 = arith.cmpi sge, %0, %5 : vector<1x64xi32>
    %c60_i32 = arith.constant 60 : i32
    %7 = vector.broadcast %c60_i32 : i32 to vector<1x64xi32>
    %8 = arith.cmpi slt, %0, %7 : vector<1x64xi32>
    %9 = arith.andi %6, %8 : vector<1x64xi1>
    %10 = arith.extui %9 : vector<1x64xi1> to vector<1x64xi32>
    %11 = arith.sitofp %10 : vector<1x64xi32> to vector<1x64xf32>
    %c0 = arith.constant 0 : index
    %c0_1 = arith.constant 0 : index
    %12 = vector.load %arg1[%c0, %c0_1] : memref<64x64xf32, #tpu.memory_space<vmem>>, vector<64x64xf32>
    %c0_2 = arith.constant 0 : index
    %c0_3 = arith.constant 0 : index
    %c0_4 = arith.constant 0 : index
    %13 = vector.load %arg2[%c0_2, %c0_3, %c0_4] : memref<1x64x64xf32, #tpu.memory_space<vmem>>, vector<1x64x64xf32>
    %14 = vector.shape_cast %13 : vector<1x64x64xf32> to vector<64x64xf32>
    %c0_5 = arith.constant 0 : index
    %c0_6 = arith.constant 0 : index
    %c0_7 = arith.constant 0 : index
    %15 = vector.load %arg3[%c0_5, %c0_6, %c0_7] : memref<1x2x64xf32, #tpu.memory_space<vmem>>, vector<1x2x64xf32>
    %16 = vector.shape_cast %15 : vector<1x2x64xf32> to vector<2x64xf32>
    %cst = arith.constant 0.000000e+00 : f32
    %17 = vector.broadcast %cst : f32 to vector<2x64xf32>
    %c0_8 = arith.constant 0 : index
    %c0_9 = arith.constant 0 : index
    %c0_10 = arith.constant 0 : index
    %18 = vector.load %arg4[%c0_8, %c0_9, %c0_10] : memref<10x64x64xf32, #tpu.memory_space<vmem>>, vector<1x64x64xf32>
    %19 = vector.shape_cast %18 : vector<1x64x64xf32> to vector<64x64xf32>
    %c3 = arith.constant 3 : index
    %c0_11 = arith.constant 0 : index
    %c0_12 = arith.constant 0 : index
    %20 = vector.load %arg4[%c3, %c0_11, %c0_12] : memref<10x64x64xf32, #tpu.memory_space<vmem>>, vector<1x64x64xf32>
    %21 = vector.shape_cast %20 : vector<1x64x64xf32> to vector<64x64xf32>
    %22 = vector.extract_strided_slice %21 {offsets = [0, 0], sizes = [1, 64], strides = [1, 1]} : vector<64x64xf32> to vector<1x64xf32>
    %23 = vector.extract_strided_slice %21 {offsets = [8, 0], sizes = [2, 64], strides = [1, 1]} : vector<64x64xf32> to vector<2x64xf32>
    %24 = vector.extract_strided_slice %21 {offsets = [16, 0], sizes = [2, 1], strides = [1, 1]} : vector<64x64xf32> to vector<2x1xf32>
    %cst_13 = arith.constant dense<0.000000e+00> : vector<64x64xf32>
    %25 = tpu.matmul %12, %19, %cst_13 {dimension_numbers = #tpu.dot_dimension_numbers<[1], [0], [0], [1], [0, 0, 1, 1], [], []>} : vector<64x64xf32>, vector<64x64xf32>, vector<64x64xf32> -> vector<64x64xf32>
    %26 = vector.broadcast %22 : vector<1x64xf32> to vector<64x64xf32>
    %27 = arith.addf %25, %26 : vector<64x64xf32>
    %cst_14 = arith.constant dense<0.000000e+00> : vector<2x64xf32>
    %28 = tpu.matmul %23, %12, %cst_14 {dimension_numbers = #tpu.dot_dimension_numbers<[1], [1], [0], [0], [0, 0, 1, 0], [], []>} : vector<2x64xf32>, vector<64x64xf32>, vector<2x64xf32> -> vector<2x64xf32>
    %29 = vector.broadcast %24 : vector<2x1xf32> to vector<2x64xf32>
    %30 = arith.addf %28, %29 : vector<2x64xf32>
    %31 = vector.extract_strided_slice %27 {offsets = [0, 60], sizes = [64, 1], strides = [1, 1]} : vector<64x64xf32> to vector<64x1xf32>
    %32 = vector.extract_strided_slice %30 {offsets = [0, 0], sizes = [1, 64], strides = [1, 1]} : vector<2x64xf32> to vector<1x64xf32>
    %33 = vector.broadcast %31 : vector<64x1xf32> to vector<64x64xf32>
    %34 = vector.broadcast %32 : vector<1x64xf32> to vector<64x64xf32>
    %35 = arith.addf %33, %34 : vector<64x64xf32>
    %cst_15 = arith.constant 0.000000e+00 : f32
    %36 = vector.broadcast %cst_15 : f32 to vector<64x64xf32>
    %37 = arith.cmpf oge, %35, %36 : vector<64x64xf32>
    %cst_16 = arith.constant 0.00999999977 : f32
    %38 = vector.broadcast %cst_16 : f32 to vector<64x64xf32>
    %39 = arith.mulf %38, %35 : vector<64x64xf32>
    %40 = arith.select %37, %35, %39 : vector<64x64xi1>, vector<64x64xf32>
    %41 = arith.addf %40, %14 : vector<64x64xf32>
    %cst_17 = arith.constant dense<0xFF800000> : vector<64xf32>
    %42 = vector.multi_reduction <maximumf>, %41, %cst_17 [1] : vector<64x64xf32> to vector<64xf32>
    %43 = vector.shape_cast %42 : vector<64xf32> to vector<64x1xf32>
    %44 = vector.broadcast %43 : vector<64x1xf32> to vector<64x64xf32>
    %45 = arith.subf %41, %44 : vector<64x64xf32>
    %46 = math.exp %45 : vector<64x64xf32>
    %cst_18 = arith.constant dense<0.000000e+00> : vector<64xf32>
    %47 = vector.multi_reduction <add>, %46, %cst_18 [1] : vector<64x64xf32> to vector<64xf32>
    %48 = vector.shape_cast %47 : vector<64xf32> to vector<64x1xf32>
    %49 = vector.broadcast %48 : vector<64x1xf32> to vector<64x64xf32>
    %50 = arith.divf %46, %49 : vector<64x64xf32>
    %51 = vector.broadcast %4 : vector<1x64xf32> to vector<64x64xf32>
    %52 = arith.mulf %27, %51 : vector<64x64xf32>
    %cst_19 = arith.constant dense<0.000000e+00> : vector<64x64xf32>
    %53 = tpu.matmul %50, %52, %cst_19 {dimension_numbers = #tpu.dot_dimension_numbers<[1], [0], [0], [1], [0, 0, 1, 1], [], []>} : vector<64x64xf32>, vector<64x64xf32>, vector<64x64xf32> -> vector<64x64xf32>
    %54 = vector.extract_strided_slice %27 {offsets = [0, 61], sizes = [64, 1], strides = [1, 1]} : vector<64x64xf32> to vector<64x1xf32>
    %55 = vector.extract_strided_slice %30 {offsets = [1, 0], sizes = [1, 64], strides = [1, 1]} : vector<2x64xf32> to vector<1x64xf32>
    %56 = vector.broadcast %54 : vector<64x1xf32> to vector<64x64xf32>
    %57 = vector.broadcast %55 : vector<1x64xf32> to vector<64x64xf32>
    %58 = arith.addf %56, %57 : vector<64x64xf32>
    %cst_20 = arith.constant 0.000000e+00 : f32
    %59 = vector.broadcast %cst_20 : f32 to vector<64x64xf32>
    %60 = arith.cmpf oge, %58, %59 : vector<64x64xf32>
    %cst_21 = arith.constant 0.00999999977 : f32
    %61 = vector.broadcast %cst_21 : f32 to vector<64x64xf32>
    %62 = arith.mulf %61, %58 : vector<64x64xf32>
    %63 = arith.select %60, %58, %62 : vector<64x64xi1>, vector<64x64xf32>
    %64 = arith.addf %63, %14 : vector<64x64xf32>
    %cst_22 = arith.constant dense<0xFF800000> : vector<64xf32>
    %65 = vector.multi_reduction <maximumf>, %64, %cst_22 [1] : vector<64x64xf32> to vector<64xf32>
    %66 = vector.shape_cast %65 : vector<64xf32> to vector<64x1xf32>
    %67 = vector.broadcast %66 : vector<64x1xf32> to vector<64x64xf32>
    %68 = arith.subf %64, %67 : vector<64x64xf32>
    %69 = math.exp %68 : vector<64x64xf32>
    %cst_23 = arith.constant dense<0.000000e+00> : vector<64xf32>
    %70 = vector.multi_reduction <add>, %69, %cst_23 [1] : vector<64x64xf32> to vector<64xf32>
    %71 = vector.shape_cast %70 : vector<64xf32> to vector<64x1xf32>
    %72 = vector.broadcast %71 : vector<64x1xf32> to vector<64x64xf32>
    %73 = arith.divf %69, %72 : vector<64x64xf32>
    %74 = vector.broadcast %11 : vector<1x64xf32> to vector<64x64xf32>
    %75 = arith.mulf %27, %74 : vector<64x64xf32>
    %cst_24 = arith.constant dense<0.000000e+00> : vector<64x64xf32>
    %76 = tpu.matmul %73, %75, %cst_24 {dimension_numbers = #tpu.dot_dimension_numbers<[1], [0], [0], [1], [0, 0, 1, 1], [], []>} : vector<64x64xf32>, vector<64x64xf32>, vector<64x64xf32> -> vector<64x64xf32>
    %77 = arith.addf %53, %76 : vector<64x64xf32>
    %cst_25 = arith.constant 0.000000e+00 : f32
    %78 = vector.broadcast %cst_25 : f32 to vector<64x64xf32>
    %79 = arith.maximumf %77, %78 : vector<64x64xf32>
    %cst_26 = arith.constant dense<0.000000e+00> : vector<2x64xf32>
    %80 = tpu.matmul %16, %79, %cst_26 {dimension_numbers = #tpu.dot_dimension_numbers<[1], [0], [0], [1], [0, 0, 1, 1], [], []>} : vector<2x64xf32>, vector<64x64xf32>, vector<2x64xf32> -> vector<2x64xf32>
    %c6 = arith.constant 6 : index
    %c0_27 = arith.constant 0 : index
    %c0_28 = arith.constant 0 : index
    %81 = vector.load %arg4[%c6, %c0_27, %c0_28] : memref<10x64x64xf32, #tpu.memory_space<vmem>>, vector<1x64x64xf32>
    %82 = vector.shape_cast %81 : vector<1x64x64xf32> to vector<64x64xf32>
    %cst_29 = arith.constant dense<0.000000e+00> : vector<2x64xf32>
    %83 = tpu.matmul %80, %82, %cst_29 {dimension_numbers = #tpu.dot_dimension_numbers<[1], [0], [0], [1], [0, 0, 1, 1], [], []>} : vector<2x64xf32>, vector<64x64xf32>, vector<2x64xf32> -> vector<2x64xf32>
    %84 = arith.addf %17, %83 : vector<2x64xf32>
    %c1 = arith.constant 1 : index
    %c0_30 = arith.constant 0 : index
    %c0_31 = arith.constant 0 : index
    %85 = vector.load %arg4[%c1, %c0_30, %c0_31] : memref<10x64x64xf32, #tpu.memory_space<vmem>>, vector<1x64x64xf32>
    %86 = vector.shape_cast %85 : vector<1x64x64xf32> to vector<64x64xf32>
    %c4 = arith.constant 4 : index
    %c0_32 = arith.constant 0 : index
    %c0_33 = arith.constant 0 : index
    %87 = vector.load %arg4[%c4, %c0_32, %c0_33] : memref<10x64x64xf32, #tpu.memory_space<vmem>>, vector<1x64x64xf32>
    %88 = vector.shape_cast %87 : vector<1x64x64xf32> to vector<64x64xf32>
    %89 = vector.extract_strided_slice %88 {offsets = [0, 0], sizes = [1, 64], strides = [1, 1]} : vector<64x64xf32> to vector<1x64xf32>
    %90 = vector.extract_strided_slice %88 {offsets = [8, 0], sizes = [2, 64], strides = [1, 1]} : vector<64x64xf32> to vector<2x64xf32>
    %91 = vector.extract_strided_slice %88 {offsets = [16, 0], sizes = [2, 1], strides = [1, 1]} : vector<64x64xf32> to vector<2x1xf32>
    %cst_34 = arith.constant dense<0.000000e+00> : vector<64x64xf32>
    %92 = tpu.matmul %79, %86, %cst_34 {dimension_numbers = #tpu.dot_dimension_numbers<[1], [0], [0], [1], [0, 0, 1, 1], [], []>} : vector<64x64xf32>, vector<64x64xf32>, vector<64x64xf32> -> vector<64x64xf32>
    %93 = vector.broadcast %89 : vector<1x64xf32> to vector<64x64xf32>
    %94 = arith.addf %92, %93 : vector<64x64xf32>
    %cst_35 = arith.constant dense<0.000000e+00> : vector<2x64xf32>
    %95 = tpu.matmul %90, %79, %cst_35 {dimension_numbers = #tpu.dot_dimension_numbers<[1], [1], [0], [0], [0, 0, 1, 0], [], []>} : vector<2x64xf32>, vector<64x64xf32>, vector<2x64xf32> -> vector<2x64xf32>
    %96 = vector.broadcast %91 : vector<2x1xf32> to vector<2x64xf32>
    %97 = arith.addf %95, %96 : vector<2x64xf32>
    %98 = vector.extract_strided_slice %94 {offsets = [0, 60], sizes = [64, 1], strides = [1, 1]} : vector<64x64xf32> to vector<64x1xf32>
    %99 = vector.extract_strided_slice %97 {offsets = [0, 0], sizes = [1, 64], strides = [1, 1]} : vector<2x64xf32> to vector<1x64xf32>
    %100 = vector.broadcast %98 : vector<64x1xf32> to vector<64x64xf32>
    %101 = vector.broadcast %99 : vector<1x64xf32> to vector<64x64xf32>
    %102 = arith.addf %100, %101 : vector<64x64xf32>
    %cst_36 = arith.constant 0.000000e+00 : f32
    %103 = vector.broadcast %cst_36 : f32 to vector<64x64xf32>
    %104 = arith.cmpf oge, %102, %103 : vector<64x64xf32>
    %cst_37 = arith.constant 0.00999999977 : f32
    %105 = vector.broadcast %cst_37 : f32 to vector<64x64xf32>
    %106 = arith.mulf %105, %102 : vector<64x64xf32>
    %107 = arith.select %104, %102, %106 : vector<64x64xi1>, vector<64x64xf32>
    %108 = arith.addf %107, %14 : vector<64x64xf32>
    %cst_38 = arith.constant dense<0xFF800000> : vector<64xf32>
    %109 = vector.multi_reduction <maximumf>, %108, %cst_38 [1] : vector<64x64xf32> to vector<64xf32>
    %110 = vector.shape_cast %109 : vector<64xf32> to vector<64x1xf32>
    %111 = vector.broadcast %110 : vector<64x1xf32> to vector<64x64xf32>
    %112 = arith.subf %108, %111 : vector<64x64xf32>
    %113 = math.exp %112 : vector<64x64xf32>
    %cst_39 = arith.constant dense<0.000000e+00> : vector<64xf32>
    %114 = vector.multi_reduction <add>, %113, %cst_39 [1] : vector<64x64xf32> to vector<64xf32>
    %115 = vector.shape_cast %114 : vector<64xf32> to vector<64x1xf32>
    %116 = vector.broadcast %115 : vector<64x1xf32> to vector<64x64xf32>
    %117 = arith.divf %113, %116 : vector<64x64xf32>
    %118 = vector.broadcast %4 : vector<1x64xf32> to vector<64x64xf32>
    %119 = arith.mulf %94, %118 : vector<64x64xf32>
    %cst_40 = arith.constant dense<0.000000e+00> : vector<64x64xf32>
    %120 = tpu.matmul %117, %119, %cst_40 {dimension_numbers = #tpu.dot_dimension_numbers<[1], [0], [0], [1], [0, 0, 1, 1], [], []>} : vector<64x64xf32>, vector<64x64xf32>, vector<64x64xf32> -> vector<64x64xf32>
    %121 = vector.extract_strided_slice %94 {offsets = [0, 61], sizes = [64, 1], strides = [1, 1]} : vector<64x64xf32> to vector<64x1xf32>
    %122 = vector.extract_strided_slice %97 {offsets = [1, 0], sizes = [1, 64], strides = [1, 1]} : vector<2x64xf32> to vector<1x64xf32>
    %123 = vector.broadcast %121 : vector<64x1xf32> to vector<64x64xf32>
    %124 = vector.broadcast %122 : vector<1x64xf32> to vector<64x64xf32>
    %125 = arith.addf %123, %124 : vector<64x64xf32>
    %cst_41 = arith.constant 0.000000e+00 : f32
    %126 = vector.broadcast %cst_41 : f32 to vector<64x64xf32>
    %127 = arith.cmpf oge, %125, %126 : vector<64x64xf32>
    %cst_42 = arith.constant 0.00999999977 : f32
    %128 = vector.broadcast %cst_42 : f32 to vector<64x64xf32>
    %129 = arith.mulf %128, %125 : vector<64x64xf32>
    %130 = arith.select %127, %125, %129 : vector<64x64xi1>, vector<64x64xf32>
    %131 = arith.addf %130, %14 : vector<64x64xf32>
    %cst_43 = arith.constant dense<0xFF800000> : vector<64xf32>
    %132 = vector.multi_reduction <maximumf>, %131, %cst_43 [1] : vector<64x64xf32> to vector<64xf32>
    %133 = vector.shape_cast %132 : vector<64xf32> to vector<64x1xf32>
    %134 = vector.broadcast %133 : vector<64x1xf32> to vector<64x64xf32>
    %135 = arith.subf %131, %134 : vector<64x64xf32>
    %136 = math.exp %135 : vector<64x64xf32>
    %cst_44 = arith.constant dense<0.000000e+00> : vector<64xf32>
    %137 = vector.multi_reduction <add>, %136, %cst_44 [1] : vector<64x64xf32> to vector<64xf32>
    %138 = vector.shape_cast %137 : vector<64xf32> to vector<64x1xf32>
    %139 = vector.broadcast %138 : vector<64x1xf32> to vector<64x64xf32>
    %140 = arith.divf %136, %139 : vector<64x64xf32>
    %141 = vector.broadcast %11 : vector<1x64xf32> to vector<64x64xf32>
    %142 = arith.mulf %94, %141 : vector<64x64xf32>
    %cst_45 = arith.constant dense<0.000000e+00> : vector<64x64xf32>
    %143 = tpu.matmul %140, %142, %cst_45 {dimension_numbers = #tpu.dot_dimension_numbers<[1], [0], [0], [1], [0, 0, 1, 1], [], []>} : vector<64x64xf32>, vector<64x64xf32>, vector<64x64xf32> -> vector<64x64xf32>
    %144 = arith.addf %120, %143 : vector<64x64xf32>
    %cst_46 = arith.constant 0.000000e+00 : f32
    %145 = vector.broadcast %cst_46 : f32 to vector<64x64xf32>
    %146 = arith.maximumf %144, %145 : vector<64x64xf32>
    %cst_47 = arith.constant dense<0.000000e+00> : vector<2x64xf32>
    %147 = tpu.matmul %16, %146, %cst_47 {dimension_numbers = #tpu.dot_dimension_numbers<[1], [0], [0], [1], [0, 0, 1, 1], [], []>} : vector<2x64xf32>, vector<64x64xf32>, vector<2x64xf32> -> vector<2x64xf32>
    %c7 = arith.constant 7 : index
    %c0_48 = arith.constant 0 : index
    %c0_49 = arith.constant 0 : index
    %148 = vector.load %arg4[%c7, %c0_48, %c0_49] : memref<10x64x64xf32, #tpu.memory_space<vmem>>, vector<1x64x64xf32>
    %149 = vector.shape_cast %148 : vector<1x64x64xf32> to vector<64x64xf32>
    %cst_50 = arith.constant dense<0.000000e+00> : vector<2x64xf32>
    %150 = tpu.matmul %147, %149, %cst_50 {dimension_numbers = #tpu.dot_dimension_numbers<[1], [0], [0], [1], [0, 0, 1, 1], [], []>} : vector<2x64xf32>, vector<64x64xf32>, vector<2x64xf32> -> vector<2x64xf32>
    %151 = arith.addf %84, %150 : vector<2x64xf32>
    %c2 = arith.constant 2 : index
    %c0_51 = arith.constant 0 : index
    %c0_52 = arith.constant 0 : index
    %152 = vector.load %arg4[%c2, %c0_51, %c0_52] : memref<10x64x64xf32, #tpu.memory_space<vmem>>, vector<1x64x64xf32>
    %153 = vector.shape_cast %152 : vector<1x64x64xf32> to vector<64x64xf32>
    %c5 = arith.constant 5 : index
    %c0_53 = arith.constant 0 : index
    %c0_54 = arith.constant 0 : index
    %154 = vector.load %arg4[%c5, %c0_53, %c0_54] : memref<10x64x64xf32, #tpu.memory_space<vmem>>, vector<1x64x64xf32>
    %155 = vector.shape_cast %154 : vector<1x64x64xf32> to vector<64x64xf32>
    %156 = vector.extract_strided_slice %155 {offsets = [0, 0], sizes = [1, 64], strides = [1, 1]} : vector<64x64xf32> to vector<1x64xf32>
    %157 = vector.extract_strided_slice %155 {offsets = [8, 0], sizes = [2, 64], strides = [1, 1]} : vector<64x64xf32> to vector<2x64xf32>
    %158 = vector.extract_strided_slice %155 {offsets = [16, 0], sizes = [2, 1], strides = [1, 1]} : vector<64x64xf32> to vector<2x1xf32>
    %cst_55 = arith.constant dense<0.000000e+00> : vector<64x64xf32>
    %159 = tpu.matmul %146, %153, %cst_55 {dimension_numbers = #tpu.dot_dimension_numbers<[1], [0], [0], [1], [0, 0, 1, 1], [], []>} : vector<64x64xf32>, vector<64x64xf32>, vector<64x64xf32> -> vector<64x64xf32>
    %160 = vector.broadcast %156 : vector<1x64xf32> to vector<64x64xf32>
    %161 = arith.addf %159, %160 : vector<64x64xf32>
    %cst_56 = arith.constant dense<0.000000e+00> : vector<2x64xf32>
    %162 = tpu.matmul %157, %146, %cst_56 {dimension_numbers = #tpu.dot_dimension_numbers<[1], [1], [0], [0], [0, 0, 1, 0], [], []>} : vector<2x64xf32>, vector<64x64xf32>, vector<2x64xf32> -> vector<2x64xf32>
    %163 = vector.broadcast %158 : vector<2x1xf32> to vector<2x64xf32>
    %164 = arith.addf %162, %163 : vector<2x64xf32>
    %165 = vector.extract_strided_slice %161 {offsets = [0, 60], sizes = [64, 1], strides = [1, 1]} : vector<64x64xf32> to vector<64x1xf32>
    %166 = vector.extract_strided_slice %164 {offsets = [0, 0], sizes = [1, 64], strides = [1, 1]} : vector<2x64xf32> to vector<1x64xf32>
    %167 = vector.broadcast %165 : vector<64x1xf32> to vector<64x64xf32>
    %168 = vector.broadcast %166 : vector<1x64xf32> to vector<64x64xf32>
    %169 = arith.addf %167, %168 : vector<64x64xf32>
    %cst_57 = arith.constant 0.000000e+00 : f32
    %170 = vector.broadcast %cst_57 : f32 to vector<64x64xf32>
    %171 = arith.cmpf oge, %169, %170 : vector<64x64xf32>
    %cst_58 = arith.constant 0.00999999977 : f32
    %172 = vector.broadcast %cst_58 : f32 to vector<64x64xf32>
    %173 = arith.mulf %172, %169 : vector<64x64xf32>
    %174 = arith.select %171, %169, %173 : vector<64x64xi1>, vector<64x64xf32>
    %175 = arith.addf %174, %14 : vector<64x64xf32>
    %cst_59 = arith.constant dense<0xFF800000> : vector<64xf32>
    %176 = vector.multi_reduction <maximumf>, %175, %cst_59 [1] : vector<64x64xf32> to vector<64xf32>
    %177 = vector.shape_cast %176 : vector<64xf32> to vector<64x1xf32>
    %178 = vector.broadcast %177 : vector<64x1xf32> to vector<64x64xf32>
    %179 = arith.subf %175, %178 : vector<64x64xf32>
    %180 = math.exp %179 : vector<64x64xf32>
    %cst_60 = arith.constant dense<0.000000e+00> : vector<64xf32>
    %181 = vector.multi_reduction <add>, %180, %cst_60 [1] : vector<64x64xf32> to vector<64xf32>
    %182 = vector.shape_cast %181 : vector<64xf32> to vector<64x1xf32>
    %183 = vector.broadcast %182 : vector<64x1xf32> to vector<64x64xf32>
    %184 = arith.divf %180, %183 : vector<64x64xf32>
    %185 = vector.broadcast %4 : vector<1x64xf32> to vector<64x64xf32>
    %186 = arith.mulf %161, %185 : vector<64x64xf32>
    %cst_61 = arith.constant dense<0.000000e+00> : vector<64x64xf32>
    %187 = tpu.matmul %184, %186, %cst_61 {dimension_numbers = #tpu.dot_dimension_numbers<[1], [0], [0], [1], [0, 0, 1, 1], [], []>} : vector<64x64xf32>, vector<64x64xf32>, vector<64x64xf32> -> vector<64x64xf32>
    %188 = vector.extract_strided_slice %161 {offsets = [0, 61], sizes = [64, 1], strides = [1, 1]} : vector<64x64xf32> to vector<64x1xf32>
    %189 = vector.extract_strided_slice %164 {offsets = [1, 0], sizes = [1, 64], strides = [1, 1]} : vector<2x64xf32> to vector<1x64xf32>
    %190 = vector.broadcast %188 : vector<64x1xf32> to vector<64x64xf32>
    %191 = vector.broadcast %189 : vector<1x64xf32> to vector<64x64xf32>
    %192 = arith.addf %190, %191 : vector<64x64xf32>
    %cst_62 = arith.constant 0.000000e+00 : f32
    %193 = vector.broadcast %cst_62 : f32 to vector<64x64xf32>
    %194 = arith.cmpf oge, %192, %193 : vector<64x64xf32>
    %cst_63 = arith.constant 0.00999999977 : f32
    %195 = vector.broadcast %cst_63 : f32 to vector<64x64xf32>
    %196 = arith.mulf %195, %192 : vector<64x64xf32>
    %197 = arith.select %194, %192, %196 : vector<64x64xi1>, vector<64x64xf32>
    %198 = arith.addf %197, %14 : vector<64x64xf32>
    %cst_64 = arith.constant dense<0xFF800000> : vector<64xf32>
    %199 = vector.multi_reduction <maximumf>, %198, %cst_64 [1] : vector<64x64xf32> to vector<64xf32>
    %200 = vector.shape_cast %199 : vector<64xf32> to vector<64x1xf32>
    %201 = vector.broadcast %200 : vector<64x1xf32> to vector<64x64xf32>
    %202 = arith.subf %198, %201 : vector<64x64xf32>
    %203 = math.exp %202 : vector<64x64xf32>
    %cst_65 = arith.constant dense<0.000000e+00> : vector<64xf32>
    %204 = vector.multi_reduction <add>, %203, %cst_65 [1] : vector<64x64xf32> to vector<64xf32>
    %205 = vector.shape_cast %204 : vector<64xf32> to vector<64x1xf32>
    %206 = vector.broadcast %205 : vector<64x1xf32> to vector<64x64xf32>
    %207 = arith.divf %203, %206 : vector<64x64xf32>
    %208 = vector.broadcast %11 : vector<1x64xf32> to vector<64x64xf32>
    %209 = arith.mulf %161, %208 : vector<64x64xf32>
    %cst_66 = arith.constant dense<0.000000e+00> : vector<64x64xf32>
    %210 = tpu.matmul %207, %209, %cst_66 {dimension_numbers = #tpu.dot_dimension_numbers<[1], [0], [0], [1], [0, 0, 1, 1], [], []>} : vector<64x64xf32>, vector<64x64xf32>, vector<64x64xf32> -> vector<64x64xf32>
    %211 = arith.addf %187, %210 : vector<64x64xf32>
    %cst_67 = arith.constant 0.000000e+00 : f32
    %212 = vector.broadcast %cst_67 : f32 to vector<64x64xf32>
    %213 = arith.maximumf %211, %212 : vector<64x64xf32>
    %cst_68 = arith.constant dense<0.000000e+00> : vector<2x64xf32>
    %214 = tpu.matmul %16, %213, %cst_68 {dimension_numbers = #tpu.dot_dimension_numbers<[1], [0], [0], [1], [0, 0, 1, 1], [], []>} : vector<2x64xf32>, vector<64x64xf32>, vector<2x64xf32> -> vector<2x64xf32>
    %c8 = arith.constant 8 : index
    %c0_69 = arith.constant 0 : index
    %c0_70 = arith.constant 0 : index
    %215 = vector.load %arg4[%c8, %c0_69, %c0_70] : memref<10x64x64xf32, #tpu.memory_space<vmem>>, vector<1x64x64xf32>
    %216 = vector.shape_cast %215 : vector<1x64x64xf32> to vector<64x64xf32>
    %cst_71 = arith.constant dense<0.000000e+00> : vector<2x64xf32>
    %217 = tpu.matmul %214, %216, %cst_71 {dimension_numbers = #tpu.dot_dimension_numbers<[1], [0], [0], [1], [0, 0, 1, 1], [], []>} : vector<2x64xf32>, vector<64x64xf32>, vector<2x64xf32> -> vector<2x64xf32>
    %218 = arith.addf %151, %217 : vector<2x64xf32>
    %c9 = arith.constant 9 : index
    %c0_72 = arith.constant 0 : index
    %c0_73 = arith.constant 0 : index
    %219 = vector.load %arg4[%c9, %c0_72, %c0_73] : memref<10x64x64xf32, #tpu.memory_space<vmem>>, vector<1x64x64xf32>
    %220 = vector.shape_cast %219 : vector<1x64x64xf32> to vector<64x64xf32>
    %221 = vector.extract_strided_slice %220 {offsets = [0, 0], sizes = [1, 64], strides = [1, 1]} : vector<64x64xf32> to vector<1x64xf32>
    %222 = vector.broadcast %221 : vector<1x64xf32> to vector<2x64xf32>
    %223 = arith.addf %218, %222 : vector<2x64xf32>
    %224 = vector.extract_strided_slice %223 {offsets = [0, 0], sizes = [2, 10], strides = [1, 1]} : vector<2x64xf32> to vector<2x10xf32>
    %cst_74 = arith.constant dense<0xFF800000> : vector<2xf32>
    %225 = vector.multi_reduction <maximumf>, %224, %cst_74 [1] : vector<2x10xf32> to vector<2xf32>
    %226 = vector.shape_cast %225 : vector<2xf32> to vector<2x1xf32>
    %227 = vector.broadcast %226 : vector<2x1xf32> to vector<2x10xf32>
    %228 = arith.subf %224, %227 : vector<2x10xf32>
    %229 = math.exp %228 : vector<2x10xf32>
    %cst_75 = arith.constant dense<0.000000e+00> : vector<2xf32>
    %230 = vector.multi_reduction <add>, %229, %cst_75 [1] : vector<2x10xf32> to vector<2xf32>
    %231 = vector.shape_cast %230 : vector<2xf32> to vector<2x1xf32>
    %232 = vector.broadcast %231 : vector<2x1xf32> to vector<2x10xf32>
    %233 = arith.divf %229, %232 : vector<2x10xf32>
    %c0_76 = arith.constant 0 : index
    %c0_77 = arith.constant 0 : index
    %c0_78 = arith.constant 0 : index
    %234 = vector.load %arg5[%c0_76, %c0_77, %c0_78] : memref<1x2x10xf32, #tpu.memory_space<vmem>>, vector<1x2x10xf32>
    %235 = vector.shape_cast %234 : vector<1x2x10xf32> to vector<2x10xf32>
    %236 = vector.shape_cast %233 : vector<2x10xf32> to vector<1x2x10xf32>
    tpu.vector_store %arg5[%c0_76, %c0_77, %c0_78], %236 {strides = array<i32>} : memref<1x2x10xf32, #tpu.memory_space<vmem>>, vector<1x2x10xf32>,
    return
  }
  func.func @transform_0(%arg0: i32) -> (i32, i32) {
    %c0_i32 = arith.constant 0 : i32
    %c0_i32_0 = arith.constant 0 : i32
    return %arg0, %c0_i32 : i32, i32
  }
  func.func @transform_1(%arg0: i32) -> (i32, i32, i32) {
    %c0_i32 = arith.constant 0 : i32
    %c0_i32_0 = arith.constant 0 : i32
    %c0_i32_1 = arith.constant 0 : i32
    return %arg0, %c0_i32, %c0_i32_0 : i32, i32, i32
  }
  func.func @transform_2(%arg0: i32) -> (i32, i32, i32) {
    %c0_i32 = arith.constant 0 : i32
    %c0_i32_0 = arith.constant 0 : i32
    %c0_i32_1 = arith.constant 0 : i32
    return %arg0, %c0_i32, %c0_i32_0 : i32, i32, i32
  }
  func.func @transform_3(%arg0: i32) -> (i32, i32, i32) {
    %c0_i32 = arith.constant 0 : i32
    %c0_i32_0 = arith.constant 0 : i32
    %c0_i32_1 = arith.constant 0 : i32
    %c0_i32_2 = arith.constant 0 : i32
    return %c0_i32, %c0_i32_0, %c0_i32_1 : i32, i32, i32
  }
  func.func @transform_4(%arg0: i32) -> (i32, i32, i32) {
    %c0_i32 = arith.constant 0 : i32
    %c0_i32_0 = arith.constant 0 : i32
    %c0_i32_1 = arith.constant 0 : i32
    return %arg0, %c0_i32, %c0_i32_0 : i32, i32, i32
  }
}

</mosaic_0001>

<bundles_post_ra>
// kernel: tpu_custom_call.1
= control target key start
LH: loop header
LB: loop body
LE: loop exit
PB: predicated region body
PF: predicated region fallthrough
CT: control target
= control target key end

     0   :  { %9 = vsyncpa [#allocation3], 0  ;;  %s4741_s0 = inlined_call_operand.vmem [shape: f32[128,64], index: 0, kind: input, shape index: {}]   ;;  %s4742_s1 = inlined_call_operand.vmem [shape: f32[2,64,64], index: 1, kind: input, shape index: {}]   ;;  %s4743_s2 = inlined_call_operand.vmem [shape: f32[2,2,64], index: 2, kind: input, shape index: {}]   ;;  %s4744_s3 = inlined_call_operand.hbm [shape: f32[10,64,64], index: 3, kind: input, shape index: {}]   ;;  %s4745_s4 = inlined_call_operand.hbm [shape: f32[2,2,10], index: 4, kind: output, shape index: {}]  }
   0x1   :  { %10 = vsyncpa [#allocation4], 0 }
   0x2   :  { %12 = vsyncpa [#allocation4 + $0x1], 0  ;;  %s3539_s15 = smov 0   ;;  %s3541_s16 = smov 0  }
   0x3   :  { %s3543_s17 = smov 0   ;;  %s3545_s18 = smov 0  }
   0x4 LB: > { %s3560_s19 = sadd.s32 4294967295, %s3505_s18   ;;  %s2977_s20 = sadd.s32 4294967294, %s3505_s18   ;;  %s3505_s18 = sphi %s3545_s18, %s4761_s18   ;;  %s3501_s17 = sphi %s3543_s17, %s4760_s17   ;;  %s3497_s16 = sphi %s3541_s16, %s4759_s16   ;;  %s3493_s15 = sphi %s3539_s15, %s4758_s15  }
   0x5   : > { %s3564_s21 = sadd.s32 1, %s3505_s18   ;;  %s124_s22 = sadd.s32 1, %s3501_s17 }
   0x6   : > { %s121_s23 = ssub.s32 %s3505_s18, %s3564_s21  ;;  %p134_p0 = scmp.ne.s32.totalorder %s3501_s17, %s3497_s16 }
   0x7   : > { %p122_p1 = scmp.eq.s32.totalorder %s121_s23, 0  ;;  %p135_p2 = scmp.eq.s32.totalorder %s3560_s19, 1 }
   0x8   : > { %p140_p3 = scmp.ne.s32.totalorder %s3497_s16, %s3493_s15  ;;  %p141_p4 = scmp.eq.s32.totalorder %s2977_s20, 1 }
   0x9   : > { %s3575_s24 = scalar_select %p122_p1, %s3501_s17, %s124_s22  }
   0xa   : > { %p3577_p5 = por %p135_p2, %p134_p0  ;;  %p3581_p6 = por %p141_p4, %p140_p3 }
   0xb   : > { %p2978_p7 = scmp.ge.s32.totalorder %s3505_s18, 1  ;;  %p148_p8 = scmp.lt.s32.totalorder %s3505_s18, 3 }
   0xc   : > { %p3123_p9 = scmp.eq.s32.totalorder %s3560_s19, 0  ;;  %s159_s29 = sshll.u32 %s4744_s3, 4  ;;  %s160_s29 = int_to_ptr.hbm [resolvable:$true] %s159_s29 }
   0xd   : > { %p149_p10 = pnand %p2978_p7, %p148_p8  ;;  %s3507_s30 = smov [#allocation2]  }
   0xe   : > { %s161_s5 = sshll.u32 %s3507_s30, 4  ;;  %s3508_s6 = smov 128   ;;  %s162_s5 = int_to_ptr.vmem [resolvable:$true] %s161_s5 }
   0xf   : > { %p3115_p11 = pneg %p149_p10  ;;  %s3509_s7 = smov 8  }
  0x10   : > { %201 = sbr.rel (%p149_p10) target bundleno = 2936 (0xb78), region = 36 }
  0x11   : > { %p3116_p12 = pnand %p3123_p9, %p3115_p11 }
  0x13   : > { %3118 = dma.hbm_to_vmem [thread:$0]  (!%p3116_p12), %s160_s29, 10240, %s162_s5, [#allocation3], %s3508_s6, %s3508_s6, %s3509_s7  }
  0x15   : > { %3484 = dma.done.wait (%p3123_p9), [#allocation3], 10240  }
  0x16   : > { %3486 = vsyncadd (%p3123_p9), [#allocation3], 4294957056  ;;  %s2984_s8 = sshll.u32 %s3560_s19, 3  ;;  %v286_v0 = vld [vmem:[#allocation2 + $0x38] sm:$0xff]  ;;  %v285_v1 = vld [vmem:[#allocation2 + $0x30] sm:$0xff]  ;;  %vm292_vm0 = vcmask 523264   ;;  %v252_v35 = vlaneseq }
  0x17   : > { %p238_p13 = scmp.lt.s32.totalorder %s2984_s8, 15  ;;  %325 = vmatpush.msra.mxu0 %v286_v0  ;;  %v284_v2 = vld [vmem:[#allocation2 + $0x28] sm:$0xff]  ;;  %v283_v3 = vld [vmem:[#allocation2 + $0x20] sm:$0xff]  ;;  %v282_v4 = vld [vmem:[#allocation2 + $0x18] sm:$0xff]  ;;  %v3510_v16 = vmov 0   ;;  %v3511_v19 = vmov 61  }
  0x18   : > { %v281_v5 = vld [vmem:[#allocation2 + $0x10] sm:$0xff]  ;;  %v280_v6 = vld [vmem:[#allocation2 + $0x8] sm:$0xff]  ;;  %v279_v7 = vld [vmem:[#allocation2] sm:$0xff]  ;;  %3165 = vset.pattern.permute.xlu0 %v3510_v16  ;;  %3167 = vset.pattern.permute.xlu1 %v3511_v19  ;;  %v3512_v20 = vmov 60   ;;  %v253_v37 = vand.u32 127, %v252_v35  ;;  %v3513_v41 = vmov 0.0  }
  0x19   : > { %326 = vmatpush.msra.mxu0 %v285_v1  ;;  %s4763_s8 = smov (!%p238_p13, %s2984_s8), 15  ;;  %v290_v15 = vld [vmem:[#allocation2 + $0xd0] sm:$0xff]  ;;  %v289_v18 = vld [vmem:[#allocation2 + $0xc8] sm:$0xff]  ;;  %3169 = vset.pattern.permute.xlu2 %v3511_v19  ;;  %v288_v21 = vld [vmem:[#allocation2 + $0xc0] sm:$0xff]  ;;  %p243_p0 = scmp.lt.s32.totalorder %s3560_s19, 1 }
  0x1a   : > { %s2985_s9 = sshll.u32 %s4763_s8, 3  ;;  %360 = vperm.xlu0 %3165, %v290_v15   ;;  %v291_v22 = vperm.slane %v288_v21, 0  ;;  %vm257_vm1 = vcmp.ge.s32.totalorder %v253_v37, 30  ;;  %vm258_vm2 = vcmp.lt.s32.totalorder %v253_v37, 60  ;;  %vm254_vm4 = vcmp.lt.s32.totalorder %v253_v37, 30  ;;  %s234_s5 = sand.u32 1, %s3497_s16  }
  0x1b   : > { %327 = vmatpush.msra.mxu0 %v284_v2  ;;  %s241_s12 = scalar_lea.vmem %s4741_s0, %s2985_s9  ;;  %vm259_vm3 = vmand %vm257_vm1, %vm258_vm2  ;;  %v3641_v43 = vsel %vm254_vm4, 1.0, %v3513_v41  ;;  %s2983_s6 = sshll.u32 %s234_s5, 1 }
  0x1c   : > { %v262_v8 = vld [vmem:[%s241_s12] sm:$0xff]  ;;  %v263_v9 = vld [vmem:[%s241_s12 + $0x8] sm:$0xff]  ;;  %v264_v10 = vld [vmem:[%s241_s12 + $0x10] sm:$0xff]  ;;  %v3639_v42 = vsel %vm259_vm3, 1.0, %v3513_v41  ;;  %s3669_s13 = scalar_select %p243_p0, %s3560_s19, 1 }
  0x1d   : > { %328 = vmatpush.msra.mxu0 %v283_v3  ;;  %v269_v11 = vld [vmem:[%s241_s12 + $0x38] sm:$0xff]  ;;  %v268_v12 = vld [vmem:[%s241_s12 + $0x30] sm:$0xff]  ;;  %v267_v14 = vld [vmem:[%s241_s12 + $0x28] sm:$0xff]  ;;  %s3097_s7 = sshll.u32 %s3560_s19, 1  ;;  %s236_s11 = scalar_lea.vmem [#allocation5], %s2983_s6 }
  0x1e   : > { %2999 = vmatpush.xpose.msk.msra.mxu1 %vm292_vm0, %v269_v11  ;;  %v265_v13 = vld [vmem:[%s241_s12 + $0x18] sm:$0xff]  ;;  %v266_v17 = vld [vmem:[%s241_s12 + $0x20] sm:$0xff]  ;;  %s3100_s14 = sshll.u32 %s3669_s13, 6  ;;  %s2988_s27 = sshll.u32 %s3669_s13, 1 }
  0x1f   : > { %329 = vmatpush.msra.mxu0 %v282_v4  ;;  %s3681_s23 = scalar_lea.vmem %s4742_s1, %s3100_s14  ;;  %s3956_s30 = scalar_lea.vmem %s4743_s2, %s2988_s27 }
  0x20   : > { %s2877_s10 = scalar_lea.hbm %s4745_s4, %s3097_s7  ;;  %s2879_s12 = sshll.u32 %s236_s11, 4  ;;  %s2880_s12 = int_to_ptr.vmem [resolvable:$true] %s2879_s12 }
  0x21   : > { %330 = vmatpush.msra.mxu0 %v281_v5  ;;  %s2881_s13 = sshll.u32 %s2877_s10, 4  ;;  %s2867_s19 = scalar_lea.sflag [#allocation4], %s234_s5  ;;  %s2882_s13 = int_to_ptr.hbm [resolvable:$true] %s2881_s13 }
  0x22   : > { %3000 = vmatpush.xpose.msk.msra.mxu1 %vm292_vm0, %v268_v12  ;;  %3166 = vset.pattern.permute.xlu0 %v3512_v20  ;;  %s3453_s14 = sshra.s32 %s2882_s13, 4  ;;  %s3459_s27 = scalar_lea.hbm %s4745_s4, 4  ;;  %s3454_s14 = int_to_ptr.hbm [resolvable:$true] %s3453_s14 }
  0x23   : > { %331 = vmatpush.msra.mxu0 %v280_v6  ;;  %s3455_s20 = scalar_lea.hbm %s3454_s14, 2  ;;  %p3460_p4 = scmp.lt.s32.totalorder %s3454_s14, %s4745_s4 }
  0x24   : > { %p3456_p1 = scmp.ne.s32.totalorder %s3454_s14, %s3455_s20  ;;  %p3461_p7 = scmp.lt.s32.totalorder %s3459_s27, %s3455_s20 }
  0x25   : > { %332 = vmatpush.msra.mxu0 %v279_v7  ;;  %v270_v7 = vld [vmem:[%s3681_s23] sm:$0xff] }
  0x26   : > { %2991 = vmatmul.msk.f32.vlgmr.msra.gmra.mxu0 %vm292_vm0, %v262_v8  ;;  %3001 = vmatpush.xpose.msk.msra.mxu1 %vm292_vm0, %v267_v14  ;;  %p3457_p2 = pnand %p3456_p1, %p3577_p5  ;;  %p3462_p8 = por %p3461_p7, %p3460_p4 }
  0x28   : > { %p3458_p3 = pneg %p3457_p2 }
  0x2a   : > { %3002 = vmatpush.xpose.msk.msra.mxu1 %vm292_vm0, %v266_v17  ;;  %p3463_p9 = pnand %p3462_p8, %p3458_p3 }
  0x2e   : > { %2992 = vmatmul.msk.f32.gmra.mxu0 %vm292_vm0, %v263_v9  ;;  %3003 = vmatpush.xpose.msk.msra.mxu1 %vm292_vm0, %v265_v13 }
  0x32   : > { %3004 = vmatpush.xpose.msk.msra.mxu1 %vm292_vm0, %v264_v10 }
  0x36   : > { %2993 = vmatmul.msk.f32.gmra.mxu0 %vm292_vm0, %v264_v10  ;;  %3005 = vmatpush.xpose.msk.msra.mxu1 %vm292_vm0, %v263_v9 }
  0x3a   : > { %3006 = vmatpush.xpose.msk.msra.mxu1 %vm292_vm0, %v262_v8 }
  0x3d   : > { %3007 = vmatmul.msk.f32.vlgmr.msra.gmra.mxu1 %vm292_vm0, %v289_v18 }
  0x3e   : > { %2994 = vmatmul.msk.f32.gmra.mxu0 %vm292_vm0, %v265_v13 }
  0x46   : > { %2995 = vmatmul.msk.f32.gmra.mxu0 %vm292_vm0, %v266_v17 }
  0x4e   : > { %2996 = vmatmul.msk.f32.gmra.mxu0 %vm292_vm0, %v267_v14 }
  0x56   : > { %2997 = vmatmul.msk.f32.gmra.mxu0 %vm292_vm0, %v268_v12 }
  0x5e   : > { %2998 = vmatmul.msk.f32.gmra.mxu0 %vm292_vm0, %v269_v11 }
  0x8c   : > { %v361_v60 = vpop.permute.xlu0 %360 }
  0xa3   : > { %v334_v23 = vpop.f32.mrf.mxu0 }
  0xa4   : > { %v3622_v24 = vadd.f32 %v334_v23, %v291_v22 }
  0xa6   : > { %668 = vperm.xlu1 %3167, %v3622_v24   ;;  %388 = vperm.xlu0 %3166, %v3622_v24   ;;  %v932_v58 = vmul.f32 %v3639_v42, %v3622_v24  ;;  %v659_v59 = vmul.f32 %v3641_v43, %v3622_v24 }
  0xab   : > { %v337_v25 = vpop.f32.mrf.mxu0 }
  0xac   : > { %v3626_v26 = vadd.f32 %v337_v25, %v291_v22 }
  0xae   : > { %672 = vperm.xlu2 %3169, %v3626_v26   ;;  %3168 = vset.pattern.permute.xlu1 %v3512_v20  ;;  %v933_v56 = vmul.f32 %v3639_v42, %v3626_v26  ;;  %v660_v57 = vmul.f32 %v3641_v43, %v3626_v26 }
  0xaf   : > { %393 = vperm.xlu1 %3168, %v3626_v26   ;;  %3172 = vset.pattern.permute.xlu0 %v3511_v19 }
  0xb3   : > { %v340_v27 = vpop.f32.mrf.mxu0 }
  0xb4   : > { %v341_v28 = vadd.f32 %v340_v27, %v291_v22 }
  0xb6   : > { %3170 = vset.pattern.permute.xlu2 %v3512_v20  ;;  %v934_v54 = vmul.f32 %v3639_v42, %v341_v28  ;;  %v661_v55 = vmul.f32 %v3641_v43, %v341_v28 }
  0xb7   : > { %398 = vperm.xlu2 %3170, %v341_v28   ;;  %3171 = vset.pattern.permute.xlu1 %v3511_v19 }
  0xb8   : > { %676 = vperm.xlu1 %3171, %v341_v28  }
  0xba   : > { %v383_v61 = vpop.f32.mrf.mxu1 }
  0xbb   : > { %v343_v29 = vpop.f32.mrf.mxu0  ;;  %v384_v62 = vadd.f32 %v383_v61, %v361_v60 }
  0xbc   : > { %v344_v30 = vadd.f32 %v343_v29, %v291_v22 }
  0xbd   : > { %v3671_v0 = vperm.slane %v384_v62, 1  ;;  %v3674_v1 = vperm.slane %v384_v62, 0 }
  0xbe   : > { %680 = vperm.xlu0 %3172, %v344_v30   ;;  %v935_v52 = vmul.f32 %v3639_v42, %v344_v30  ;;  %v662_v53 = vmul.f32 %v3641_v43, %v344_v30 }
  0xbf   : > { %403 = vperm.xlu2 %3170, %v344_v30  }
  0xc0   : > { %3173 = vset.pattern.permute.xlu1 %v3512_v20 }
  0xc3   : > { %v346_v31 = vpop.f32.mrf.mxu0 }
  0xc4   : > { %v347_v32 = vadd.f32 %v346_v31, %v291_v22 }
  0xc6   : > { %408 = vperm.xlu1 %3173, %v347_v32   ;;  %v936_v50 = vmul.f32 %v3639_v42, %v347_v32  ;;  %v663_v51 = vmul.f32 %v3641_v43, %v347_v32 }
  0xc7   : > { %3174 = vset.pattern.permute.xlu2 %v3511_v19 }
  0xc8   : > { %684 = vperm.xlu2 %3174, %v347_v32  }
  0xcb   : > { %v349_v33 = vpop.f32.mrf.mxu0 }
  0xcc   : > { %v350_v34 = vadd.f32 %v349_v33, %v291_v22 }
  0xce   : > { %413 = vperm.xlu1 %3173, %v350_v34   ;;  %v937_v48 = vmul.f32 %v3639_v42, %v350_v34  ;;  %v664_v49 = vmul.f32 %v3641_v43, %v350_v34 }
  0xd0   : > { %688 = vperm.xlu2 %3174, %v350_v34   ;;  %v272_v34 = vld [vmem:[%s3681_s23 + $0x10] sm:$0xff] }
  0xd3   : > { %v352_v36 = vpop.f32.mrf.mxu0 }
  0xd4   : > { %v353_v38 = vadd.f32 %v352_v36, %v291_v22 }
  0xd6   : > { %v938_v46 = vmul.f32 %v3639_v42, %v353_v38  ;;  %v665_v47 = vmul.f32 %v3641_v43, %v353_v38 }
  0xd8   : > { %3175 = vset.pattern.permute.xlu2 %v3512_v20 }
  0xd9   : > { %418 = vperm.xlu2 %3175, %v353_v38  }
  0xdb   : > { %v355_v39 = vpop.f32.mrf.mxu0 }
  0xdc   : > { %v3637_v40 = vadd.f32 %v355_v39, %v291_v22  ;;  %v271_v22 = vld [vmem:[%s3681_s23 + $0x8] sm:$0xff] }
  0xde   : > { %v939_v44 = vmul.f32 %v3639_v42, %v3637_v40  ;;  %v666_v45 = vmul.f32 %v3641_v43, %v3637_v40 }
  0xe0   : > { %972 = vmatpush.msra.mxu2 %v939_v44  ;;  %1037 = vmatpush.msra.mxu3 %v666_v45 }
  0xe1   : > { %3176 = vset.pattern.permute.xlu2 %v3511_v19 }
  0xe2   : > { %973 = vmatpush.msra.mxu2 %v938_v46  ;;  %1038 = vmatpush.msra.mxu3 %v665_v47 }
  0xe3   : > { %692 = vperm.xlu2 %3176, %v353_v38  }
  0xe4   : > { %974 = vmatpush.msra.mxu2 %v937_v48  ;;  %1039 = vmatpush.msra.mxu3 %v664_v49 }
  0xe6   : > { %975 = vmatpush.msra.mxu2 %v936_v50  ;;  %1040 = vmatpush.msra.mxu3 %v663_v51 }
  0xe8   : > { %976 = vmatpush.msra.mxu2 %v935_v52  ;;  %1041 = vmatpush.msra.mxu3 %v662_v53  ;;  %v274_v52 = vld [vmem:[%s3681_s23 + $0x20] sm:$0xff] }
  0xea   : > { %977 = vmatpush.msra.mxu2 %v934_v54  ;;  %1042 = vmatpush.msra.mxu3 %v661_v55 }
  0xeb   : > { %3178 = vset.pattern.permute.xlu2 %v3512_v20 }
  0xec   : > { %978 = vmatpush.msra.mxu2 %v933_v56  ;;  %1043 = vmatpush.msra.mxu3 %v660_v57 }
  0xee   : > { %979 = vmatpush.msra.mxu2 %v932_v58  ;;  %1044 = vmatpush.msra.mxu3 %v659_v59 }
 0x108   : > { %v673_v63 = vpop.permute.xlu2 %672 }
 0x109   : > { %v701_v6 = vadd.f32 %v3671_v0, %v673_v63 }
 0x10b   : > { %v717_v12 = vmul.f32 0.01, %v701_v6  ;;  %vm709_vm7 = vcmp.ge.f32.partialorder %v701_v6, 0.0 }
 0x10d   : > { %v725_v23 = vsel %vm709_vm7, %v701_v6, %v717_v12 }
 0x10e   : > { %v3696_v27 = vadd.f32 %v725_v23, %v271_v22  ;;  %v276_v23 = vld [vmem:[%s3681_s23 + $0x30] sm:$0xff] }
 0x110   : > { %v743_v31 = vsel %vm292_vm0, %v3696_v27, -inf }
 0x111   : > { %v399_v15 = vpop.permute.xlu2 %398 }
 0x112   : > { %v429_v24 = vadd.f32 %v3674_v1, %v399_v15 }
 0x114   : > { %v445_v28 = vmul.f32 0.01, %v429_v24  ;;  %vm437_vm9 = vcmp.ge.f32.partialorder %v429_v24, 0.0 }
 0x116   : > { %v453_v35 = vsel %vm437_vm9, %v429_v24, %v445_v28  ;;  %v273_v28 = vld [vmem:[%s3681_s23 + $0x18] sm:$0xff] }
 0x117   : > { %v3706_v38 = vadd.f32 %v453_v35, %v272_v34 }
 0x118   : > { %v669_v2 = vpop.permute.xlu1 %668  ;;  %v389_v3 = vpop.permute.xlu0 %388 }
 0x119   : > { %v700_v4 = vadd.f32 %v3671_v0, %v669_v2  ;;  %v427_v5 = vadd.f32 %v3674_v1, %v389_v3  ;;  %v404_v37 = vpop.permute.xlu2 %403  ;;  %v473_v41 = vsel %vm292_vm0, %v3706_v38, -inf  ;;  %v275_v3 = vld [vmem:[%s3681_s23 + $0x28] sm:$0xff] }
 0x11b   : > { %vm708_vm5 = vcmp.ge.f32.partialorder %v700_v4, 0.0  ;;  %v716_v8 = vmul.f32 0.01, %v700_v4  ;;  %vm435_vm6 = vcmp.ge.f32.partialorder %v427_v5, 0.0  ;;  %v443_v9 = vmul.f32 0.01, %v427_v5 }
 0x11d   : > { %v724_v10 = vsel %vm708_vm5, %v700_v4, %v716_v8  ;;  %v451_v11 = vsel %vm435_vm6, %v427_v5, %v443_v9 }
 0x11e   : > { %v3685_v13 = vadd.f32 %v724_v10, %v270_v7  ;;  %v3687_v14 = vadd.f32 %v451_v11, %v270_v7  ;;  %v430_v10 = vadd.f32 %v3674_v1, %v404_v37 }
 0x120   : > { %v740_v17 = vsel %vm292_vm0, %v3685_v13, -inf  ;;  %v467_v18 = vsel %vm292_vm0, %v3687_v14, -inf  ;;  %vm438_vm1 = vcmp.ge.f32.partialorder %v430_v10, 0.0 }
 0x121   : > { %741 = vmax.xlane.f32.xlu1 %v740_v17  ;;  %v394_v21 = vpop.permute.xlu1 %393  ;;  %468 = vmax.xlane.f32.xlu0 %v467_v18  ;;  %v446_v18 = vmul.f32 0.01, %v430_v10 }
 0x122   : > { %v428_v25 = vadd.f32 %v3674_v1, %v394_v21  ;;  %v685_v46 = vpop.permute.xlu2 %684 }
 0x123   : > { %v704_v50 = vadd.f32 %v3671_v0, %v685_v46 }
 0x124   : > { %vm436_vm8 = vcmp.ge.f32.partialorder %v428_v25, 0.0  ;;  %v444_v26 = vmul.f32 0.01, %v428_v25 }
 0x125   : > { %v720_v54 = vmul.f32 0.01, %v704_v50  ;;  %vm712_vm12 = vcmp.ge.f32.partialorder %v704_v50, 0.0 }
 0x126   : > { %v452_v29 = vsel %vm436_vm8, %v428_v25, %v444_v26 }
 0x127   : > { %v3698_v30 = vadd.f32 %v452_v29, %v271_v22  ;;  %v728_v59 = vsel %vm712_vm12, %v704_v50, %v720_v54  ;;  %v454_v29 = vsel %vm438_vm1, %v430_v10, %v446_v18  ;;  %v277_v10 = vld [vmem:[%s3681_s23 + $0x38] sm:$0xff] }
 0x128   : > { %v3725_v61 = vadd.f32 %v728_v59, %v274_v52 }
 0x129   : > { %744 = vmax.xlane.f32.xlu0 %v743_v31  ;;  %v470_v32 = vsel %vm292_vm0, %v3698_v30, -inf }
 0x12a   : > { %471 = vmax.xlane.f32.xlu2 %v470_v32  ;;  %v677_v33 = vpop.permute.xlu1 %676  ;;  %v689_v60 = vpop.permute.xlu2 %688  ;;  %v752_v62 = vsel %vm292_vm0, %v3725_v61, -inf  ;;  %v3748_v32 = vadd.f32 %v454_v29, %v273_v28 }
 0x12b   : > { %v702_v36 = vadd.f32 %v3671_v0, %v677_v33  ;;  %v705_v63 = vadd.f32 %v3671_v0, %v689_v60 }
 0x12c   : > { %v476_v37 = vsel %vm292_vm0, %v3748_v32, -inf }
 0x12d   : > { %v718_v39 = vmul.f32 0.01, %v702_v36  ;;  %vm710_vm10 = vcmp.ge.f32.partialorder %v702_v36, 0.0  ;;  %v721_v5 = vmul.f32 0.01, %v705_v63  ;;  %vm713_vm14 = vcmp.ge.f32.partialorder %v705_v63, 0.0 }
 0x12f   : > { %v726_v44 = vsel %vm710_vm10, %v702_v36, %v718_v39  ;;  %v729_v9 = vsel %vm713_vm14, %v705_v63, %v721_v5 }
 0x130   : > { %v3710_v45 = vadd.f32 %v726_v44, %v272_v34  ;;  %v681_v11 = vpop.permute.xlu0 %680  ;;  %v3738_v12 = vadd.f32 %v729_v9, %v275_v3 }
 0x131   : > { %v703_v17 = vadd.f32 %v3671_v0, %v681_v11 }
 0x132   : > { %474 = vmax.xlane.f32.xlu2 %v473_v41  ;;  %v746_v49 = vsel %vm292_vm0, %v3710_v45, -inf  ;;  %v755_v22 = vsel %vm292_vm0, %v3738_v12, -inf }
 0x133   : > { %v419_v6 = vpop.permute.xlu2 %418  ;;  %v719_v25 = vmul.f32 0.01, %v703_v17  ;;  %vm711_vm2 = vcmp.ge.f32.partialorder %v703_v17, 0.0 }
 0x134   : > { %v433_v8 = vadd.f32 %v3674_v1, %v419_v6 }
 0x135   : > { %v727_v33 = vsel %vm711_vm2, %v703_v17, %v719_v25 }
 0x136   : > { %v449_v15 = vmul.f32 0.01, %v433_v8  ;;  %vm441_vm15 = vcmp.ge.f32.partialorder %v433_v8, 0.0  ;;  %v3752_v36 = vadd.f32 %v727_v33, %v273_v28 }
 0x138   : > { %v409_v47 = vpop.permute.xlu1 %408  ;;  %v457_v24 = vsel %vm441_vm15, %v433_v8, %v449_v15  ;;  %v749_v41 = vsel %vm292_vm0, %v3752_v36, -inf }
 0x139   : > { %v431_v48 = vadd.f32 %v3674_v1, %v409_v47  ;;  %v3746_v31 = vadd.f32 %v457_v24, %v276_v23 }
 0x13a   : > { %423 = vperm.xlu1 %3173, %v3637_v40   ;;  %747 = vmax.xlane.f32.xlu2 %v746_v49 }
 0x13b   : > { %vm439_vm11 = vcmp.ge.f32.partialorder %v431_v48, 0.0  ;;  %v447_v51 = vmul.f32 0.01, %v431_v48  ;;  %v485_v35 = vsel %vm292_vm0, %v3746_v31, -inf }
 0x13d   : > { %696 = vperm.xlu0 %3172, %v3637_v40   ;;  %v455_v53 = vsel %vm439_vm11, %v431_v48, %v447_v51  ;;  %v693_v21 = vpop.permute.xlu2 %692 }
 0x13e   : > { %v3719_v55 = vadd.f32 %v455_v53, %v274_v52  ;;  %v706_v26 = vadd.f32 %v3671_v0, %v693_v21 }
 0x140   : > { %v414_v56 = vpop.permute.xlu1 %413  ;;  %v479_v57 = vsel %vm292_vm0, %v3719_v55, -inf  ;;  %v722_v34 = vmul.f32 0.01, %v706_v26  ;;  %vm714_vm3 = vcmp.ge.f32.partialorder %v706_v26, 0.0 }
 0x141   : > { %v432_v58 = vadd.f32 %v3674_v1, %v414_v56 }
 0x142   : > { %480 = vmax.xlane.f32.xlu2 %v479_v57  ;;  %3179 = vset.pattern.permute.xlu1 %v3511_v19  ;;  %v730_v39 = vsel %vm714_vm3, %v706_v26, %v722_v34 }
 0x143   : > { %v448_v40 = vmul.f32 0.01, %v432_v58  ;;  %vm440_vm13 = vcmp.ge.f32.partialorder %v432_v58, 0.0  ;;  %v3758_v44 = vadd.f32 %v730_v39, %v276_v23 }
 0x145   : > { %3177 = vset.pattern.permute.xlu0 %v3510_v16  ;;  %v456_v2 = vsel %vm440_vm13, %v432_v58, %v448_v40  ;;  %v758_v46 = vsel %vm292_vm0, %v3758_v44, -inf }
 0x146   : > { %v3732_v4 = vadd.f32 %v456_v2, %v275_v3 }
 0x148   : > { %v482_v7 = vsel %vm292_vm0, %v3732_v4, -inf }
 0x14a   : > { %753 = vmax.xlane.f32.xlu2 %v752_v62 }
 0x152   : > { %483 = vmax.xlane.f32.xlu2 %v482_v7 }
 0x15a   : > { %756 = vmax.xlane.f32.xlu2 %v755_v22 }
 0x162   : > { %486 = vmax.xlane.f32.xlu2 %v485_v35 }
 0x164   : > { %477 = vmax.xlane.f32.xlu1 %v476_v37 }
 0x167   : > { %750 = vmax.xlane.f32.xlu0 %v749_v41 }
 0x16c   : > { %759 = vmax.xlane.f32.xlu1 %v758_v46 }
 0x194   : > { %v742_v47 = vpop.xlane.xlu1 %741  ;;  %v469_v48 = vpop.xlane.xlu0 %468 }
 0x195   : > { %v764_v49 = vsub.f32 %v3685_v13, %v742_v47  ;;  %v491_v50 = vsub.f32 %v3687_v14, %v469_v48 }
 0x197   : > { %v772_v51 = vmul.f32 1.442695, %v764_v49  ;;  %v499_v52 = vmul.f32 1.442695, %v491_v50 }
 0x199   : > { %3195 = vpow2.f32 %v772_v51 }
 0x19a   : > { %3197 = vpow2.f32 %v499_v52 }
 0x19c   : > { %v745_v60 = vpop.xlane.xlu0 %744 }
 0x19d   : > { %v472_v53 = vpop.xlane.xlu2 %471  ;;  %v765_v62 = vsub.f32 %v3696_v27, %v745_v60 }
 0x19e   : > { %v492_v54 = vsub.f32 %v3698_v30, %v472_v53 }
 0x19f   : > { %v3765_v56 = vpop.eup %3195  ;;  %v774_v7 = vmul.f32 1.442695, %v765_v62 }
 0x1a0   : > { %v3767_v57 = vpop.eup %3197  ;;  %v501_v58 = vmul.f32 1.442695, %v492_v54  ;;  %v788_v59 = vsel %vm292_vm0, %v3765_v56, 0.0 }
 0x1a1   : > { %789 = vadd.xlane.f32.xlu2 %v788_v59  ;;  %v515_v13 = vsel %vm292_vm0, %v3767_v57, 0.0 }
 0x1a2   : > { %3199 = vpow2.f32 %v501_v58  ;;  %516 = vadd.xlane.f32.xlu0 %v515_v13 }
 0x1a5   : > { %v475_v14 = vpop.xlane.xlu2 %474 }
 0x1a6   : > { %v493_v2 = vsub.f32 %v3706_v38, %v475_v14 }
 0x1a8   : > { %v3773_v40 = vpop.eup %3199  ;;  %v503_v17 = vmul.f32 1.442695, %v493_v2 }
 0x1a9   : > { %v518_v30 = vsel %vm292_vm0, %v3773_v40, 0.0 }
 0x1aa   : > { %519 = vadd.xlane.f32.xlu2 %v518_v30 }
 0x1ac   : > { %v424_v63 = vpop.permute.xlu1 %423 }
 0x1ad   : > { %v434_v3 = vadd.f32 %v3674_v1, %v424_v63  ;;  %v748_v5 = vpop.xlane.xlu2 %747 }
 0x1ae   : > { %v766_v6 = vsub.f32 %v3710_v45, %v748_v5 }
 0x1af   : > { %vm442_vm4 = vcmp.ge.f32.partialorder %v434_v3, 0.0  ;;  %v450_v8 = vmul.f32 0.01, %v434_v3  ;;  %v697_v9 = vpop.permute.xlu0 %696 }
 0x1b0   : > { %v776_v11 = vmul.f32 1.442695, %v766_v6  ;;  %v707_v15 = vadd.f32 %v3671_v0, %v697_v9 }
 0x1b1   : > { %v458_v18 = vsel %vm442_vm4, %v434_v3, %v450_v8 }
 0x1b2   : > { %3201 = vpow2.f32 %v776_v11  ;;  %vm715_vm5 = vcmp.ge.f32.partialorder %v707_v15, 0.0  ;;  %v723_v27 = vmul.f32 0.01, %v707_v15  ;;  %v3783_v21 = vadd.f32 %v458_v18, %v277_v10 }
 0x1b3   : > { %3203 = vpow2.f32 %v774_v7 }
 0x1b4   : > { %v488_v1 = vsel %vm292_vm0, %v3783_v21, -inf  ;;  %v731_v38 = vsel %vm715_vm5, %v707_v15, %v723_v27  ;;  %3205 = vpow2.f32 %v503_v17 }
 0x1b5   : > { %v481_v45 = vpop.xlane.xlu2 %480  ;;  %489 = vmax.xlane.f32.xlu1 %v488_v1  ;;  %v3787_v22 = vadd.f32 %v731_v38, %v277_v10 }
 0x1b6   : > { %v495_v23 = vsub.f32 %v3719_v55, %v481_v45 }
 0x1b7   : > { %v761_v0 = vsel %vm292_vm0, %v3787_v22, -inf }
 0x1b8   : > { %v3792_v24 = vpop.eup %3201  ;;  %v507_v25 = vmul.f32 1.442695, %v495_v23  ;;  %762 = vmax.xlane.f32.xlu0 %v761_v0 }
 0x1b9   : > { %v3794_v26 = vpop.eup %3203  ;;  %v794_v28 = vsel %vm292_vm0, %v3792_v24, 0.0 }
 0x1ba   : > { %3207 = vpow2.f32 %v507_v25  ;;  %795 = vadd.xlane.f32.xlu2 %v794_v28  ;;  %v3798_v29 = vpop.eup %3205  ;;  %v791_v33 = vsel %vm292_vm0, %v3794_v26, 0.0 }
 0x1bb   : > { %v521_v34 = vsel %vm292_vm0, %v3798_v29, 0.0 }
 0x1bd   : > { %v754_v55 = vpop.xlane.xlu2 %753  ;;  %792 = vadd.xlane.f32.xlu1 %v791_v33 }
 0x1be   : > { %v768_v52 = vsub.f32 %v3725_v61, %v754_v55 }
 0x1c0   : > { %v3804_v35 = vpop.eup %3207  ;;  %522 = vadd.xlane.f32.xlu0 %v521_v34  ;;  %v780_v13 = vmul.f32 1.442695, %v768_v52 }
 0x1c1   : > { %v527_v37 = vsel %vm292_vm0, %v3804_v35, 0.0 }
 0x1c2   : > { %528 = vadd.xlane.f32.xlu2 %v527_v37 }
 0x1c5   : > { %v484_v39 = vpop.xlane.xlu2 %483 }
 0x1cd   : > { %v757_v41 = vpop.xlane.xlu2 %756 }
 0x1ce   : > { %v769_v46 = vsub.f32 %v3738_v12, %v757_v41  ;;  %v496_v12 = vsub.f32 %v3732_v4, %v484_v39 }
 0x1d0   : > { %v782_v47 = vmul.f32 1.442695, %v769_v46  ;;  %v509_v60 = vmul.f32 1.442695, %v496_v12 }
 0x1d2   : > { %3209 = vpow2.f32 %v782_v47 }
 0x1d5   : > { %v487_v14 = vpop.xlane.xlu2 %486 }
 0x1d7   : > { %v478_v48 = vpop.xlane.xlu1 %477 }
 0x1d8   : > { %v3809_v49 = vpop.eup %3209  ;;  %v494_v50 = vsub.f32 %v3748_v32, %v478_v48  ;;  %v497_v32 = vsub.f32 %v3746_v31, %v487_v14 }
 0x1d9   : > { %v803_v51 = vsel %vm292_vm0, %v3809_v49, 0.0 }
 0x1da   : > { %v505_v53 = vmul.f32 1.442695, %v494_v50  ;;  %804 = vadd.xlane.f32.xlu2 %v803_v51  ;;  %v751_v54 = vpop.xlane.xlu0 %750 }
 0x1db   : > { %v767_v58 = vsub.f32 %v3752_v36, %v751_v54  ;;  %v511_v36 = vmul.f32 1.442695, %v497_v32 }
 0x1dc   : > { %3211 = vpow2.f32 %v505_v53 }
 0x1dd   : > { %v778_v59 = vmul.f32 1.442695, %v767_v58 }
 0x1df   : > { %3213 = vpow2.f32 %v778_v59  ;;  %v760_v62 = vpop.xlane.xlu1 %759 }
 0x1e0   : > { %3215 = vpow2.f32 %v780_v13  ;;  %v770_v4 = vsub.f32 %v3758_v44, %v760_v62 }
 0x1e1   : > { %3217 = vpow2.f32 %v509_v60 }
 0x1e2   : > { %v3817_v30 = vpop.eup %3211  ;;  %v784_v5 = vmul.f32 1.442695, %v770_v4  ;;  %3219 = vpow2.f32 %v511_v36 }
 0x1e3   : > { %v524_v61 = vsel %vm292_vm0, %v3817_v30, 0.0 }
 0x1e4   : > { %525 = vadd.xlane.f32.xlu1 %v524_v61  ;;  %3221 = vpow2.f32 %v784_v5 }
 0x1e5   : > { %v3822_v63 = vpop.eup %3213 }
 0x1e6   : > { %v797_v2 = vsel %vm292_vm0, %v3822_v63, 0.0  ;;  %v3827_v3 = vpop.eup %3215 }
 0x1e7   : > { %798 = vadd.xlane.f32.xlu0 %v797_v2  ;;  %v3829_v31 = vpop.eup %3217  ;;  %v800_v6 = vsel %vm292_vm0, %v3827_v3, 0.0 }
 0x1e8   : > { %v530_v7 = vsel %vm292_vm0, %v3829_v31, 0.0  ;;  %v3835_v44 = vpop.eup %3219 }
 0x1e9   : > { %v533_v9 = vsel %vm292_vm0, %v3835_v44, 0.0 }
 0x1ea   : > { %v3837_v8 = vpop.eup %3221 }
 0x1eb   : > { %v806_v10 = vsel %vm292_vm0, %v3837_v8, 0.0 }
 0x1ec   : > { %801 = vadd.xlane.f32.xlu1 %v800_v6 }
 0x1ef   : > { %531 = vadd.xlane.f32.xlu0 %v530_v7 }
 0x1f4   : > { %534 = vadd.xlane.f32.xlu1 %v533_v9 }
 0x1f7   : > { %807 = vadd.xlane.f32.xlu0 %v806_v10 }
 0x214   : > { %v790_v11 = vpop.xlane.xlu2 %789 }
 0x215   : > { %3223 = vrcp.f32 %v790_v11  ;;  %v517_v15 = vpop.xlane.xlu0 %516  ;;  %v823_v23 = vand.u32 2147483648, %v790_v11  ;;  %v821_v33 = vand.u32 2147483647, %v790_v11  ;;  %vm817_vm8 = vweird.f32 %v790_v11 }
 0x216   : > { %3225 = vrcp.f32 %v517_v15  ;;  %v550_v28 = vand.u32 2147483648, %v517_v15  ;;  %v548_v34 = vand.u32 2147483647, %v517_v15  ;;  %vm544_vm9 = vweird.f32 %v517_v15 }
 0x217   : > { %v824_v39 = vor.u32 1.1754944e-38, %v823_v23  ;;  %vm822_vm11 = vcmp.eq.f32.partialorder %v821_v33, 8.507059e+37 }
 0x218   : > { %v551_v47 = vor.u32 1.1754944e-38, %v550_v28  ;;  %vm549_vm13 = vcmp.eq.f32.partialorder %v548_v34, 8.507059e+37 }
 0x21b   : > { %v3224_v17 = vpop.eup %3223 }
 0x21c   : > { %v3226_v18 = vpop.eup %3225  ;;  %v813_v27 = vmul.f32 %v3224_v17, %v790_v11  ;;  %vm818_vm6 = vweird.f32 %v3224_v17 }
 0x21d   : > { %v540_v1 = vmul.f32 %v3226_v18, %v517_v15  ;;  %v520_v38 = vpop.xlane.xlu2 %519  ;;  %vm545_vm7 = vweird.f32 %v3226_v18  ;;  %vm819_vm10 = vmor %vm817_vm8, %vm818_vm6 }
 0x21e   : > { %v814_v45 = vsub.f32 1.0, %v813_v27  ;;  %3227 = vrcp.f32 %v520_v38  ;;  %vm546_vm12 = vmor %vm544_vm9, %vm545_vm7  ;;  %v565_v14 = vand.u32 2147483648, %v520_v38  ;;  %v563_v32 = vand.u32 2147483647, %v520_v38 }
 0x21f   : > { %v541_v0 = vsub.f32 1.0, %v540_v1  ;;  %vm559_vm15 = vweird.f32 %v520_v38 }
 0x220   : > { %v815_v25 = vmul.f32 %v3224_v17, %v814_v45  ;;  %v566_v36 = vor.u32 1.1754944e-38, %v565_v14  ;;  %vm564_vm2 = vcmp.eq.f32.partialorder %v563_v32, 8.507059e+37 }
 0x221   : > { %v542_v55 = vmul.f32 %v3226_v18, %v541_v0 }
 0x222   : > { %v816_v37 = vadd.f32 %v3224_v17, %v815_v25 }
 0x223   : > { %v543_v41 = vadd.f32 %v3226_v18, %v542_v55 }
 0x224   : > { %v3228_v46 = vpop.eup %3227  ;;  %v820_v48 = vsel %vm819_vm10, %v3224_v17, %v816_v37 }
 0x225   : > { %v555_v50 = vmul.f32 %v3228_v46, %v520_v38  ;;  %v825_v51 = vsel %vm822_vm11, %v824_v39, %v820_v48  ;;  %v547_v52 = vsel %vm546_vm12, %v3226_v18, %v543_v41  ;;  %vm560_vm14 = vweird.f32 %v3228_v46 }
 0x226   : > { %v826_v53 = vmul.f32 %v3765_v56, %v825_v51  ;;  %v552_v54 = vsel %vm549_vm13, %v551_v47, %v547_v52  ;;  %vm561_vm1 = vmor %vm559_vm15, %vm560_vm14 }
 0x227   : > { %v556_v58 = vsub.f32 1.0, %v555_v50  ;;  %v553_v12 = vmul.f32 %v3767_v57, %v552_v54 }
 0x228   : > { %v490_v59 = vpop.xlane.xlu1 %489  ;;  %3008 = vmatmul.msk.f32.vlgmr.msra.gmra.mxu2 %vm292_vm0, %v826_v53 }
 0x229   : > { %v557_v13 = vmul.f32 %v3228_v46, %v556_v58  ;;  %v498_v60 = vsub.f32 %v3783_v21, %v490_v59  ;;  %3016 = vmatmul.msk.f32.vlgmr.msra.gmra.mxu3 %vm292_vm0, %v553_v12 }
 0x22b   : > { %v513_v62 = vmul.f32 1.442695, %v498_v60  ;;  %v763_v61 = vpop.xlane.xlu0 %762  ;;  %v558_v4 = vadd.f32 %v3228_v46, %v557_v13 }
 0x22c   : > { %v771_v56 = vsub.f32 %v3787_v22, %v763_v61 }
 0x22d   : > { %3229 = vpow2.f32 %v513_v62  ;;  %v796_v57 = vpop.xlane.xlu2 %795  ;;  %v562_v2 = vsel %vm561_vm1, %v3228_v46, %v558_v4 }
 0x22e   : > { %v786_v5 = vmul.f32 1.442695, %v771_v56  ;;  %3231 = vrcp.f32 %v796_v57  ;;  %v567_v6 = vsel %vm564_vm2, %v566_v36, %v562_v2  ;;  %v853_v50 = vand.u32 2147483648, %v796_v57 }
 0x22f   : > { %v568_v7 = vmul.f32 %v3773_v40, %v567_v6  ;;  %vm847_vm10 = vweird.f32 %v796_v57  ;;  %v851_v58 = vand.u32 2147483647, %v796_v57 }
 0x230   : > { %3233 = vpow2.f32 %v786_v5  ;;  %v793_v21 = vpop.xlane.xlu1 %792  ;;  %v854_v14 = vor.u32 1.1754944e-38, %v853_v50 }
 0x231   : > { %3235 = vrcp.f32 %v793_v21  ;;  %3017 = vmatmul.msk.f32.gmra.mxu3 %vm292_vm0, %v568_v7  ;;  %v838_v23 = vand.u32 2147483648, %v793_v21  ;;  %v836_v33 = vand.u32 2147483647, %v793_v21  ;;  %vm832_vm4 = vweird.f32 %v793_v21 }
 0x232   : > { %vm852_vm14 = vcmp.eq.f32.partialorder %v851_v58, 8.507059e+37 }
 0x233   : > { %v3851_v9 = vpop.eup %3229  ;;  %v523_v10 = vpop.xlane.xlu0 %522  ;;  %v839_v39 = vor.u32 1.1754944e-38, %v838_v23  ;;  %vm837_vm7 = vcmp.eq.f32.partialorder %v836_v33, 8.507059e+37 }
 0x234   : > { %v3232_v22 = vpop.eup %3231  ;;  %3237 = vrcp.f32 %v523_v10  ;;  %v536_v11 = vsel %vm292_vm0, %v3851_v9, 0.0  ;;  %v580_v34 = vand.u32 2147483648, %v523_v10  ;;  %v578_v46 = vand.u32 2147483647, %v523_v10 }
 0x235   : > { %v843_v15 = vmul.f32 %v3232_v22, %v796_v57  ;;  %537 = vadd.xlane.f32.xlu2 %v536_v11  ;;  %vm848_vm8 = vweird.f32 %v3232_v22  ;;  %vm574_vm9 = vweird.f32 %v523_v10  ;;  %v529_v62 = vpop.xlane.xlu2 %528 }
 0x236   : > { %v3855_v17 = vpop.eup %3233  ;;  %v581_v53 = vor.u32 1.1754944e-38, %v580_v34  ;;  %vm579_vm12 = vcmp.eq.f32.partialorder %v578_v46, 8.507059e+37  ;;  %vm849_vm13 = vmor %vm847_vm10, %vm848_vm8  ;;  %3239 = vrcp.f32 %v529_v62  ;;  %v610_v7 = vand.u32 2147483648, %v529_v62 }
 0x237   : > { %v3236_v18 = vpop.eup %3235  ;;  %v809_v27 = vsel %vm292_vm0, %v3855_v17, 0.0  ;;  %v844_v40 = vsub.f32 1.0, %v843_v15  ;;  %vm604_vm2 = vweird.f32 %v529_v62 }
 0x238   : > { %v828_v1 = vmul.f32 %v3236_v18, %v793_v21  ;;  %810 = vadd.xlane.f32.xlu1 %v809_v27  ;;  %vm833_vm3 = vweird.f32 %v3236_v18 }
 0x239   : > { %v845_v25 = vmul.f32 %v3232_v22, %v844_v40  ;;  %vm834_vm5 = vmor %vm832_vm4, %vm833_vm3 }
 0x23a   : > { %v3238_v38 = vpop.eup %3237  ;;  %v829_v45 = vsub.f32 1.0, %v828_v1 }
 0x23b   : > { %v570_v0 = vmul.f32 %v3238_v38, %v523_v10  ;;  %vm575_vm6 = vweird.f32 %v3238_v38  ;;  %v846_v48 = vadd.f32 %v3232_v22, %v845_v25  ;;  %v608_v25 = vand.u32 2147483647, %v529_v62 }
 0x23c   : > { %v830_v28 = vmul.f32 %v3236_v18, %v829_v45  ;;  %vm576_vm11 = vmor %vm574_vm9, %vm575_vm6  ;;  %v611_v45 = vor.u32 1.1754944e-38, %v610_v7 }
 0x23d   : > { %v571_v55 = vsub.f32 1.0, %v570_v0  ;;  %v850_v13 = vsel %vm849_vm13, %v3232_v22, %v846_v48  ;;  %vm609_vm8 = vcmp.eq.f32.partialorder %v608_v25, 8.507059e+37 }
 0x23e   : > { %v831_v37 = vadd.f32 %v3236_v18, %v830_v28  ;;  %v855_v32 = vsel %vm852_vm14, %v854_v14, %v850_v13 }
 0x23f   : > { %v572_v41 = vmul.f32 %v3238_v38, %v571_v55  ;;  %v856_v61 = vmul.f32 %v3792_v24, %v855_v32 }
 0x240   : > { %v835_v47 = vsel %vm834_vm5, %v3236_v18, %v831_v37 }
 0x241   : > { %v840_v51 = vsel %vm837_vm7, %v839_v39, %v835_v47  ;;  %v573_v52 = vadd.f32 %v3238_v38, %v572_v41 }
 0x242   : > { %v841_v54 = vmul.f32 %v3794_v26, %v840_v51  ;;  %v3240_v26 = vpop.eup %3239 }
 0x243   : > { %v577_v12 = vsel %vm576_vm11, %v3238_v38, %v573_v52  ;;  %v600_v4 = vmul.f32 %v3240_v26, %v529_v62  ;;  %vm605_vm15 = vweird.f32 %v3240_v26 }
 0x244   : > { %3009 = vmatmul.msk.f32.gmra.mxu2 %vm292_vm0, %v841_v54  ;;  %v582_v59 = vsel %vm579_vm12, %v581_v53, %v577_v12  ;;  %vm3876_vm4 = vmor %vm604_vm2, %vm605_vm15 }
 0x245   : > { %v583_v60 = vmul.f32 %v3798_v29, %v582_v59  ;;  %v601_v36 = vsub.f32 1.0, %v600_v4 }
 0x247   : > { %3018 = vmatmul.msk.f32.gmra.mxu3 %vm292_vm0, %v583_v60  ;;  %v602_v5 = vmul.f32 %v3240_v26, %v601_v36 }
 0x249   : > { %v603_v18 = vadd.f32 %v3240_v26, %v602_v5 }
 0x24b   : > { %v607_v37 = vsel %vm3876_vm4, %v3240_v26, %v603_v18 }
 0x24c   : > { %3010 = vmatmul.msk.f32.gmra.mxu2 %vm292_vm0, %v856_v61  ;;  %v612_v59 = vsel %vm609_vm8, %v611_v45, %v607_v37 }
 0x24d   : > { %v3865_v57 = vpop.xlane.xlu2 %804  ;;  %v613_v5 = vmul.f32 %v3804_v35, %v612_v59 }
 0x24e   : > { %v898_v25 = vand.u32 2147483648, %v3865_v57 }
 0x257   : > { %v526_v56 = vpop.xlane.xlu1 %525 }
 0x258   : > { %3241 = vrcp.f32 %v526_v56  ;;  %v595_v22 = vand.u32 2147483648, %v526_v56  ;;  %v593_v1 = vand.u32 2147483647, %v526_v56  ;;  %vm589_vm3 = vweird.f32 %v526_v56 }
 0x25a   : > { %v799_v2 = vpop.xlane.xlu0 %798  ;;  %v596_v55 = vor.u32 1.1754944e-38, %v595_v22  ;;  %vm594_vm6 = vcmp.eq.f32.partialorder %v593_v1, 8.507059e+37 }
 0x25b   : > { %3243 = vrcp.f32 %v799_v2  ;;  %v868_v39 = vand.u32 2147483648, %v799_v2  ;;  %v866_v50 = vand.u32 2147483647, %v799_v2  ;;  %vm862_vm9 = vweird.f32 %v799_v2 }
 0x25c   : > { %3245 = vrcp.f32 %v3865_v57 }
 0x25d   : > { %v869_v14 = vor.u32 1.1754944e-38, %v868_v39  ;;  %vm867_vm11 = vcmp.eq.f32.partialorder %v866_v50, 8.507059e+37 }
 0x25e   : > { %v3242_v29 = vpop.eup %3241 }
 0x25f   : > { %v585_v6 = vmul.f32 %v3242_v29, %v526_v56  ;;  %v3868_v21 = vpop.xlane.xlu1 %801  ;;  %vm590_vm1 = vweird.f32 %v3242_v29 }
 0x260   : > { %3247 = vrcp.f32 %v3868_v21  ;;  %vm591_vm5 = vmor %vm589_vm3, %vm590_vm1  ;;  %v883_v62 = vand.u32 2147483648, %v3868_v21  ;;  %vm877_vm13 = vweird.f32 %v3868_v21 }
 0x261   : > { %v3244_v24 = vpop.eup %3243  ;;  %v586_v10 = vsub.f32 1.0, %v585_v6 }
 0x262   : > { %v858_v11 = vmul.f32 %v3244_v24, %v799_v2  ;;  %v3871_v15 = vpop.xlane.xlu0 %531  ;;  %v3873_v27 = vpop.eup %3245  ;;  %vm863_vm7 = vweird.f32 %v3244_v24  ;;  %v881_v2 = vand.u32 2147483647, %v3868_v21  ;;  %v884_v22 = vor.u32 1.1754944e-38, %v883_v62 }
 0x263   : > { %v587_v40 = vmul.f32 %v3242_v29, %v586_v10  ;;  %3249 = vrcp.f32 %v3871_v15  ;;  %v888_v33 = vmul.f32 %v3873_v27, %v3865_v57  ;;  %vm864_vm10 = vmor %vm862_vm9, %vm863_vm7  ;;  %v625_v7 = vand.u32 2147483648, %v3871_v15 }
 0x264   : > { %v859_v38 = vsub.f32 1.0, %v858_v11  ;;  %vm619_vm1 = vweird.f32 %v3871_v15  ;;  %v623_v11 = vand.u32 2147483647, %v3871_v15  ;;  %vm882_vm2 = vcmp.eq.f32.partialorder %v881_v2, 8.507059e+37 }
 0x265   : > { %v588_v23 = vadd.f32 %v3242_v29, %v587_v40  ;;  %v889_v13 = vsub.f32 1.0, %v888_v33  ;;  %v626_v45 = vor.u32 1.1754944e-38, %v625_v7  ;;  %vm893_vm4 = vweird.f32 %v3873_v27 }
 0x266   : > { %v3880_v28 = vpop.eup %3247  ;;  %v860_v34 = vmul.f32 %v3244_v24, %v859_v38  ;;  %v896_v33 = vand.u32 2147483647, %v3865_v57 }
 0x267   : > { %v873_v41 = vmul.f32 %v3880_v28, %v3868_v21  ;;  %v3888_v46 = vpop.xlane.xlu1 %534  ;;  %v592_v47 = vsel %vm591_vm5, %v3242_v29, %v588_v23  ;;  %vm878_vm12 = vweird.f32 %v3880_v28  ;;  %vm624_vm5 = vcmp.eq.f32.partialorder %v623_v11, 8.507059e+37 }
 0x268   : > { %3251 = vrcp.f32 %v3888_v46  ;;  %v597_v48 = vsel %vm594_vm6, %v596_v55, %v592_v47  ;;  %v861_v54 = vadd.f32 %v3244_v24, %v860_v34  ;;  %vm3907_vm14 = vmor %vm877_vm13, %vm878_vm12  ;;  %vm892_vm6 = vweird.f32 %v3865_v57 }
 0x269   : > { %v3250_v51 = vpop.eup %3249  ;;  %v874_v52 = vsub.f32 1.0, %v873_v41  ;;  %v598_v53 = vmul.f32 %v3817_v30, %v597_v48  ;;  %vm894_vm7 = vmor %vm892_vm6, %vm893_vm4  ;;  %v640_v34 = vand.u32 2147483648, %v3888_v46  ;;  %v899_v41 = vor.u32 1.1754944e-38, %v898_v25 }
 0x26a   : > { %v615_v58 = vmul.f32 %v3250_v51, %v3871_v15  ;;  %v3893_v12 = vpop.xlane.xlu0 %807  ;;  %v865_v30 = vsel %vm864_vm10, %v3244_v24, %v861_v54  ;;  %vm620_vm15 = vweird.f32 %v3250_v51  ;;  %v890_v24 = vmul.f32 %v3873_v27, %v889_v13 }
 0x26b   : > { %v875_v60 = vmul.f32 %v3880_v28, %v874_v52  ;;  %3253 = vrcp.f32 %v3893_v12  ;;  %3019 = vmatmul.msk.f32.gmra.mxu3 %vm292_vm0, %v598_v53  ;;  %v870_v61 = vsel %vm867_vm11, %v869_v14, %v865_v30  ;;  %vm621_vm3 = vmor %vm619_vm1, %vm620_vm15  ;;  %vm634_vm9 = vweird.f32 %v3888_v46 }
 0x26c   : > { %v616_v32 = vsub.f32 1.0, %v615_v58  ;;  %v871_v36 = vmul.f32 %v3822_v63, %v870_v61  ;;  %v891_v0 = vadd.f32 %v3873_v27, %v890_v24  ;;  %vm897_vm10 = vcmp.eq.f32.partialorder %v896_v33, 8.507059e+37 }
 0x26d   : > { %v876_v26 = vadd.f32 %v3880_v28, %v875_v60  ;;  %v641_v50 = vor.u32 1.1754944e-38, %v640_v34  ;;  %v913_v52 = vand.u32 2147483648, %v3893_v12 }
 0x26e   : > { %v3252_v4 = vpop.eup %3251  ;;  %v617_v56 = vmul.f32 %v3250_v51, %v616_v32  ;;  %3011 = vmatmul.msk.f32.gmra.mxu2 %vm292_vm0, %v871_v36  ;;  %v895_v39 = vsel %vm894_vm7, %v3873_v27, %v891_v0 }
 0x26f   : > { %v630_v29 = vmul.f32 %v3252_v4, %v3888_v46  ;;  %v880_v63 = vsel %vm3907_vm14, %v3880_v28, %v876_v26  ;;  %vm635_vm8 = vweird.f32 %v3252_v4  ;;  %v900_v57 = vsel %vm897_vm10, %v899_v41, %v895_v39 }
 0x270   : > { %v618_v21 = vadd.f32 %v3250_v51, %v617_v56  ;;  %v885_v1 = vsel %vm882_vm2, %v884_v22, %v880_v63  ;;  %vm636_vm11 = vmor %vm634_vm9, %vm635_vm8  ;;  %vm907_vm14 = vweird.f32 %v3893_v12  ;;  %v901_v27 = vmul.f32 %v3809_v49, %v900_v57 }
 0x271   : > { %v3254_v10 = vpop.eup %3253  ;;  %v631_v35 = vsub.f32 1.0, %v630_v29  ;;  %v886_v15 = vmul.f32 %v3827_v3, %v885_v1  ;;  %v638_v3 = vand.u32 2147483647, %v3888_v46  ;;  %v914_v54 = vor.u32 1.1754944e-38, %v913_v52 }
 0x272   : > { %v903_v18 = vmul.f32 %v3254_v10, %v3893_v12  ;;  %v622_v38 = vsel %vm621_vm3, %v3250_v51, %v618_v21  ;;  %vm908_vm12 = vweird.f32 %v3254_v10 }
 0x273   : > { %v632_v40 = vmul.f32 %v3252_v4, %v631_v35  ;;  %3020 = vmatmul.msk.f32.gmra.mxu3 %vm292_vm0, %v613_v5  ;;  %v627_v28 = vsel %vm624_vm5, %v626_v45, %v622_v38  ;;  %vm639_vm13 = vcmp.eq.f32.partialorder %v638_v3, 8.507059e+37  ;;  %vm909_vm15 = vmor %vm907_vm14, %vm908_vm12 }
 0x274   : > { %v904_v23 = vsub.f32 1.0, %v903_v18  ;;  %v628_v47 = vmul.f32 %v3829_v31, %v627_v28  ;;  %v911_v31 = vand.u32 2147483647, %v3893_v12 }
 0x275   : > { %v633_v55 = vadd.f32 %v3252_v4, %v632_v40 }
 0x276   : > { %v905_v37 = vmul.f32 %v3254_v10, %v904_v23  ;;  %3012 = vmatmul.msk.f32.gmra.mxu2 %vm292_vm0, %v886_v15  ;;  %vm912_vm1 = vcmp.eq.f32.partialorder %v911_v31, 8.507059e+37 }
 0x277   : > { %v637_v48 = vsel %vm636_vm11, %v3252_v4, %v633_v55 }
 0x278   : > { %v906_v51 = vadd.f32 %v3254_v10, %v905_v37  ;;  %v642_v53 = vsel %vm639_vm13, %v641_v50, %v637_v48 }
 0x279   : > { %v643_v58 = vmul.f32 %v3835_v44, %v642_v53 }
 0x27a   : > { %v910_v46 = vsel %vm909_vm15, %v3254_v10, %v906_v51 }
 0x27b   : > { %3021 = vmatmul.msk.f32.gmra.mxu3 %vm292_vm0, %v628_v47  ;;  %v915_v59 = vsel %vm912_vm1, %v914_v54, %v910_v46 }
 0x27c   : > { %v916_v13 = vmul.f32 %v3837_v8, %v915_v59  ;;  %v278_v59 = vld [vmem:[%s3956_s30] sm:$0x3] }
 0x27e   : > { %3013 = vmatmul.msk.f32.gmra.mxu2 %vm292_vm0, %v901_v27 }
 0x283   : > { %3022 = vmatmul.msk.f32.gmra.mxu3 %vm292_vm0, %v643_v58  ;;  %v1118_v58 = vld [vmem:[#allocation2 + $0x78] sm:$0xff] }
 0x286   : > { %3014 = vmatmul.msk.f32.gmra.mxu2 %vm292_vm0, %v916_v13  ;;  %v1117_v13 = vld [vmem:[#allocation2 + $0x70] sm:$0xff] }
 0x2a8   : > { %v538_v14 = vpop.xlane.xlu2 %537 }
 0x2a9   : > { %3255 = vrcp.f32 %v538_v14  ;;  %v655_v26 = vand.u32 2147483648, %v538_v14  ;;  %v653_v36 = vand.u32 2147483647, %v538_v14  ;;  %vm649_vm3 = vweird.f32 %v538_v14 }
 0x2ab   : > { %v811_v49 = vpop.xlane.xlu1 %810  ;;  %v981_v60 = vpop.f32.mrf.mxu2  ;;  %v656_v5 = vor.u32 1.1754944e-38, %v655_v26  ;;  %vm654_vm6 = vcmp.eq.f32.partialorder %v653_v36, 8.507059e+37  ;;  %v1120_v26 = vld [vmem:[#allocation2 + $0x100] sm:$0xff] }
 0x2ac   : > { %3257 = vrcp.f32 %v811_v49  ;;  %v1046_v12 = vpop.f32.mrf.mxu3  ;;  %v928_v2 = vand.u32 2147483648, %v811_v49  ;;  %v926_v24 = vand.u32 2147483647, %v811_v49  ;;  %vm922_vm7 = vweird.f32 %v811_v49 }
 0x2ad   : > { %v3943_v32 = vadd.f32 %v1046_v12, %v981_v60  ;;  %v1114_v60 = vld [vmem:[#allocation2 + $0x58] sm:$0xff]  ;;  %v1113_v12 = vld [vmem:[#allocation2 + $0x50] sm:$0xff] }
 0x2ae   : > { %v929_v10 = vor.u32 1.1754944e-38, %v928_v2  ;;  %vm927_vm9 = vcmp.eq.f32.partialorder %v926_v24, 8.507059e+37 }
 0x2af   : > { %v3256_v30 = vpop.eup %3255  ;;  %v1070_v54 = vmax.f32 %v3943_v32, 0.0  ;;  %v1112_v32 = vld [vmem:[#allocation2 + $0x48] sm:$0xff] }
 0x2b0   : > { %v645_v62 = vmul.f32 %v3256_v30, %v538_v14  ;;  %vm650_vm2 = vweird.f32 %v3256_v30  ;;  %v1116_v14 = vld [vmem:[#allocation2 + $0x68] sm:$0xff] }
 0x2b1   : > { %vm651_vm4 = vmor %vm649_vm3, %vm650_vm2 }
 0x2b2   : > { %v3258_v61 = vpop.eup %3257  ;;  %v646_v44 = vsub.f32 1.0, %v645_v62  ;;  %v1121_v62 = vld [vmem:[#allocation2 + $0x108] sm:$0xff] }
 0x2b3   : > { %v918_v4 = vmul.f32 %v3258_v61, %v811_v49  ;;  %vm923_vm5 = vweird.f32 %v3258_v61  ;;  %v1115_v49 = vld [vmem:[#allocation2 + $0x60] sm:$0xff] }
 0x2b4   : > { %v647_v56 = vmul.f32 %v3256_v30, %v646_v44  ;;  %vm924_vm8 = vmor %vm922_vm7, %vm923_vm5  ;;  %v1049_v1 = vpop.f32.mrf.mxu3 }
 0x2b5   : > { %v919_v8 = vsub.f32 1.0, %v918_v4  ;;  %v1123_v4 = vperm.slane %v1120_v26, 0  ;;  %v3392_v26 = vld [vmem:[%s3681_s23 + $0x8] sm:$0xff] }
 0x2b6   : > { %v648_v29 = vadd.f32 %v3256_v30, %v647_v56 }
 0x2b7   : > { %v920_v6 = vmul.f32 %v3258_v61, %v919_v8 }
 0x2b8   : > { %v652_v7 = vsel %vm651_vm4, %v3256_v30, %v648_v29  ;;  %v1111_v30 = vld [vmem:[#allocation2 + $0x40] sm:$0xff] }
 0x2b9   : > { %v657_v63 = vsel %vm654_vm6, %v656_v5, %v652_v7  ;;  %v921_v21 = vadd.f32 %v3258_v61, %v920_v6 }
 0x2ba   : > { %v658_v22 = vmul.f32 %v3851_v9, %v657_v63 }
 0x2bb   : > { %v925_v35 = vsel %vm924_vm8, %v3258_v61, %v921_v21  ;;  %v1122_v61 = vld [vmem:[#allocation2 + $0x110] sm:$0xff] }
 0x2bc   : > { %3023 = vmatmul.msk.f32.gmra.mxu3 %vm292_vm0, %v658_v22  ;;  %v930_v11 = vsel %vm927_vm9, %v929_v10, %v925_v35  ;;  %1191 = vperm.xlu0 %3177, %v1122_v61  }
 0x2bd   : > { %v931_v18 = vmul.f32 %v3855_v17, %v930_v11 }
 0x2bf   : > { %3015 = vmatmul.msk.f32.gmra.mxu2 %vm292_vm0, %v931_v18 }
 0x2c4   : > { %3180 = vset.pattern.permute.xlu0 %v3512_v20 }
 0x2c7   : > { %v984_v40 = vpop.f32.mrf.mxu2 }
 0x2c8   : > { %v1050_v27 = vadd.f32 %v1049_v1, %v984_v40 }
 0x2ca   : > { %v1052_v38 = vpop.f32.mrf.mxu3  ;;  %v1071_v46 = vmax.f32 %v1050_v27, 0.0  ;;  %v3391_v27 = vld [vmem:[%s3681_s23] sm:$0xff] }
 0x2cf   : > { %v987_v45 = vpop.f32.mrf.mxu2 }
 0x2d0   : > { %v1053_v51 = vadd.f32 %v1052_v38, %v987_v45 }
 0x2d2   : > { %v1072_v31 = vmax.f32 %v1053_v51, 0.0 }
 0x2ee   : > { %v1055_v23 = vpop.f32.mrf.mxu3 }
 0x2f1   : > { %v990_v0 = vpop.f32.mrf.mxu2 }
 0x2f2   : > { %v1056_v48 = vadd.f32 %v1055_v23, %v990_v0 }
 0x2f4   : > { %v1073_v53 = vmax.f32 %v1056_v48, 0.0 }
 0x2f6   : > { %v1058_v25 = vpop.f32.mrf.mxu3 }
 0x2f9   : > { %v993_v15 = vpop.f32.mrf.mxu2 }
 0x2fa   : > { %v1059_v3 = vadd.f32 %v1058_v25, %v993_v15 }
 0x2fc   : > { %v1074_v52 = vmax.f32 %v1059_v3, 0.0 }
 0x2fe   : > { %v1061_v28 = vpop.f32.mrf.mxu3 }
 0x301   : > { %v996_v9 = vpop.f32.mrf.mxu2 }
 0x302   : > { %v1062_v47 = vadd.f32 %v1061_v28, %v996_v9 }
 0x304   : > { %v1075_v50 = vmax.f32 %v1062_v47, 0.0 }
 0x306   : > { %v1064_v33 = vpop.f32.mrf.mxu3 }
 0x309   : > { %v999_v55 = vpop.f32.mrf.mxu2 }
 0x30a   : > { %v1065_v39 = vadd.f32 %v1064_v33, %v999_v55 }
 0x30c   : > { %v1076_v57 = vmax.f32 %v1065_v39, 0.0 }
 0x32e   : > { %v1192_v47 = vpop.permute.xlu0 %1191 }
 0x33f   : > { %v1067_v34 = vpop.f32.mrf.mxu3 }
 0x342   : > { %v1002_v37 = vpop.f32.mrf.mxu2 }
 0x343   : > { %v1068_v41 = vadd.f32 %v1067_v34, %v1002_v37 }
 0x345   : > { %v1077_v17 = vmax.f32 %v1068_v41, 0.0 }
 0x347   : > { %1089 = vmatpush.msrb.mxu1 %v1077_v17  ;;  %3033 = vmatpush.xpose.msk.msrb.mxu2 %vm292_vm0, %v1077_v17 }
 0x349   : > { %1090 = vmatpush.msrb.mxu1 %v1076_v57 }
 0x34b   : > { %1091 = vmatpush.msrb.mxu1 %v1075_v50  ;;  %3034 = vmatpush.xpose.msk.msrb.mxu2 %vm292_vm0, %v1076_v57 }
 0x34d   : > { %1092 = vmatpush.msrb.mxu1 %v1074_v52 }
 0x34f   : > { %1093 = vmatpush.msrb.mxu1 %v1073_v53  ;;  %3035 = vmatpush.xpose.msk.msrb.mxu2 %vm292_vm0, %v1075_v50 }
 0x351   : > { %1094 = vmatpush.msrb.mxu1 %v1072_v31 }
 0x353   : > { %1095 = vmatpush.msrb.mxu1 %v1071_v46  ;;  %3036 = vmatpush.xpose.msk.msrb.mxu2 %vm292_vm0, %v1074_v52 }
 0x355   : > { %1096 = vmatpush.msrb.mxu1 %v1070_v54 }
 0x356   : > { %3024 = vmatmul.msk.f32.vlgmr.msrb.gmra.mxu1 %vm292_vm0, %v278_v59 }
 0x357   : > { %1156 = vmatpush.msra.mxu1 %v1118_v58  ;;  %3037 = vmatpush.xpose.msk.msrb.mxu2 %vm292_vm0, %v1073_v53 }
 0x359   : > { %1157 = vmatpush.msra.mxu1 %v1117_v13 }
 0x35b   : > { %1158 = vmatpush.msra.mxu1 %v1116_v14  ;;  %3038 = vmatpush.xpose.msk.msrb.mxu2 %vm292_vm0, %v1072_v31 }
 0x35d   : > { %1159 = vmatpush.msra.mxu1 %v1115_v49 }
 0x35f   : > { %1160 = vmatpush.msra.mxu1 %v1114_v60  ;;  %3039 = vmatpush.xpose.msk.msrb.mxu2 %vm292_vm0, %v1071_v46 }
 0x361   : > { %1161 = vmatpush.msra.mxu1 %v1113_v12 }
 0x363   : > { %1162 = vmatpush.msra.mxu1 %v1112_v32  ;;  %3040 = vmatpush.xpose.msk.msrb.mxu2 %vm292_vm0, %v1070_v54 }
 0x365   : > { %1163 = vmatpush.msra.mxu1 %v1111_v30 }
 0x366   : > { %3025 = vmatmul.msk.f32.vlgmr.msra.gmra.mxu1 %vm292_vm0, %v1070_v54  ;;  %3041 = vmatmul.msk.f32.vlgmr.msrb.gmra.mxu2 %vm292_vm0, %v1121_v62 }
 0x36e   : > { %3026 = vmatmul.msk.f32.gmra.mxu1 %vm292_vm0, %v1071_v46 }
 0x376   : > { %3027 = vmatmul.msk.f32.gmra.mxu1 %vm292_vm0, %v1072_v31 }
 0x37e   : > { %3028 = vmatmul.msk.f32.gmra.mxu1 %vm292_vm0, %v1073_v53 }
 0x386   : > { %3029 = vmatmul.msk.f32.gmra.mxu1 %vm292_vm0, %v1074_v52 }
 0x38e   : > { %3030 = vmatmul.msk.f32.gmra.mxu1 %vm292_vm0, %v1075_v50 }
 0x396   : > { %3031 = vmatmul.msk.f32.gmra.mxu1 %vm292_vm0, %v1076_v57 }
 0x39e   : > { %3032 = vmatmul.msk.f32.gmra.mxu1 %vm292_vm0, %v1077_v17 }
 0x3d3   : > { %v3976_v44 = vpop.f32.mrf.mxu1 }
 0x3e3   : > { %v1165_v56 = vpop.f32.mrf.mxu1 }
 0x3e4   : > { %v3978_v36 = vadd.f32 %v1165_v56, %v1123_v4 }
 0x3e6   : > { %1499 = vperm.xlu1 %3179, %v3978_v36   ;;  %1219 = vperm.xlu2 %3178, %v3978_v36   ;;  %v1763_v39 = vmul.f32 %v3639_v42, %v3978_v36  ;;  %v1490_v41 = vmul.f32 %v3641_v43, %v3978_v36 }
 0x3e9   : > { %v1214_v17 = vpop.f32.mrf.mxu2 }
 0x3ea   : > { %v1215_v3 = vadd.f32 %v1214_v17, %v1192_v47 }
 0x3eb   : > { %v1168_v8 = vpop.f32.mrf.mxu1 }
 0x3ec   : > { %v1169_v2 = vadd.f32 %v1168_v8, %v1123_v4  ;;  %v4009_v57 = vperm.slane %v1215_v3, 0  ;;  %v4017_v46 = vperm.slane %v1215_v3, 1 }
 0x3ee   : > { %1503 = vperm.xlu1 %3179, %v1169_v2   ;;  %1224 = vperm.xlu2 %3178, %v1169_v2   ;;  %v1764_v34 = vmul.f32 %v3639_v42, %v1169_v2  ;;  %v1491_v37 = vmul.f32 %v3641_v43, %v1169_v2 }
 0x3f3   : > { %v1171_v29 = vpop.f32.mrf.mxu1 }
 0x3f4   : > { %v1172_v5 = vadd.f32 %v1171_v29, %v1123_v4 }
 0x3f6   : > { %1507 = vperm.xlu1 %3179, %v1172_v5   ;;  %1229 = vperm.xlu2 %3178, %v1172_v5   ;;  %v1765_v33 = vmul.f32 %v3639_v42, %v1172_v5  ;;  %v1492_v55 = vmul.f32 %v3641_v43, %v1172_v5 }
 0x3fb   : > { %v1174_v6 = vpop.f32.mrf.mxu1 }
 0x3fc   : > { %v1175_v24 = vadd.f32 %v1174_v6, %v1123_v4 }
 0x3fe   : > { %1234 = vperm.xlu0 %3180, %v1175_v24   ;;  %3181 = vset.pattern.permute.xlu2 %v3511_v19  ;;  %v1766_v28 = vmul.f32 %v3639_v42, %v1175_v24  ;;  %v1493_v9 = vmul.f32 %v3641_v43, %v1175_v24 }
 0x3ff   : > { %1511 = vperm.xlu2 %3181, %v1175_v24   ;;  %3182 = vset.pattern.permute.xlu1 %v3512_v20 }
 0x403   : > { %v1177_v7 = vpop.f32.mrf.mxu1 }
 0x404   : > { %v1178_v63 = vadd.f32 %v1177_v7, %v1123_v4 }
 0x406   : > { %1239 = vperm.xlu1 %3182, %v1178_v63   ;;  %3183 = vset.pattern.permute.xlu0 %v3511_v19  ;;  %v1767_v25 = vmul.f32 %v3639_v42, %v1178_v63  ;;  %v1494_v15 = vmul.f32 %v3641_v43, %v1178_v63 }
 0x407   : > { %1515 = vperm.xlu2 %3181, %v1178_v63   ;;  %v3393_v63 = vld [vmem:[%s3681_s23 + $0x18] sm:$0xff] }
 0x40b   : > { %v1180_v21 = vpop.f32.mrf.mxu1 }
 0x40c   : > { %v1181_v10 = vadd.f32 %v1180_v21, %v1123_v4 }
 0x40e   : > { %1519 = vperm.xlu0 %3183, %v1181_v10   ;;  %1244 = vperm.xlu1 %3182, %v1181_v10   ;;  %v1768_v23 = vmul.f32 %v3639_v42, %v1181_v10  ;;  %v1495_v0 = vmul.f32 %v3641_v43, %v1181_v10 }
 0x413   : > { %v1183_v22 = vpop.f32.mrf.mxu1 }
 0x414   : > { %v1184_v35 = vadd.f32 %v1183_v22, %v1123_v4 }
 0x416   : > { %3184 = vset.pattern.permute.xlu0 %v3512_v20  ;;  %v1769_v38 = vmul.f32 %v3639_v42, %v1184_v35  ;;  %v1496_v45 = vmul.f32 %v3641_v43, %v1184_v35 }
 0x417   : > { %1249 = vperm.xlu0 %3184, %v1184_v35  }
 0x41b   : > { %v1186_v11 = vpop.f32.mrf.mxu1 }
 0x41c   : > { %v3986_v18 = vadd.f32 %v1186_v11, %v1123_v4 }
 0x41e   : > { %v1770_v40 = vmul.f32 %v3639_v42, %v3986_v18  ;;  %v1497_v1 = vmul.f32 %v3641_v43, %v3986_v18 }
 0x41f   : > { %3185 = vset.pattern.permute.xlu0 %v3511_v19 }
 0x420   : > { %1803 = vmatpush.msra.mxu2 %v1770_v40  ;;  %1868 = vmatpush.msrb.mxu3 %v1497_v1 }
 0x421   : > { %1523 = vperm.xlu0 %3185, %v1184_v35  }
 0x422   : > { %1804 = vmatpush.msra.mxu2 %v1769_v38  ;;  %1869 = vmatpush.msrb.mxu3 %v1496_v45 }
 0x424   : > { %1805 = vmatpush.msra.mxu2 %v1768_v23  ;;  %1870 = vmatpush.msrb.mxu3 %v1495_v0 }
 0x426   : > { %1806 = vmatpush.msra.mxu2 %v1767_v25  ;;  %1871 = vmatpush.msrb.mxu3 %v1494_v15 }
 0x428   : > { %1807 = vmatpush.msra.mxu2 %v1766_v28  ;;  %1872 = vmatpush.msrb.mxu3 %v1493_v9 }
 0x42a   : > { %1808 = vmatpush.msra.mxu2 %v1765_v33  ;;  %1873 = vmatpush.msrb.mxu3 %v1492_v55  ;;  %v3394_v33 = vld [vmem:[%s3681_s23 + $0x20] sm:$0xff] }
 0x42c   : > { %1809 = vmatpush.msra.mxu2 %v1764_v34  ;;  %1874 = vmatpush.msrb.mxu3 %v1491_v37 }
 0x42e   : > { %1810 = vmatpush.msra.mxu2 %v1763_v39  ;;  %1875 = vmatpush.msrb.mxu3 %v1490_v41 }
 0x440   : > { %v1220_v48 = vpop.permute.xlu2 %1219 }
 0x441   : > { %v1258_v50 = vadd.f32 %v4009_v57, %v1220_v48 }
 0x443   : > { %vm1266_vm10 = vcmp.ge.f32.partialorder %v1258_v50, 0.0  ;;  %v1274_v51 = vmul.f32 0.01, %v1258_v50 }
 0x445   : > { %v1282_v52 = vsel %vm1266_vm10, %v1258_v50, %v1274_v51 }
 0x446   : > { %v4013_v53 = vadd.f32 %v3391_v27, %v1282_v52 }
 0x448   : > { %v1298_v31 = vsel %vm292_vm0, %v4013_v53, -inf  ;;  %v1225_v59 = vpop.permute.xlu2 %1224 }
 0x449   : > { %1299 = vmax.xlane.f32.xlu2 %v1298_v31  ;;  %v1259_v11 = vadd.f32 %v4009_v57, %v1225_v59 }
 0x44b   : > { %v1275_v38 = vmul.f32 0.01, %v1259_v11  ;;  %vm1267_vm1 = vcmp.ge.f32.partialorder %v1259_v11, 0.0 }
 0x44d   : > { %v1283_v9 = vsel %vm1267_vm1, %v1259_v11, %v1275_v38 }
 0x44e   : > { %v4053_v34 = vadd.f32 %v3392_v26, %v1283_v9 }
 0x450   : > { %v4026_v62 = vpop.permute.xlu2 %1229  ;;  %v1301_v47 = vsel %vm292_vm0, %v4053_v34, -inf }
 0x458   : > { %v1500_v54 = vpop.permute.xlu1 %1499 }
 0x459   : > { %v1531_v58 = vadd.f32 %v4017_v46, %v1500_v54  ;;  %v1512_v36 = vpop.permute.xlu2 %1511 }
 0x45a   : > { %v1534_v29 = vadd.f32 %v4017_v46, %v1512_v36 }
 0x45b   : > { %vm1539_vm11 = vcmp.ge.f32.partialorder %v1531_v58, 0.0  ;;  %v1547_v13 = vmul.f32 0.01, %v1531_v58 }
 0x45c   : > { %v1550_v24 = vmul.f32 0.01, %v1534_v29  ;;  %vm1542_vm14 = vcmp.ge.f32.partialorder %v1534_v29, 0.0 }
 0x45d   : > { %v1555_v14 = vsel %vm1539_vm11, %v1531_v58, %v1547_v13 }
 0x45e   : > { %v4020_v49 = vadd.f32 %v3391_v27, %v1555_v14  ;;  %v1558_v35 = vsel %vm1542_vm14, %v1534_v29, %v1550_v24  ;;  %v3395_v27 = vld [vmem:[%s3681_s23 + $0x10] sm:$0xff] }
 0x45f   : > { %v4044_v40 = vadd.f32 %v3393_v63, %v1558_v35 }
 0x460   : > { %v1504_v60 = vpop.permute.xlu1 %1503  ;;  %v1571_v12 = vsel %vm292_vm0, %v4020_v49, -inf }
 0x461   : > { %v1532_v32 = vadd.f32 %v4017_v46, %v1504_v60  ;;  %1572 = vmax.xlane.f32.xlu1 %v1571_v12  ;;  %1527 = vperm.xlu2 %3181, %v3986_v18   ;;  %v1516_v45 = vpop.permute.xlu2 %1515  ;;  %v1580_v0 = vsel %vm292_vm0, %v4044_v40, -inf  ;;  %v1260_v60 = vadd.f32 %v4009_v57, %v4026_v62  ;;  %v3396_v12 = vld [vmem:[%s3681_s23 + $0x30] sm:$0xff] }
 0x462   : > { %v1535_v25 = vadd.f32 %v4017_v46, %v1516_v45 }
 0x463   : > { %vm1540_vm12 = vcmp.ge.f32.partialorder %v1532_v32, 0.0  ;;  %v1548_v30 = vmul.f32 0.01, %v1532_v32  ;;  %vm1268_vm6 = vcmp.ge.f32.partialorder %v1260_v60, 0.0 }
 0x464   : > { %v1551_v55 = vmul.f32 0.01, %v1535_v25  ;;  %vm1543_vm2 = vcmp.ge.f32.partialorder %v1535_v25, 0.0 }
 0x465   : > { %v1556_v61 = vsel %vm1540_vm12, %v1532_v32, %v1548_v30  ;;  %v3397_v30 = vld [vmem:[%s3681_s23 + $0x28] sm:$0xff] }
 0x466   : > { %v4029_v4 = vadd.f32 %v3392_v26, %v1556_v61  ;;  %v1559_v17 = vsel %vm1543_vm2, %v1535_v25, %v1551_v55  ;;  %v1276_v26 = vmul.f32 0.01, %v1260_v60  ;;  %v3398_v55 = vld [vmem:[%s3681_s23 + $0x38] sm:$0xff] }
 0x467   : > { %v4061_v51 = vadd.f32 %v3394_v33, %v1559_v17 }
 0x468   : > { %v1574_v56 = vsel %vm292_vm0, %v4029_v4, -inf  ;;  %v1508_v8 = vpop.permute.xlu1 %1507  ;;  %v1284_v62 = vsel %vm1268_vm6, %v1260_v60, %v1276_v26 }
 0x469   : > { %1575 = vmax.xlane.f32.xlu0 %v1574_v56  ;;  %3186 = vset.pattern.permute.xlu2 %v3510_v16  ;;  %v1533_v28 = vadd.f32 %v4017_v46, %v1508_v8  ;;  %v1583_v58 = vsel %vm292_vm0, %v4061_v51, -inf  ;;  %v4083_v29 = vadd.f32 %v3395_v27, %v1284_v62 }
 0x46b   : > { %v1549_v37 = vmul.f32 0.01, %v1533_v28  ;;  %vm1541_vm3 = vcmp.ge.f32.partialorder %v1533_v28, 0.0  ;;  %v1304_v24 = vsel %vm292_vm0, %v4083_v29, -inf }
 0x46d   : > { %v1557_v50 = vsel %vm1541_vm3, %v1533_v28, %v1549_v37 }
 0x46e   : > { %v4064_v31 = vadd.f32 %v3395_v27, %v1557_v50 }
 0x470   : > { %v1235_v2 = vpop.permute.xlu0 %1234  ;;  %v1577_v59 = vsel %vm292_vm0, %v4064_v31, -inf }
 0x471   : > { %v1261_v5 = vadd.f32 %v4009_v57, %v1235_v2 }
 0x473   : > { %vm1269_vm13 = vcmp.ge.f32.partialorder %v1261_v5, 0.0  ;;  %v1277_v6 = vmul.f32 0.01, %v1261_v5 }
 0x475   : > { %v1285_v7 = vsel %vm1269_vm13, %v1261_v5, %v1277_v6 }
 0x476   : > { %v4037_v21 = vadd.f32 %v3393_v63, %v1285_v7 }
 0x478   : > { %v1240_v10 = vpop.permute.xlu1 %1239  ;;  %v1307_v22 = vsel %vm292_vm0, %v4037_v21, -inf }
 0x479   : > { %v1262_v16 = vadd.f32 %v4009_v57, %v1240_v10  ;;  %1308 = vmax.xlane.f32.xlu0 %v1307_v22 }
 0x47a   : > { %1254 = vperm.xlu1 %3182, %v3986_v18  }
 0x47b   : > { %v1278_v1 = vmul.f32 0.01, %v1262_v16  ;;  %vm1270_vm15 = vcmp.ge.f32.partialorder %v1262_v16, 0.0 }
 0x47d   : > { %v1286_v15 = vsel %vm1270_vm15, %v1262_v16, %v1278_v1 }
 0x47e   : > { %v4051_v18 = vadd.f32 %v3394_v33, %v1286_v15 }
 0x480   : > { %v1520_v23 = vpop.permute.xlu0 %1519  ;;  %v1310_v39 = vsel %vm292_vm0, %v4051_v18, -inf  ;;  %v1245_v36 = vpop.permute.xlu1 %1244 }
 0x481   : > { %1581 = vmax.xlane.f32.xlu0 %v1580_v0  ;;  %v1536_v3 = vadd.f32 %v4017_v46, %v1520_v23  ;;  %v1263_v2 = vadd.f32 %v4009_v57, %v1245_v36 }
 0x483   : > { %v1552_v54 = vmul.f32 0.01, %v1536_v3  ;;  %vm1544_vm5 = vcmp.ge.f32.partialorder %v1536_v3, 0.0  ;;  %v1279_v5 = vmul.f32 0.01, %v1263_v2  ;;  %vm1271_vm7 = vcmp.ge.f32.partialorder %v1263_v2, 0.0 }
 0x485   : > { %v1560_v14 = vsel %vm1544_vm5, %v1536_v3, %v1552_v54  ;;  %v1287_v63 = vsel %vm1271_vm7, %v1263_v2, %v1279_v5 }
 0x486   : > { %v4076_v61 = vadd.f32 %v3397_v30, %v1560_v14  ;;  %v4088_v10 = vadd.f32 %v3397_v30, %v1287_v63 }
 0x488   : > { %v1586_v8 = vsel %vm292_vm0, %v4076_v61, -inf  ;;  %v1313_v16 = vsel %vm292_vm0, %v4088_v10, -inf }
 0x489   : > { %v1250_v41 = vpop.permute.xlu0 %1249  ;;  %1311 = vmax.xlane.f32.xlu0 %v1310_v39 }
 0x48a   : > { %v1264_v48 = vadd.f32 %v4009_v57, %v1250_v41  ;;  %1302 = vmax.xlane.f32.xlu2 %v1301_v47 }
 0x48c   : > { %v1280_v52 = vmul.f32 0.01, %v1264_v48  ;;  %vm1272_vm4 = vcmp.ge.f32.partialorder %v1264_v48, 0.0 }
 0x48e   : > { %v1288_v13 = vsel %vm1272_vm4, %v1264_v48, %v1280_v52 }
 0x48f   : > { %v4073_v32 = vadd.f32 %v3396_v12, %v1288_v13 }
 0x491   : > { %1584 = vmax.xlane.f32.xlu0 %v1583_v58  ;;  %v1316_v56 = vsel %vm292_vm0, %v4073_v32, -inf }
 0x492   : > { %1578 = vmax.xlane.f32.xlu2 %v1577_v59 }
 0x493   : > { %v1524_v6 = vpop.permute.xlu0 %1523 }
 0x494   : > { %v1537_v7 = vadd.f32 %v4017_v46, %v1524_v6 }
 0x496   : > { %v1553_v22 = vmul.f32 0.01, %v1537_v7  ;;  %vm1545_vm8 = vcmp.ge.f32.partialorder %v1537_v7, 0.0 }
 0x498   : > { %v1561_v35 = vsel %vm1545_vm8, %v1537_v7, %v1553_v22 }
 0x499   : > { %1317 = vmax.xlane.f32.xlu0 %v1316_v56  ;;  %v4092_v11 = vadd.f32 %v3396_v12, %v1561_v35 }
 0x49a   : > { %1587 = vmax.xlane.f32.xlu2 %v1586_v8 }
 0x49b   : > { %v1589_v1 = vsel %vm292_vm0, %v4092_v11, -inf }
 0x4a4   : > { %1305 = vmax.xlane.f32.xlu1 %v1304_v24 }
 0x4ac   : > { %1314 = vmax.xlane.f32.xlu1 %v1313_v16 }
 0x4b4   : > { %1590 = vmax.xlane.f32.xlu1 %v1589_v1 }
 0x4bc   : > { %v1300_v38 = vpop.xlane.xlu2 %1299 }
 0x4bd   : > { %v1322_v45 = vsub.f32 %v4013_v53, %v1300_v38 }
 0x4bf   : > { %v1330_v23 = vmul.f32 1.442695, %v1322_v45 }
 0x4c1   : > { %3259 = vpow2.f32 %v1330_v23 }
 0x4c4   : > { %v1528_v0 = vpop.permute.xlu2 %1527 }
 0x4c5   : > { %v1538_v25 = vadd.f32 %v4017_v46, %v1528_v0 }
 0x4c7   : > { %v4098_v15 = vpop.eup %3259  ;;  %vm1546_vm9 = vcmp.ge.f32.partialorder %v1538_v25, 0.0  ;;  %v1554_v28 = vmul.f32 0.01, %v1538_v25 }
 0x4c8   : > { %v1346_v9 = vsel %vm292_vm0, %v4098_v15, 0.0 }
 0x4c9   : > { %1347 = vadd.xlane.f32.xlu2 %v1346_v9  ;;  %v1562_v33 = vsel %vm1546_vm9, %v1538_v25, %v1554_v28 }
 0x4ca   : > { %v4103_v37 = vadd.f32 %v3398_v55, %v1562_v33 }
 0x4cc   : > { %v1592_v53 = vsel %vm292_vm0, %v4103_v37, -inf }
 0x4d1   : > { %1593 = vmax.xlane.f32.xlu2 %v1592_v53 }
 0x4d4   : > { %v1573_v39 = vpop.xlane.xlu1 %1572 }
 0x4d5   : > { %v1595_v41 = vsub.f32 %v4020_v49, %v1573_v39 }
 0x4d7   : > { %v1603_v46 = vmul.f32 1.442695, %v1595_v41 }
 0x4d9   : > { %3261 = vpow2.f32 %v1603_v46 }
 0x4dc   : > { %v1576_v3 = vpop.xlane.xlu0 %1575 }
 0x4dd   : > { %v1596_v48 = vsub.f32 %v4029_v4, %v1576_v3 }
 0x4df   : > { %v4108_v47 = vpop.eup %3261  ;;  %v1605_v54 = vmul.f32 1.442695, %v1596_v48 }
 0x4e0   : > { %v1619_v17 = vsel %vm292_vm0, %v4108_v47, 0.0 }
 0x4e1   : > { %1620 = vadd.xlane.f32.xlu0 %v1619_v17  ;;  %3263 = vpow2.f32 %v1605_v54 }
 0x4e7   : > { %v4119_v4 = vpop.eup %3263 }
 0x4ec   : > { %v1309_v50 = vpop.xlane.xlu0 %1308  ;;  %v1255_v52 = vpop.permute.xlu1 %1254 }
 0x4ed   : > { %v1265_v27 = vadd.f32 %v4009_v57, %v1255_v52  ;;  %v1325_v13 = vsub.f32 %v4037_v21, %v1309_v50  ;;  %v1622_v57 = vsel %vm292_vm0, %v4119_v4, 0.0 }
 0x4ef   : > { %vm1273_vm10 = vcmp.ge.f32.partialorder %v1265_v27, 0.0  ;;  %v1281_v58 = vmul.f32 0.01, %v1265_v27  ;;  %v1336_v12 = vmul.f32 1.442695, %v1325_v13 }
 0x4f1   : > { %v1289_v59 = vsel %vm1273_vm10, %v1265_v27, %v1281_v58  ;;  %3265 = vpow2.f32 %v1336_v12 }
 0x4f2   : > { %v4114_v49 = vadd.f32 %v3398_v55, %v1289_v59 }
 0x4f4   : > { %v1582_v14 = vpop.xlane.xlu0 %1581  ;;  %v1319_v60 = vsel %vm292_vm0, %v4114_v49, -inf }
 0x4f5   : > { %1320 = vmax.xlane.f32.xlu1 %v1319_v60  ;;  %v1598_v53 = vsub.f32 %v4044_v40, %v1582_v14 }
 0x4f7   : > { %v4124_v8 = vpop.eup %3265  ;;  %v1609_v46 = vmul.f32 1.442695, %v1598_v53 }
 0x4f8   : > { %v1355_v2 = vsel %vm292_vm0, %v4124_v8, 0.0 }
 0x4fc   : > { %v1312_v30 = vpop.xlane.xlu0 %1311 }
 0x4fd   : > { %1623 = vadd.xlane.f32.xlu1 %v1622_v57  ;;  %v1303_v26 = vpop.xlane.xlu2 %1302  ;;  %v1326_v63 = vsub.f32 %v4051_v18, %v1312_v30 }
 0x4fe   : > { %v1323_v56 = vsub.f32 %v4053_v34, %v1303_v26 }
 0x4ff   : > { %v1338_v16 = vmul.f32 1.442695, %v1326_v63 }
 0x500   : > { %v1332_v36 = vmul.f32 1.442695, %v1323_v56 }
 0x502   : > { %3267 = vpow2.f32 %v1332_v36 }
 0x504   : > { %v1585_v21 = vpop.xlane.xlu0 %1584 }
 0x505   : > { %v1599_v62 = vsub.f32 %v4061_v51, %v1585_v21  ;;  %1356 = vadd.xlane.f32.xlu1 %v1355_v2  ;;  %v1579_v5 = vpop.xlane.xlu2 %1578 }
 0x506   : > { %v1597_v6 = vsub.f32 %v4064_v31, %v1579_v5 }
 0x507   : > { %v1611_v24 = vmul.f32 1.442695, %v1599_v62 }
 0x508   : > { %v4130_v7 = vpop.eup %3267  ;;  %v1607_v34 = vmul.f32 1.442695, %v1597_v6 }
 0x509   : > { %3269 = vpow2.f32 %v1611_v24  ;;  %v1349_v22 = vsel %vm292_vm0, %v4130_v7, 0.0 }
 0x50a   : > { %3271 = vpow2.f32 %v1607_v34  ;;  %1350 = vadd.xlane.f32.xlu0 %v1349_v22 }
 0x50b   : > { %3273 = vpow2.f32 %v1338_v16 }
 0x50c   : > { %v1318_v35 = vpop.xlane.xlu0 %1317 }
 0x50d   : > { %v1328_v51 = vsub.f32 %v4073_v32, %v1318_v35  ;;  %v1588_v1 = vpop.xlane.xlu2 %1587 }
 0x50e   : > { %v1600_v18 = vsub.f32 %v4076_v61, %v1588_v1 }
 0x50f   : > { %v4136_v38 = vpop.eup %3269  ;;  %v1342_v31 = vmul.f32 1.442695, %v1328_v51 }
 0x510   : > { %v4138_v45 = vpop.eup %3271  ;;  %v1631_v23 = vsel %vm292_vm0, %v4136_v38, 0.0  ;;  %v1613_v25 = vmul.f32 1.442695, %v1600_v18 }
 0x511   : > { %3275 = vpow2.f32 %v1342_v31  ;;  %1632 = vadd.xlane.f32.xlu1 %v1631_v23  ;;  %v1625_v0 = vsel %vm292_vm0, %v4138_v45, 0.0  ;;  %v4145_v32 = vpop.eup %3273 }
 0x512   : > { %1626 = vadd.xlane.f32.xlu0 %v1625_v0  ;;  %3277 = vpow2.f32 %v1613_v25  ;;  %v1358_v55 = vsel %vm292_vm0, %v4145_v32, 0.0 }
 0x517   : > { %v4147_v28 = vpop.eup %3275  ;;  %v1306_v9 = vpop.xlane.xlu1 %1305 }
 0x518   : > { %v1324_v33 = vsub.f32 %v4083_v29, %v1306_v9  ;;  %v1364_v61 = vsel %vm292_vm0, %v4147_v28, 0.0  ;;  %v4155_v41 = vpop.eup %3277 }
 0x519   : > { %1365 = vadd.xlane.f32.xlu1 %v1364_v61  ;;  %v1634_v3 = vsel %vm292_vm0, %v4155_v41, 0.0 }
 0x51a   : > { %v1334_v39 = vmul.f32 1.442695, %v1324_v33  ;;  %1359 = vadd.xlane.f32.xlu0 %v1358_v55 }
 0x51c   : > { %3279 = vpow2.f32 %v1334_v39 }
 0x51d   : > { %3281 = vpow2.f32 %v1609_v46 }
 0x51f   : > { %v1315_v17 = vpop.xlane.xlu1 %1314 }
 0x520   : > { %v1327_v48 = vsub.f32 %v4088_v10, %v1315_v17 }
 0x522   : > { %v4159_v29 = vpop.eup %3279  ;;  %1635 = vadd.xlane.f32.xlu0 %v1634_v3  ;;  %v1340_v40 = vmul.f32 1.442695, %v1327_v48 }
 0x523   : > { %v1352_v50 = vsel %vm292_vm0, %v4159_v29, 0.0  ;;  %v4164_v27 = vpop.eup %3281 }
 0x524   : > { %1353 = vadd.xlane.f32.xlu2 %v1352_v50  ;;  %3283 = vpow2.f32 %v1340_v40  ;;  %v1628_v58 = vsel %vm292_vm0, %v4164_v27, 0.0 }
 0x527   : > { %v1591_v52 = vpop.xlane.xlu1 %1590 }
 0x528   : > { %v1601_v54 = vsub.f32 %v4092_v11, %v1591_v52 }
 0x52a   : > { %v1615_v59 = vmul.f32 1.442695, %v1601_v54  ;;  %v4169_v13 = vpop.eup %3283 }
 0x52b   : > { %v1361_v10 = vsel %vm292_vm0, %v4169_v13, 0.0 }
 0x52c   : > { %1629 = vadd.xlane.f32.xlu2 %v1628_v58  ;;  %3285 = vpow2.f32 %v1615_v59 }
 0x532   : > { %v4173_v14 = vpop.eup %3285 }
 0x533   : > { %v1637_v60 = vsel %vm292_vm0, %v4173_v14, 0.0 }
 0x534   : > { %1362 = vadd.xlane.f32.xlu2 %v1361_v10 }
 0x53c   : > { %1638 = vadd.xlane.f32.xlu2 %v1637_v60  ;;  %v1348_v12 = vpop.xlane.xlu2 %1347 }
 0x53d   : > { %3287 = vrcp.f32 %v1348_v12  ;;  %v1381_v36 = vand.u32 2147483648, %v1348_v12  ;;  %v1379_v62 = vand.u32 2147483647, %v1348_v12  ;;  %vm1375_vm12 = vweird.f32 %v1348_v12 }
 0x53f   : > { %v1382_v6 = vor.u32 1.1754944e-38, %v1381_v36  ;;  %vm1380_vm14 = vcmp.eq.f32.partialorder %v1379_v62, 8.507059e+37 }
 0x543   : > { %v3288_v11 = vpop.eup %3287 }
 0x544   : > { %v1371_v30 = vmul.f32 %v3288_v11, %v1348_v12  ;;  %v1594_v57 = vpop.xlane.xlu2 %1593  ;;  %vm1376_vm11 = vweird.f32 %v3288_v11 }
 0x545   : > { %v1602_v26 = vsub.f32 %v4103_v37, %v1594_v57  ;;  %vm1377_vm13 = vmor %vm1375_vm12, %vm1376_vm11 }
 0x546   : > { %v1372_v56 = vsub.f32 1.0, %v1371_v30 }
 0x547   : > { %v1617_v21 = vmul.f32 1.442695, %v1602_v26 }
 0x548   : > { %v1373_v2 = vmul.f32 %v3288_v11, %v1372_v56 }
 0x549   : > { %3289 = vpow2.f32 %v1617_v21 }
 0x54a   : > { %v1374_v5 = vadd.f32 %v3288_v11, %v1373_v2 }
 0x54c   : > { %v1378_v24 = vsel %vm1377_vm13, %v3288_v11, %v1374_v5 }
 0x54d   : > { %v1383_v63 = vsel %vm1380_vm14, %v1382_v6, %v1378_v24 }
 0x54e   : > { %v1384_v34 = vmul.f32 %v4098_v15, %v1383_v63 }
 0x54f   : > { %v4179_v22 = vpop.eup %3289 }
 0x550   : > { %3050 = vmatmul.msk.f32.vlgmr.msrb.gmra.mxu3 %vm292_vm0, %v1384_v34  ;;  %v1640_v37 = vsel %vm292_vm0, %v4179_v22, 0.0 }
 0x551   : > { %1641 = vadd.xlane.f32.xlu1 %v1640_v37 }
 0x554   : > { %v1621_v16 = vpop.xlane.xlu0 %1620 }
 0x555   : > { %3291 = vrcp.f32 %v1621_v16  ;;  %v1654_v31 = vand.u32 2147483648, %v1621_v16  ;;  %v1652_v23 = vand.u32 2147483647, %v1621_v16  ;;  %vm1648_vm1 = vweird.f32 %v1621_v16 }
 0x557   : > { %v1655_v15 = vor.u32 1.1754944e-38, %v1654_v31  ;;  %vm1653_vm3 = vcmp.eq.f32.partialorder %v1652_v23, 8.507059e+37 }
 0x55b   : > { %v3292_v35 = vpop.eup %3291 }
 0x55c   : > { %v1644_v51 = vmul.f32 %v3292_v35, %v1621_v16  ;;  %vm1649_vm15 = vweird.f32 %v3292_v35 }
 0x55d   : > { %vm1650_vm2 = vmor %vm1648_vm1, %vm1649_vm15 }
 0x55e   : > { %v1645_v1 = vsub.f32 1.0, %v1644_v51 }
 0x560   : > { %v1646_v18 = vmul.f32 %v3292_v35, %v1645_v1 }
 0x562   : > { %v1647_v0 = vadd.f32 %v3292_v35, %v1646_v18 }
 0x564   : > { %v1651_v25 = vsel %vm1650_vm2, %v3292_v35, %v1647_v0 }
 0x565   : > { %v1656_v9 = vsel %vm1653_vm3, %v1655_v15, %v1651_v25 }
 0x566   : > { %v1657_v33 = vmul.f32 %v4108_v47, %v1656_v9 }
 0x568   : > { %v1321_v61 = vpop.xlane.xlu1 %1320  ;;  %3042 = vmatmul.msk.f32.vlgmr.msra.gmra.mxu2 %vm292_vm0, %v1657_v33 }
 0x569   : > { %v1329_v55 = vsub.f32 %v4114_v49, %v1321_v61 }
 0x56b   : > { %v1344_v53 = vmul.f32 1.442695, %v1329_v55 }
 0x56d   : > { %3293 = vpow2.f32 %v1344_v53 }
 0x570   : > { %v1624_v39 = vpop.xlane.xlu1 %1623 }
 0x571   : > { %3295 = vrcp.f32 %v1624_v39  ;;  %v1669_v40 = vand.u32 2147483648, %v1624_v39  ;;  %v1667_v52 = vand.u32 2147483647, %v1624_v39  ;;  %vm1663_vm5 = vweird.f32 %v1624_v39 }
 0x573   : > { %v4187_v46 = vpop.eup %3293  ;;  %v1670_v58 = vor.u32 1.1754944e-38, %v1669_v40  ;;  %vm1668_vm7 = vcmp.eq.f32.partialorder %v1667_v52, 8.507059e+37 }
 0x574   : > { %v1367_v17 = vsel %vm292_vm0, %v4187_v46, 0.0 }
 0x575   : > { %1368 = vadd.xlane.f32.xlu0 %v1367_v17 }
 0x577   : > { %v3296_v3 = vpop.eup %3295 }
 0x578   : > { %v1659_v48 = vmul.f32 %v3296_v3, %v1624_v39  ;;  %vm1664_vm4 = vweird.f32 %v3296_v3  ;;  %v4193_v62 = vpop.xlane.xlu1 %1356 }
 0x579   : > { %vm1665_vm6 = vmor %vm1663_vm5, %vm1664_vm4 }
 0x57a   : > { %v1660_v50 = vsub.f32 1.0, %v1659_v48 }
 0x57c   : > { %v1661_v47 = vmul.f32 %v3296_v3, %v1660_v50 }
 0x57d   : > { %v1351_v54 = vpop.xlane.xlu0 %1350 }
 0x57e   : > { %3297 = vrcp.f32 %v1351_v54  ;;  %v1662_v49 = vadd.f32 %v3296_v3, %v1661_v47  ;;  %v1396_v56 = vand.u32 2147483648, %v1351_v54  ;;  %v1394_v21 = vand.u32 2147483647, %v1351_v54 }
 0x57f   : > { %vm1390_vm9 = vweird.f32 %v1351_v54 }
 0x580   : > { %v1666_v59 = vsel %vm1665_vm6, %v3296_v3, %v1662_v49  ;;  %v1397_v6 = vor.u32 1.1754944e-38, %v1396_v56  ;;  %vm1395_vm11 = vcmp.eq.f32.partialorder %v1394_v21, 8.507059e+37  ;;  %v1426_v49 = vand.u32 2147483648, %v4193_v62 }
 0x581   : > { %v1671_v10 = vsel %vm1668_vm7, %v1670_v58, %v1666_v59  ;;  %vm1420_vm6 = vweird.f32 %v4193_v62 }
 0x582   : > { %v1672_v60 = vmul.f32 %v4119_v4, %v1671_v10 }
 0x584   : > { %v3298_v12 = vpop.eup %3297  ;;  %3043 = vmatmul.msk.f32.gmra.mxu2 %vm292_vm0, %v1672_v60  ;;  %v4198_v1 = vpop.xlane.xlu1 %1632 }
 0x585   : > { %v1386_v11 = vmul.f32 %v3298_v12, %v1351_v54  ;;  %v1627_v30 = vpop.xlane.xlu0 %1626  ;;  %vm1391_vm8 = vweird.f32 %v3298_v12 }
 0x586   : > { %3299 = vrcp.f32 %v1627_v30  ;;  %vm1392_vm10 = vmor %vm1390_vm9, %vm1391_vm8  ;;  %v1684_v37 = vand.u32 2147483648, %v1627_v30  ;;  %v1682_v35 = vand.u32 2147483647, %v1627_v30  ;;  %vm1678_vm13 = vweird.f32 %v1627_v30 }
 0x587   : > { %v1387_v57 = vsub.f32 1.0, %v1386_v11  ;;  %3301 = vrcp.f32 %v4193_v62  ;;  %vm1708_vm9 = vweird.f32 %v4198_v1 }
 0x588   : > { %v1685_v31 = vor.u32 1.1754944e-38, %v1684_v37  ;;  %vm1683_vm15 = vcmp.eq.f32.partialorder %v1682_v35, 8.507059e+37  ;;  %3303 = vrcp.f32 %v4198_v1 }
 0x589   : > { %v1388_v26 = vmul.f32 %v3298_v12, %v1387_v57 }
 0x58b   : > { %v1389_v36 = vadd.f32 %v3298_v12, %v1388_v26 }
 0x58c   : > { %v3300_v2 = vpop.eup %3299  ;;  %v4227_v60 = vpop.xlane.xlu1 %1365 }
 0x58d   : > { %v1674_v5 = vmul.f32 %v3300_v2, %v1627_v30  ;;  %v1393_v24 = vsel %vm1392_vm10, %v3298_v12, %v1389_v36  ;;  %vm1679_vm12 = vweird.f32 %v3300_v2  ;;  %v4200_v18 = vpop.xlane.xlu0 %1359  ;;  %v4202_v0 = vpop.eup %3301 }
 0x58e   : > { %v1398_v63 = vsel %vm1395_vm11, %v1397_v6, %v1393_v24  ;;  %vm1680_vm14 = vmor %vm1678_vm13, %vm1679_vm12  ;;  %v1416_v25 = vmul.f32 %v4202_v0, %v4193_v62  ;;  %v4210_v33 = vpop.eup %3303  ;;  %vm1421_vm3 = vweird.f32 %v4202_v0 }
 0x58f   : > { %v1675_v4 = vsub.f32 1.0, %v1674_v5  ;;  %v1399_v16 = vmul.f32 %v4130_v7, %v1398_v63  ;;  %v1427_v5 = vor.u32 1.1754944e-38, %v1426_v49  ;;  %vm4242_vm7 = vmor %vm1420_vm6, %vm1421_vm3  ;;  %vm1709_vm12 = vweird.f32 %v4210_v33 }
 0x590   : > { %v1417_v61 = vsub.f32 1.0, %v1416_v25 }
 0x591   : > { %v1676_v34 = vmul.f32 %v3300_v2, %v1675_v4  ;;  %3051 = vmatmul.msk.f32.gmra.mxu3 %vm292_vm0, %v1399_v16 }
 0x592   : > { %v1418_v48 = vmul.f32 %v4202_v0, %v1417_v61 }
 0x593   : > { %v1677_v51 = vadd.f32 %v3300_v2, %v1676_v34 }
 0x594   : > { %v1419_v30 = vadd.f32 %v4202_v0, %v1418_v48 }
 0x595   : > { %v1681_v23 = vsel %vm1680_vm14, %v3300_v2, %v1677_v51  ;;  %v4214_v39 = vpop.xlane.xlu0 %1635  ;;  %v1424_v2 = vand.u32 2147483647, %v4193_v62  ;;  %v1714_v51 = vand.u32 2147483648, %v4198_v1 }
 0x596   : > { %v1686_v7 = vsel %vm1683_vm15, %v1685_v31, %v1681_v23  ;;  %v1423_v62 = vsel %vm4242_vm7, %v4202_v0, %v1419_v30  ;;  %v1712_v31 = vand.u32 2147483647, %v4198_v1  ;;  %vm1723_vm6 = vweird.f32 %v4214_v39 }
 0x597   : > { %v1354_v15 = vpop.xlane.xlu2 %1353  ;;  %v1687_v9 = vmul.f32 %v4138_v45, %v1686_v7  ;;  %v1704_v45 = vmul.f32 %v4210_v33, %v4198_v1  ;;  %vm1425_vm10 = vcmp.eq.f32.partialorder %v1424_v2, 8.507059e+37 }
 0x598   : > { %3305 = vrcp.f32 %v1354_v15  ;;  %v1411_v47 = vand.u32 2147483648, %v1354_v15  ;;  %v1409_v54 = vand.u32 2147483647, %v1354_v15  ;;  %vm1405_vm2 = vweird.f32 %v1354_v15 }
 0x599   : > { %3307 = vrcp.f32 %v4200_v18  ;;  %3044 = vmatmul.msk.f32.gmra.mxu2 %vm292_vm0, %v1687_v9  ;;  %v1705_v10 = vsub.f32 1.0, %v1704_v45  ;;  %v1428_v0 = vsel %vm1425_vm10, %v1427_v5, %v1423_v62  ;;  %v1727_v5 = vand.u32 2147483647, %v4214_v39 }
 0x59a   : > { %v1412_v11 = vor.u32 1.1754944e-38, %v1411_v47  ;;  %vm1410_vm5 = vcmp.eq.f32.partialorder %v1409_v54, 8.507059e+37  ;;  %v1439_v54 = vand.u32 2147483647, %v4200_v18 }
 0x59b   : > { %v1706_v63 = vmul.f32 %v4210_v33, %v1705_v10 }
 0x59d   : > { %v1707_v25 = vadd.f32 %v4210_v33, %v1706_v63 }
 0x59e   : > { %v3306_v55 = vpop.eup %3305 }
 0x59f   : > { %v4212_v53 = vpop.eup %3307  ;;  %v1401_v17 = vmul.f32 %v3306_v55, %v1354_v15  ;;  %v4216_v3 = vpop.xlane.xlu2 %1629  ;;  %vm1406_vm1 = vweird.f32 %v3306_v55 }
 0x5a0   : > { %3309 = vrcp.f32 %v4216_v3  ;;  %v1431_v40 = vmul.f32 %v4212_v53, %v4200_v18  ;;  %vm1407_vm4 = vmor %vm1405_vm2, %vm1406_vm1  ;;  %v1699_v37 = vand.u32 2147483648, %v4216_v3  ;;  %v1697_v35 = vand.u32 2147483647, %v4216_v3 }
 0x5a1   : > { %v1402_v50 = vsub.f32 1.0, %v1401_v17  ;;  %3311 = vrcp.f32 %v4214_v39  ;;  %vm1693_vm11 = vweird.f32 %v4216_v3  ;;  %vm1436_vm14 = vweird.f32 %v4212_v53  ;;  %vm1710_vm2 = vmor %vm1708_vm9, %vm1709_vm12 }
 0x5a2   : > { %v1432_v12 = vsub.f32 1.0, %v1431_v40  ;;  %v1700_v7 = vor.u32 1.1754944e-38, %v1699_v37  ;;  %vm1698_vm15 = vcmp.eq.f32.partialorder %v1697_v35, 8.507059e+37  ;;  %v1429_v40 = vmul.f32 %v4124_v8, %v1428_v0  ;;  %v1991_v37 = vld [vmem:[#allocation2 + $0xb0] sm:$0xff]  ;;  %v1989_v35 = vld [vmem:[#allocation2 + $0xa0] sm:$0xff] }
 0x5a3   : > { %v1403_v52 = vmul.f32 %v3306_v55, %v1402_v50  ;;  %v1441_v50 = vand.u32 2147483648, %v4200_v18  ;;  %vm1435_vm1 = vweird.f32 %v4200_v18  ;;  %v1715_v8 = vor.u32 1.1754944e-38, %v1714_v51 }
 0x5a4   : > { %v1433_v34 = vmul.f32 %v4212_v53, %v1432_v12  ;;  %vm1437_vm3 = vmor %vm1435_vm1, %vm1436_vm14  ;;  %vm1728_vm12 = vcmp.eq.f32.partialorder %v1727_v5, 8.507059e+37  ;;  %vm1465_vm1 = vweird.f32 %v4227_v60  ;;  %v1471_v0 = vand.u32 2147483648, %v4227_v60 }
 0x5a5   : > { %v1404_v58 = vadd.f32 %v3306_v55, %v1403_v52  ;;  %v1442_v18 = vor.u32 1.1754944e-38, %v1441_v50 }
 0x5a6   : > { %v3310_v59 = vpop.eup %3309  ;;  %v1434_v9 = vadd.f32 %v4212_v53, %v1433_v34 }
 0x5a7   : > { %v1689_v57 = vmul.f32 %v3310_v59, %v4216_v3  ;;  %v4231_v26 = vpop.xlane.xlu2 %1362  ;;  %v1408_v56 = vsel %vm1407_vm4, %v3306_v55, %v1404_v58  ;;  %v4233_v36 = vpop.eup %3311  ;;  %vm1694_vm8 = vweird.f32 %v3310_v59  ;;  %v1711_v58 = vsel %vm1710_vm2, %v4210_v33, %v1707_v25 }
 0x5a8   : > { %3313 = vrcp.f32 %v4231_v26  ;;  %v1413_v21 = vsel %vm1410_vm5, %v1412_v11, %v1408_v56  ;;  %v1719_v16 = vmul.f32 %v4233_v36, %v4214_v39  ;;  %vm1695_vm13 = vmor %vm1693_vm11, %vm1694_vm8  ;;  %v1438_v1 = vsel %vm1437_vm3, %v4212_v53, %v1434_v9 }
 0x5a9   : > { %3315 = vrcp.f32 %v4227_v60  ;;  %v1690_v6 = vsub.f32 1.0, %v1689_v57  ;;  %v1414_v4 = vmul.f32 %v4159_v29, %v1413_v21  ;;  %vm1713_vm4 = vcmp.eq.f32.partialorder %v1712_v31, 8.507059e+37 }
 0x5aa   : > { %v1720_v55 = vsub.f32 1.0, %v1719_v16  ;;  %v1716_v10 = vsel %vm1713_vm4, %v1715_v8, %v1711_v58  ;;  %vm1440_vm5 = vcmp.eq.f32.partialorder %v1439_v54, 8.507059e+37  ;;  %vm1724_vm7 = vweird.f32 %v4233_v36  ;;  %v1990_v16 = vld [vmem:[#allocation2 + $0xa8] sm:$0xff]  ;;  %v1988_v54 = vld [vmem:[#allocation2 + $0x98] sm:$0xff] }
 0x5ab   : > { %v1691_v29 = vmul.f32 %v3310_v59, %v1690_v6  ;;  %3052 = vmatmul.msk.f32.gmra.mxu3 %vm292_vm0, %v1414_v4  ;;  %v1443_v11 = vsel %vm1440_vm5, %v1442_v18, %v1438_v1  ;;  %v1729_v53 = vand.u32 2147483648, %v4214_v39  ;;  %v1456_v21 = vand.u32 2147483648, %v4231_v26  ;;  %v1992_v6 = vld [vmem:[#allocation2 + $0xb8] sm:$0xff]  ;;  %vm4309_vm10 = vmor %vm1723_vm6, %vm1724_vm7 }
 0x5ac   : > { %v1717_v2 = vmul.f32 %v4136_v38, %v1716_v10  ;;  %vm1450_vm9 = vweird.f32 %v4231_v26  ;;  %v1444_v24 = vmul.f32 %v4145_v32, %v1443_v11  ;;  %v1454_v34 = vand.u32 2147483647, %v4231_v26  ;;  %2030 = vmatpush.msrb.mxu1 %v1992_v6 }
 0x5ad   : > { %v1692_v23 = vadd.f32 %v3310_v59, %v1691_v29  ;;  %v1730_v29 = vor.u32 1.1754944e-38, %v1729_v53 }
 0x5ae   : > { %v4261_v15 = vpop.eup %3313  ;;  %2031 = vmatpush.msrb.mxu1 %v1991_v37 }
 0x5af   : > { %v4266_v61 = vpop.eup %3315  ;;  %v1446_v17 = vmul.f32 %v4261_v15, %v4231_v26  ;;  %v4270_v3 = vpop.xlane.xlu2 %1638  ;;  %v1696_v48 = vsel %vm1695_vm13, %v3310_v59, %v1692_v23  ;;  %v1721_v59 = vmul.f32 %v4233_v36, %v1720_v55  ;;  %vm1451_vm8 = vweird.f32 %v4261_v15 }
 0x5b0   : > { %3317 = vrcp.f32 %v4270_v3  ;;  %v1701_v45 = vsel %vm1698_vm15, %v1700_v7, %v1696_v48  ;;  %v1461_v49 = vmul.f32 %v4266_v61, %v4227_v60  ;;  %vm1452_vm11 = vmor %vm1450_vm9, %vm1451_vm8  ;;  %v1457_v26 = vor.u32 1.1754944e-38, %v1456_v21  ;;  %2032 = vmatpush.msrb.mxu1 %v1990_v16 }
 0x5b1   : > { %v1447_v47 = vsub.f32 1.0, %v1446_v17  ;;  %v1702_v52 = vmul.f32 %v4164_v27, %v1701_v45  ;;  %v1722_v57 = vadd.f32 %v4233_v36, %v1721_v59  ;;  %vm1455_vm13 = vcmp.eq.f32.partialorder %v1454_v34, 8.507059e+37 }
 0x5b2   : > { %v1462_v33 = vsub.f32 1.0, %v1461_v49  ;;  %vm1466_vm14 = vweird.f32 %v4266_v61  ;;  %v1469_v7 = vand.u32 2147483647, %v4227_v60  ;;  %2033 = vmatpush.msrb.mxu1 %v1989_v35  ;;  %vm1738_vm2 = vweird.f32 %v4270_v3  ;;  %v1987_v49 = vld [vmem:[#allocation2 + $0x90] sm:$0xff] }
 0x5b3   : > { %v1448_v27 = vmul.f32 %v4261_v15, %v1447_v47  ;;  %3045 = vmatmul.msk.f32.gmra.mxu2 %vm292_vm0, %v1702_v52  ;;  %3053 = vmatmul.msk.f32.gmra.mxu3 %vm292_vm0, %v1429_v40  ;;  %v1726_v32 = vsel %vm4309_vm10, %v4233_v36, %v1722_v57  ;;  %v1742_v55 = vand.u32 2147483647, %v4270_v3  ;;  %vm1467_vm3 = vmor %vm1465_vm1, %vm1466_vm14  ;;  %v1472_v60 = vor.u32 1.1754944e-38, %v1471_v0 }
 0x5b4   : > { %v1463_v38 = vmul.f32 %v4266_v61, %v1462_v33  ;;  %v1731_v51 = vsel %vm1728_vm12, %v1730_v29, %v1726_v32  ;;  %vm1470_vm6 = vcmp.eq.f32.partialorder %v1469_v7, 8.507059e+37  ;;  %2034 = vmatpush.msrb.mxu1 %v1988_v54 }
 0x5b5   : > { %v1449_v56 = vadd.f32 %v4261_v15, %v1448_v27  ;;  %v1732_v25 = vmul.f32 %v4155_v41, %v1731_v51  ;;  %vm1743_vm5 = vcmp.eq.f32.partialorder %v1742_v55, 8.507059e+37  ;;  %v1986_v27 = vld [vmem:[#allocation2 + $0x88] sm:$0xff] }
 0x5b6   : > { %v4292_v12 = vpop.eup %3317  ;;  %v1464_v36 = vadd.f32 %v4266_v61, %v1463_v38  ;;  %2035 = vmatpush.msrb.mxu1 %v1987_v49 }
 0x5b7   : > { %v1734_v30 = vmul.f32 %v4292_v12, %v4270_v3  ;;  %v1453_v39 = vsel %vm1452_vm11, %v4261_v15, %v1449_v56  ;;  %vm1739_vm15 = vweird.f32 %v4292_v12  ;;  %v1744_v15 = vand.u32 2147483648, %v4270_v3 }
 0x5b8   : > { %v1458_v31 = vsel %vm1455_vm13, %v1457_v26, %v1453_v39  ;;  %vm1740_vm4 = vmor %vm1738_vm2, %vm1739_vm15  ;;  %v1468_v48 = vsel %vm1467_vm3, %v4266_v61, %v1464_v36  ;;  %2036 = vmatpush.msrb.mxu1 %v1986_v27  ;;  %v1995_v27 = vld [vmem:[#allocation2 + $0x148] sm:$0xff] }
 0x5b9   : > { %v1735_v4 = vsub.f32 1.0, %v1734_v30  ;;  %v1459_v9 = vmul.f32 %v4169_v13, %v1458_v31  ;;  %v1745_v50 = vor.u32 1.1754944e-38, %v1744_v15  ;;  %v1473_v13 = vsel %vm1470_vm6, %v1472_v60, %v1468_v48 }
 0x5ba   : > { %v1474_v40 = vmul.f32 %v4147_v28, %v1473_v13  ;;  %v1985_v28 = vld [vmem:[#allocation2 + $0x80] sm:$0xff] }
 0x5bb   : > { %v1736_v62 = vmul.f32 %v4292_v12, %v1735_v4  ;;  %3046 = vmatmul.msk.f32.gmra.mxu2 %vm292_vm0, %v1717_v2  ;;  %3054 = vmatmul.msk.f32.gmra.mxu3 %vm292_vm0, %v1444_v24 }
 0x5bc   : > { %2037 = vmatpush.msrb.mxu1 %v1985_v28 }
 0x5bd   : > { %v1737_v23 = vadd.f32 %v4292_v12, %v1736_v62 }
 0x5bf   : > { %v1741_v17 = vsel %vm1740_vm4, %v4292_v12, %v1737_v23 }
 0x5c0   : > { %v1746_v41 = vsel %vm1743_vm5, %v1745_v50, %v1741_v17 }
 0x5c1   : > { %v1747_v3 = vmul.f32 %v4173_v14, %v1746_v41  ;;  %v1994_v41 = vld [vmem:[#allocation2 + $0x140] sm:$0xff] }
 0x5c2   : > { %v4356_v13 = vperm.slane %v1994_v41, 0 }
 0x5c3   : > { %3047 = vmatmul.msk.f32.gmra.mxu2 %vm292_vm0, %v1732_v25  ;;  %3055 = vmatmul.msk.f32.gmra.mxu3 %vm292_vm0, %v1459_v9 }
 0x5c4   : > { %v1642_v45 = vpop.xlane.xlu1 %1641 }
 0x5c5   : > { %3319 = vrcp.f32 %v1642_v45  ;;  %v1759_v58 = vand.u32 2147483648, %v1642_v45  ;;  %v1757_v59 = vand.u32 2147483647, %v1642_v45  ;;  %vm1753_vm8 = vweird.f32 %v1642_v45 }
 0x5c7   : > { %v1760_v1 = vor.u32 1.1754944e-38, %v1759_v58  ;;  %vm1758_vm10 = vcmp.eq.f32.partialorder %v1757_v59, 8.507059e+37  ;;  %v3399_v58 = vld [vmem:[%s3956_s30] sm:$0x3] }
 0x5cb   : > { %v3320_v47 = vpop.eup %3319  ;;  %3048 = vmatmul.msk.f32.gmra.mxu2 %vm292_vm0, %v1747_v3  ;;  %3056 = vmatmul.msk.f32.gmra.mxu3 %vm292_vm0, %v1474_v40 }
 0x5cc   : > { %v1749_v52 = vmul.f32 %v3320_v47, %v1642_v45  ;;  %vm1754_vm7 = vweird.f32 %v3320_v47 }
 0x5cd   : > { %vm1755_vm9 = vmor %vm1753_vm8, %vm1754_vm7 }
 0x5ce   : > { %v1750_v61 = vsub.f32 1.0, %v1749_v52 }
 0x5d0   : > { %v1751_v8 = vmul.f32 %v3320_v47, %v1750_v61 }
 0x5d2   : > { %v1752_v14 = vadd.f32 %v3320_v47, %v1751_v8 }
 0x5d3   : > { %v1877_v11 = vpop.f32.mrf.mxu3 }
 0x5d4   : > { %v1756_v18 = vsel %vm1755_vm9, %v3320_v47, %v1752_v14  ;;  %v1996_v47 = vld [vmem:[#allocation2 + $0x150] sm:$0xff] }
 0x5d5   : > { %v1761_v10 = vsel %vm1758_vm10, %v1760_v1, %v1756_v18  ;;  %2065 = vperm.xlu2 %3186, %v1996_v47  }
 0x5d6   : > { %v1762_v12 = vmul.f32 %v4179_v22, %v1761_v10 }
 0x5d8   : > { %3049 = vmatmul.msk.f32.gmra.mxu2 %vm292_vm0, %v1762_v12 }
 0x5dd   : > { %3187 = vset.pattern.permute.xlu2 %v3511_v19 }
 0x5e8   : > { %v1369_v33 = vpop.xlane.xlu0 %1368 }
 0x5e9   : > { %3321 = vrcp.f32 %v1369_v33  ;;  %v1486_v5 = vand.u32 2147483648, %v1369_v33  ;;  %v1484_v4 = vand.u32 2147483647, %v1369_v33  ;;  %vm1480_vm12 = vweird.f32 %v1369_v33 }
 0x5eb   : > { %v1812_v30 = vpop.f32.mrf.mxu2  ;;  %v1487_v24 = vor.u32 1.1754944e-38, %v1486_v5  ;;  %vm1485_vm14 = vcmp.eq.f32.partialorder %v1484_v4, 8.507059e+37  ;;  %v1933_v5 = vld [vmem:[#allocation2 + $0x1d8] sm:$0xff]  ;;  %v1931_v4 = vld [vmem:[#allocation2 + $0x1c8] sm:$0xff] }
 0x5ec   : > { %v1878_v57 = vadd.f32 %v1877_v11, %v1812_v30 }
 0x5ee   : > { %v4344_v56 = vmax.f32 %v1878_v57, 0.0 }
 0x5ef   : > { %v3322_v53 = vpop.eup %3321 }
 0x5f0   : > { %v1476_v21 = vmul.f32 %v3322_v53, %v1369_v33  ;;  %3061 = vmatmul.msk.f32.vlgmr.msrb.gmra.mxu1 %vm292_vm0, %v4344_v56  ;;  %vm1481_vm11 = vweird.f32 %v3322_v53 }
 0x5f1   : > { %vm1482_vm13 = vmor %vm1480_vm12, %vm1481_vm11 }
 0x5f2   : > { %v1477_v2 = vsub.f32 1.0, %v1476_v21  ;;  %v1935_v21 = vld [vmem:[#allocation2 + $0x1e8] sm:$0xff] }
 0x5f4   : > { %v1478_v6 = vmul.f32 %v3322_v53, %v1477_v2  ;;  %v1934_v2 = vld [vmem:[#allocation2 + $0x1e0] sm:$0xff] }
 0x5f6   : > { %v1479_v22 = vadd.f32 %v3322_v53, %v1478_v6  ;;  %v1932_v6 = vld [vmem:[#allocation2 + $0x1d0] sm:$0xff] }
 0x5f8   : > { %v1483_v63 = vsel %vm1482_vm13, %v3322_v53, %v1479_v22  ;;  %v1936_v53 = vld [vmem:[#allocation2 + $0x1f0] sm:$0xff]  ;;  %v1930_v22 = vld [vmem:[#allocation2 + $0x1c0] sm:$0xff] }
 0x5f9   : > { %v1488_v34 = vsel %vm1485_vm14, %v1487_v24, %v1483_v63  ;;  %v1109_v24 = vld [vmem:[#allocation2 + $0x1b8] sm:$0xff]  ;;  %v1108_v63 = vld [vmem:[#allocation2 + $0x1b0] sm:$0xff] }
 0x5fa   : > { %v1489_v37 = vmul.f32 %v4187_v46, %v1488_v34  ;;  %v1107_v34 = vld [vmem:[#allocation2 + $0x1a8] sm:$0xff] }
 0x5fc   : > { %3057 = vmatmul.msk.f32.gmra.mxu3 %vm292_vm0, %v1489_v37  ;;  %v1106_v37 = vld [vmem:[#allocation2 + $0x1a0] sm:$0xff] }
 0x607   : > { %v1815_v38 = vpop.f32.mrf.mxu2 }
 0x614   : > { %v1880_v62 = vpop.f32.mrf.mxu3 }
 0x615   : > { %v1881_v32 = vadd.f32 %v1880_v62, %v1815_v38  ;;  %v1105_v38 = vld [vmem:[#allocation2 + $0x198] sm:$0xff]  ;;  %v1104_v62 = vld [vmem:[#allocation2 + $0x190] sm:$0xff] }
 0x617   : > { %v1902_v39 = vmax.f32 %v1881_v32, 0.0  ;;  %v1103_v32 = vld [vmem:[#allocation2 + $0x188] sm:$0xff] }
 0x619   : > { %3062 = vmatmul.msk.f32.gmra.mxu1 %vm292_vm0, %v1902_v39 }
 0x61c   : > { %v1818_v16 = vpop.f32.mrf.mxu2 }
 0x62e   : > { %v1883_v29 = vpop.f32.mrf.mxu3 }
 0x62f   : > { %v1884_v26 = vadd.f32 %v1883_v29, %v1818_v16 }
 0x631   : > { %v1903_v35 = vmax.f32 %v1884_v26, 0.0 }
 0x633   : > { %3063 = vmatmul.msk.f32.gmra.mxu1 %vm292_vm0, %v1903_v35 }
 0x636   : > { %v1821_v51 = vpop.f32.mrf.mxu2  ;;  %v1886_v31 = vpop.f32.mrf.mxu3 }
 0x637   : > { %v1887_v23 = vadd.f32 %v1886_v31, %v1821_v51 }
 0x639   : > { %v1904_v36 = vmax.f32 %v1887_v23, 0.0  ;;  %v2066_v23 = vpop.permute.xlu2 %2065 }
 0x63b   : > { %3064 = vmatmul.msk.f32.gmra.mxu1 %vm292_vm0, %v1904_v36 }
 0x63e   : > { %v1824_v46 = vpop.f32.mrf.mxu2  ;;  %v1889_v0 = vpop.f32.mrf.mxu3 }
 0x63f   : > { %v1890_v15 = vadd.f32 %v1889_v0, %v1824_v46 }
 0x641   : > { %v1905_v7 = vmax.f32 %v1890_v15, 0.0 }
 0x643   : > { %3065 = vmatmul.msk.f32.gmra.mxu1 %vm292_vm0, %v1905_v7 }
 0x646   : > { %v1827_v25 = vpop.f32.mrf.mxu2  ;;  %v1892_v9 = vpop.f32.mrf.mxu3 }
 0x647   : > { %v1893_v55 = vadd.f32 %v1892_v9, %v1827_v25 }
 0x649   : > { %v1906_v17 = vmax.f32 %v1893_v55, 0.0 }
 0x64b   : > { %3066 = vmatmul.msk.f32.gmra.mxu1 %vm292_vm0, %v1906_v17 }
 0x64e   : > { %v1830_v48 = vpop.f32.mrf.mxu2  ;;  %v1895_v60 = vpop.f32.mrf.mxu3 }
 0x64f   : > { %v1896_v50 = vadd.f32 %v1895_v60, %v1830_v48 }
 0x651   : > { %v1907_v45 = vmax.f32 %v1896_v50, 0.0 }
 0x653   : > { %3067 = vmatmul.msk.f32.gmra.mxu1 %vm292_vm0, %v1907_v45 }
 0x65b   : > { %v1833_v52 = vpop.f32.mrf.mxu2 }
 0x66d   : > { %v2039_v3 = vpop.f32.mrf.mxu1 }
 0x66e   : > { %v4359_v40 = vadd.f32 %v2039_v3, %v4356_v13 }
 0x670   : > { %2373 = vperm.xlu0 %3185, %v4359_v40  }
 0x678   : > { %3188 = vset.pattern.permute.xlu0 %v3512_v20 }
 0x67f   : > { %v1898_v54 = vpop.f32.mrf.mxu3 }
 0x680   : > { %v1899_v61 = vadd.f32 %v1898_v54, %v1833_v52 }
 0x682   : > { %v1908_v49 = vmax.f32 %v1899_v61, 0.0 }
 0x684   : > { %1917 = vmatpush.msrb.mxu0 %v1908_v49  ;;  %3068 = vmatmul.msk.f32.gmra.mxu1 %vm292_vm0, %v1908_v49 }
 0x685   : > { %3069 = vmatpush.xpose.msk.msrb.mxu2 %vm292_vm0, %v1908_v49 }
 0x686   : > { %1918 = vmatpush.msrb.mxu0 %v1907_v45 }
 0x688   : > { %1919 = vmatpush.msrb.mxu0 %v1906_v17 }
 0x689   : > { %3070 = vmatpush.xpose.msk.msrb.mxu2 %vm292_vm0, %v1907_v45  ;;  %v2637_v45 = vmul.f32 %v3639_v42, %v4359_v40 }
 0x68a   : > { %1920 = vmatpush.msrb.mxu0 %v1905_v7 }
 0x68c   : > { %1921 = vmatpush.msrb.mxu0 %v1904_v36 }
 0x68d   : > { %3071 = vmatpush.xpose.msk.msrb.mxu2 %vm292_vm0, %v1906_v17 }
 0x68e   : > { %1922 = vmatpush.msrb.mxu0 %v1903_v35 }
 0x690   : > { %1923 = vmatpush.msrb.mxu0 %v1902_v39 }
 0x691   : > { %3072 = vmatpush.xpose.msk.msrb.mxu2 %vm292_vm0, %v1905_v7 }
 0x692   : > { %1924 = vmatpush.msrb.mxu0 %v4344_v56 }
 0x693   : > { %3058 = vmatmul.msk.f32.vlgmr.msrb.gmra.mxu0 %vm292_vm0, %v3399_v58 }
 0x695   : > { %3073 = vmatpush.xpose.msk.msrb.mxu2 %vm292_vm0, %v1904_v36 }
 0x696   : > { %v2042_v8 = vpop.f32.mrf.mxu1 }
 0x697   : > { %v4374_v59 = vadd.f32 %v2042_v8, %v4356_v13 }
 0x699   : > { %3074 = vmatpush.xpose.msk.msrb.mxu2 %vm292_vm0, %v1903_v35  ;;  %2377 = vperm.xlu2 %3187, %v4374_v59   ;;  %v2365_v7 = vmul.f32 %v3641_v43, %v4374_v59  ;;  %v2638_v60 = vmul.f32 %v3639_v42, %v4374_v59 }
 0x69a   : > { %2098 = vperm.xlu1 %3182, %v4374_v59  }
 0x69d   : > { %3075 = vmatpush.xpose.msk.msrb.mxu2 %vm292_vm0, %v1902_v39  ;;  %v1102_v39 = vld [vmem:[#allocation2 + $0x180] sm:$0xff] }
 0x6a1   : > { %3076 = vmatpush.xpose.msk.msrb.mxu2 %vm292_vm0, %v4344_v56  ;;  %v1937_v56 = vld [vmem:[#allocation2 + $0x1f8] sm:$0xff] }
 0x6a2   : > { %1949 = vmatpush.msra.mxu0 %v1937_v56 }
 0x6a4   : > { %3077 = vmatmul.msk.f32.vlgmr.msrb.gmra.mxu2 %vm292_vm0, %v1995_v27  ;;  %1950 = vmatpush.msra.mxu0 %v1936_v53 }
 0x6a6   : > { %1951 = vmatpush.msra.mxu0 %v1935_v21 }
 0x6a8   : > { %1952 = vmatpush.msra.mxu0 %v1934_v2 }
 0x6aa   : > { %1953 = vmatpush.msra.mxu0 %v1933_v5 }
 0x6ac   : > { %1954 = vmatpush.msra.mxu0 %v1932_v6 }
 0x6ae   : > { %1955 = vmatpush.msra.mxu0 %v1931_v4 }
 0x6b0   : > { %v2045_v14 = vpop.f32.mrf.mxu1  ;;  %1956 = vmatpush.msra.mxu0 %v1930_v22 }
 0x6b1   : > { %v4384_v28 = vadd.f32 %v2045_v14, %v4356_v13 }
 0x6b2   : > { %1972 = vmatpush.msrb.mxu0 %v1109_v24 }
 0x6b3   : > { %2381 = vperm.xlu2 %3187, %v4384_v28   ;;  %2103 = vperm.xlu0 %3188, %v4384_v28   ;;  %v2366_v46 = vmul.f32 %v3641_v43, %v4384_v28 }
 0x6b4   : > { %1973 = vmatpush.msrb.mxu0 %v1108_v63 }
 0x6b6   : > { %1974 = vmatpush.msrb.mxu0 %v1107_v34 }
 0x6b8   : > { %v2048_v1 = vpop.f32.mrf.mxu1  ;;  %1975 = vmatpush.msrb.mxu0 %v1106_v37  ;;  %v3402_v37 = vld [vmem:[%s3681_s23 + $0x18] sm:$0xff] }
 0x6b9   : > { %v4389_v18 = vadd.f32 %v2048_v1, %v4356_v13 }
 0x6ba   : > { %1976 = vmatpush.msrb.mxu0 %v1105_v38 }
 0x6bb   : > { %2385 = vperm.xlu2 %3187, %v4389_v18   ;;  %2108 = vperm.xlu1 %3182, %v4389_v18   ;;  %v2367_v36 = vmul.f32 %v3641_v43, %v4389_v18  ;;  %v2640_v48 = vmul.f32 %v3639_v42, %v4389_v18 }
 0x6bc   : > { %3189 = vset.pattern.permute.xlu0 %v3511_v19  ;;  %1977 = vmatpush.msrb.mxu0 %v1104_v62  ;;  %v3403_v62 = vld [vmem:[%s3681_s23 + $0x10] sm:$0xff] }
 0x6be   : > { %1978 = vmatpush.msrb.mxu0 %v1103_v32 }
 0x6c0   : > { %v2051_v10 = vpop.f32.mrf.mxu1  ;;  %1979 = vmatpush.msrb.mxu0 %v1102_v39 }
 0x6c1   : > { %v4395_v12 = vadd.f32 %v2051_v10, %v4356_v13 }
 0x6c3   : > { %2113 = vperm.xlu1 %3182, %v4395_v12   ;;  %2389 = vperm.xlu0 %3189, %v4395_v12   ;;  %v2368_v31 = vmul.f32 %v3641_v43, %v4395_v12  ;;  %v2641_v17 = vmul.f32 %v3639_v42, %v4395_v12 }
 0x6c4   : > { %3190 = vset.pattern.permute.xlu2 %v3512_v20 }
 0x6c8   : > { %v2054_v33 = vpop.f32.mrf.mxu1 }
 0x6c9   : > { %v4401_v11 = vadd.f32 %v2054_v33, %v4356_v13  ;;  %v3400_v33 = vld [vmem:[%s3681_s23 + $0x8] sm:$0xff] }
 0x6cb   : > { %2118 = vperm.xlu2 %3190, %v4401_v11   ;;  %3191 = vset.pattern.permute.xlu1 %v3511_v19  ;;  %v2369_v51 = vmul.f32 %v3641_v43, %v4401_v11  ;;  %v2642_v9 = vmul.f32 %v3639_v42, %v4401_v11 }
 0x6cc   : > { %2393 = vperm.xlu1 %3191, %v4401_v11  }
 0x6d0   : > { %v2057_v30 = vpop.f32.mrf.mxu1 }
 0x6d1   : > { %v2058_v57 = vadd.f32 %v2057_v30, %v4356_v13 }
 0x6d3   : > { %2123 = vperm.xlu2 %3190, %v2058_v57   ;;  %2397 = vperm.xlu0 %3189, %v2058_v57   ;;  %v2370_v35 = vmul.f32 %v3641_v43, %v2058_v57  ;;  %v2643_v25 = vmul.f32 %v3639_v42, %v2058_v57  ;;  %v4461_v57 = vld [vmem:[%s3681_s23] sm:$0xff] }
 0x6db   : > { %3192 = vset.pattern.permute.xlu0 %v3512_v20 }
 0x6e2   : > { %v2374_v41 = vpop.permute.xlu0 %2373 }
 0x6f3   : > { %v2378_v55 = vpop.permute.xlu2 %2377 }
 0x701   : > { %v2060_v16 = vpop.f32.mrf.mxu1 }
 0x702   : > { %v4409_v29 = vadd.f32 %v2060_v16, %v4356_v13 }
 0x704   : > { %2128 = vperm.xlu0 %3192, %v4409_v29   ;;  %v2371_v26 = vmul.f32 %v3641_v43, %v4409_v29  ;;  %v2644_v15 = vmul.f32 %v3639_v42, %v4409_v29 }
 0x706   : > { %3101 = vmatpush.msra.mxu3 %v2371_v26 }
 0x708   : > { %3102 = vmatpush.msra.mxu3 %v2370_v35 }
 0x70a   : > { %3103 = vmatpush.msra.mxu3 %v2369_v51 }
 0x70c   : > { %3104 = vmatpush.msra.mxu3 %v2368_v31  ;;  %3194 = vset.pattern.permute.xlu0 %v3511_v19  ;;  %v2364_v19 = vmul.f32 %v3641_v43, %v4359_v40  ;;  %v2639_v43 = vmul.f32 %v3639_v42, %v4384_v28  ;;  %v2099_v54 = vpop.permute.xlu1 %2098 }
 0x70d   : > { %v2382_v50 = vpop.permute.xlu2 %2381 }
 0x70e   : > { %3105 = vmatpush.msra.mxu3 %v2367_v36 }
 0x710   : > { %v1926_v0 = vpop.f32.mrf.mxu0  ;;  %3106 = vmatpush.msra.mxu3 %v2366_v46 }
 0x711   : > { %3059 = vmatmul.msk.f32.vlgmr.msra.gmra.mxu0 %vm292_vm0, %v1926_v0 }
 0x712   : > { %2677 = vmatpush.msra.mxu0 %v2644_v15  ;;  %3107 = vmatpush.msra.mxu3 %v2365_v7  ;;  %v3404_v15 = vld [vmem:[%s3681_s23 + $0x28] sm:$0xff] }
 0x714   : > { %2678 = vmatpush.msra.mxu0 %v2643_v25  ;;  %3108 = vmatpush.msra.mxu3 %v2364_v19 }
 0x715   : > { %v2386_v13 = vpop.permute.xlu2 %2385 }
 0x716   : > { %2679 = vmatpush.msra.mxu0 %v2642_v9 }
 0x718   : > { %2680 = vmatpush.msra.mxu0 %v2641_v17 }
 0x719   : > { %3060 = vmatmul.msk.f32.vlgmr.msrb.gmra.mxu0 %vm292_vm0, %v3976_v44 }
 0x71a   : > { %2681 = vmatpush.msra.mxu0 %v2640_v48 }
 0x71c   : > { %2682 = vmatpush.msra.mxu0 %v2639_v43 }
 0x71e   : > { %2683 = vmatpush.msra.mxu0 %v2638_v60 }
 0x720   : > { %2684 = vmatpush.msra.mxu0 %v2637_v45 }
 0x722   : > { %2742 = vmatpush.msrb.mxu0 %v2371_v26 }
 0x724   : > { %2743 = vmatpush.msrb.mxu0 %v2370_v35 }
 0x725   : > { %v2104_v58 = vpop.permute.xlu0 %2103  ;;  %v2119_v14 = vpop.permute.xlu2 %2118 }
 0x726   : > { %2744 = vmatpush.msrb.mxu0 %v2369_v51 }
 0x727   : > { %v2088_v44 = vpop.f32.mrf.mxu2 }
 0x728   : > { %2745 = vmatpush.msrb.mxu0 %v2368_v31  ;;  %v2089_v3 = vadd.f32 %v2088_v44, %v2066_v23 }
 0x72a   : > { %2746 = vmatpush.msrb.mxu0 %v2367_v36  ;;  %v4446_v47 = vperm.slane %v2089_v3, 0  ;;  %v4448_v52 = vperm.slane %v2089_v3, 1 }
 0x72c   : > { %2747 = vmatpush.msrb.mxu0 %v2366_v46  ;;  %v2133_v61 = vadd.f32 %v4446_v47, %v2099_v54  ;;  %v2406_v42 = vadd.f32 %v4448_v52, %v2378_v55  ;;  %v2405_v49 = vadd.f32 %v4448_v52, %v2374_v41  ;;  %v2408_v8 = vadd.f32 %v4448_v52, %v2386_v13 }
 0x72d   : > { %v2134_v27 = vadd.f32 %v4446_v47, %v2104_v58  ;;  %v2137_v4 = vadd.f32 %v4446_v47, %v2119_v14  ;;  %v2407_v63 = vadd.f32 %v4448_v52, %v2382_v50  ;;  %v2109_v34 = vpop.permute.xlu1 %2108  ;;  %v2124_v39 = vpop.permute.xlu2 %2123  ;;  %v3405_v50 = vld [vmem:[%s3681_s23 + $0x30] sm:$0xff]  ;;  %v3406_v58 = vld [vmem:[%s3681_s23 + $0x20] sm:$0xff] }
 0x72e   : > { %2748 = vmatpush.msrb.mxu0 %v2365_v7  ;;  %vm2141_vm15 = vcmp.ge.f32.partialorder %v2133_v61, 0.0  ;;  %v2149_v59 = vmul.f32 0.01, %v2133_v61  ;;  %vm2414_vm1 = vcmp.ge.f32.partialorder %v2406_v42, 0.0  ;;  %v2422_v28 = vmul.f32 0.01, %v2406_v42 }
 0x72f   : > { %vm2413_vm2 = vcmp.ge.f32.partialorder %v2405_v49, 0.0  ;;  %v2421_v1 = vmul.f32 0.01, %v2405_v49  ;;  %vm2416_vm3 = vcmp.ge.f32.partialorder %v2408_v8, 0.0  ;;  %v2424_v53 = vmul.f32 0.01, %v2408_v8 }
 0x730   : > { %2749 = vmatpush.msrb.mxu0 %v2364_v19  ;;  %v2157_v18 = vsel %vm2141_vm15, %v2133_v61, %v2149_v59  ;;  %v2430_v10 = vsel %vm2414_vm1, %v2406_v42, %v2422_v28  ;;  %vm2142_vm4 = vcmp.ge.f32.partialorder %v2134_v27, 0.0  ;;  %v2150_v21 = vmul.f32 0.01, %v2134_v27 }
 0x731   : > { %v2429_v12 = vsel %vm2413_vm2, %v2405_v49, %v2421_v1  ;;  %v4456_v11 = vadd.f32 %v3400_v33, %v2157_v18  ;;  %v4458_v30 = vadd.f32 %v3400_v33, %v2430_v10  ;;  %v2432_v22 = vsel %vm2416_vm3, %v2408_v8, %v2424_v53 }
 0x732   : > { %v4464_v56 = vadd.f32 %v4461_v57, %v2429_v12  ;;  %v2158_v24 = vsel %vm2142_vm4, %v2134_v27, %v2150_v21  ;;  %v4475_v38 = vadd.f32 %v3402_v37, %v2432_v22  ;;  %v2153_v16 = vmul.f32 0.01, %v2137_v4  ;;  %v3407_v22 = vld [vmem:[%s3681_s23 + $0x38] sm:$0xff] }
 0x733   : > { %v2175_v2 = vsel %vm292_vm0, %v4456_v11, -inf  ;;  %v2448_v5 = vsel %vm292_vm0, %v4458_v30, -inf  ;;  %v4478_v32 = vadd.f32 %v3403_v62, %v2158_v24  ;;  %v2423_v26 = vmul.f32 0.01, %v2407_v63 }
 0x734   : > { %v2445_v6 = vsel %vm292_vm0, %v4464_v56, -inf  ;;  %2176 = vmax.xlane.f32.xlu2 %v2175_v2  ;;  %2449 = vmax.xlane.f32.xlu0 %v2448_v5  ;;  %vm2145_vm5 = vcmp.ge.f32.partialorder %v2137_v4, 0.0  ;;  %vm2415_vm6 = vcmp.ge.f32.partialorder %v2407_v63, 0.0  ;;  %v2138_v35 = vadd.f32 %v4446_v47, %v2124_v39 }
 0x735   : > { %2446 = vmax.xlane.f32.xlu1 %v2445_v6  ;;  %v2454_v51 = vsel %vm292_vm0, %v4475_v38, -inf  ;;  %v2178_v31 = vsel %vm292_vm0, %v4478_v32, -inf  ;;  %v2135_v23 = vadd.f32 %v4446_v47, %v2109_v34  ;;  %v2161_v36 = vsel %vm2145_vm5, %v2137_v4, %v2153_v16  ;;  %v2114_v0 = vpop.permute.xlu1 %2113  ;;  %v2390_v44 = vpop.permute.xlu0 %2389 }
 0x736   : > { %v2431_v46 = vsel %vm2415_vm6, %v2407_v63, %v2423_v26  ;;  %v4487_v7 = vadd.f32 %v3404_v15, %v2161_v36  ;;  %v2154_v19 = vmul.f32 0.01, %v2138_v35  ;;  %vm2146_vm7 = vcmp.ge.f32.partialorder %v2138_v35, 0.0 }
 0x737   : > { %v4489_v25 = vadd.f32 %v3403_v62, %v2431_v46  ;;  %v2151_v9 = vmul.f32 0.01, %v2135_v23  ;;  %vm2143_vm8 = vcmp.ge.f32.partialorder %v2135_v23, 0.0  ;;  %v2136_v48 = vadd.f32 %v4446_v47, %v2114_v0 }
 0x738   : > { %v2187_v55 = vsel %vm292_vm0, %v4487_v7, -inf  ;;  %v2162_v43 = vsel %vm2146_vm7, %v2138_v35, %v2154_v19 }
 0x739   : > { %v2451_v17 = vsel %vm292_vm0, %v4489_v25, -inf  ;;  %v2159_v60 = vsel %vm2143_vm8, %v2135_v23, %v2151_v9  ;;  %v4497_v45 = vadd.f32 %v3405_v50, %v2162_v43  ;;  %v2152_v13 = vmul.f32 0.01, %v2136_v48 }
 0x73a   : > { %v4499_v41 = vadd.f32 %v3402_v37, %v2159_v60  ;;  %vm2144_vm9 = vcmp.ge.f32.partialorder %v2136_v48, 0.0 }
 0x73b   : > { %v2190_v54 = vsel %vm292_vm0, %v4497_v45, -inf  ;;  %v2160_v49 = vsel %vm2144_vm9, %v2136_v48, %v2152_v13 }
 0x73c   : > { %2455 = vmax.xlane.f32.xlu0 %v2454_v51  ;;  %2179 = vmax.xlane.f32.xlu2 %v2178_v31  ;;  %v2181_v61 = vsel %vm292_vm0, %v4499_v41, -inf  ;;  %v4508_v8 = vadd.f32 %v3406_v58, %v2160_v49 }
 0x73e   : > { %v2394_v3 = vpop.permute.xlu1 %2393  ;;  %v2184_v14 = vsel %vm292_vm0, %v4508_v8, -inf }
 0x73f   : > { %v2410_v42 = vadd.f32 %v4448_v52, %v2394_v3 }
 0x741   : > { %v2426_v59 = vmul.f32 0.01, %v2410_v42  ;;  %vm2418_vm10 = vcmp.ge.f32.partialorder %v2410_v42, 0.0 }
 0x743   : > { %v2434_v1 = vsel %vm2418_vm10, %v2410_v42, %v2426_v59 }
 0x744   : > { %2188 = vmax.xlane.f32.xlu0 %v2187_v55  ;;  %2452 = vmax.xlane.f32.xlu2 %v2451_v17  ;;  %v4515_v18 = vadd.f32 %v3404_v15, %v2434_v1 }
 0x745   : > { %v2398_v27 = vpop.permute.xlu0 %2397 }
 0x746   : > { %v2411_v28 = vadd.f32 %v4448_v52, %v2398_v27  ;;  %v2460_v10 = vsel %vm292_vm0, %v4515_v18, -inf }
 0x748   : > { %vm2419_vm11 = vcmp.ge.f32.partialorder %v2411_v28, 0.0 }
 0x74c   : > { %2191 = vmax.xlane.f32.xlu0 %v2190_v54  ;;  %2182 = vmax.xlane.f32.xlu2 %v2181_v61 }
 0x74e   : > { %2401 = vperm.xlu1 %3191, %v4409_v29   ;;  %v2427_v29 = vmul.f32 0.01, %v2411_v28 }
 0x750   : > { %v2435_v12 = vsel %vm2419_vm11, %v2411_v28, %v2427_v29 }
 0x751   : > { %v4519_v33 = vadd.f32 %v3405_v50, %v2435_v12 }
 0x753   : > { %v2463_v53 = vsel %vm292_vm0, %v4519_v33, -inf }
 0x754   : > { %2185 = vmax.xlane.f32.xlu2 %v2184_v14 }
 0x756   : > { %3193 = vset.pattern.permute.xlu1 %v3512_v20  ;;  %v2409_v20 = vadd.f32 %v4448_v52, %v2390_v44 }
 0x757   : > { %2093 = vperm.xlu1 %3193, %v4359_v40  }
 0x758   : > { %v2425_v21 = vmul.f32 0.01, %v2409_v20  ;;  %vm2417_vm12 = vcmp.ge.f32.partialorder %v2409_v20, 0.0 }
 0x75a   : > { %v2433_v6 = vsel %vm2417_vm12, %v2409_v20, %v2425_v21 }
 0x75b   : > { %v4528_v63 = vadd.f32 %v3406_v58, %v2433_v6 }
 0x75c   : > { %2461 = vmax.xlane.f32.xlu2 %v2460_v10 }
 0x75d   : > { %v2457_v37 = vsel %vm292_vm0, %v4528_v63, -inf }
 0x764   : > { %2464 = vmax.xlane.f32.xlu2 %v2463_v53 }
 0x776   : > { %v2129_v40 = vpop.permute.xlu0 %2128 }
 0x777   : > { %v2139_v2 = vadd.f32 %v4446_v47, %v2129_v40 }
 0x779   : > { %vm2147_vm13 = vcmp.ge.f32.partialorder %v2139_v2, 0.0  ;;  %v2155_v5 = vmul.f32 0.01, %v2139_v2 }
 0x77b   : > { %v2163_v4 = vsel %vm2147_vm13, %v2139_v2, %v2155_v5 }
 0x77c   : > { %v4526_v24 = vadd.f32 %v3407_v22, %v2163_v4 }
 0x77e   : > { %v2193_v34 = vsel %vm292_vm0, %v4526_v24, -inf }
 0x77f   : > { %2194 = vmax.xlane.f32.xlu0 %v2193_v34 }
 0x781   : > { %2458 = vmax.xlane.f32.xlu1 %v2457_v37 }
 0x7a7   : > { %v2177_v62 = vpop.xlane.xlu2 %2176  ;;  %v2450_v39 = vpop.xlane.xlu0 %2449 }
 0x7a8   : > { %v2197_v16 = vsub.f32 %v4456_v11, %v2177_v62  ;;  %v2447_v26 = vpop.xlane.xlu1 %2446  ;;  %v2470_v31 = vsub.f32 %v4458_v30, %v2450_v39 }
 0x7a9   : > { %v2469_v35 = vsub.f32 %v4464_v56, %v2447_v26 }
 0x7aa   : > { %v2206_v51 = vmul.f32 1.442695, %v2197_v16  ;;  %v2479_v36 = vmul.f32 1.442695, %v2470_v31 }
 0x7ab   : > { %v2477_v23 = vmul.f32 1.442695, %v2469_v35 }
 0x7ac   : > { %3323 = vpow2.f32 %v2206_v51 }
 0x7ad   : > { %3325 = vpow2.f32 %v2477_v23 }
 0x7ae   : > { %3327 = vpow2.f32 %v2479_v36 }
 0x7af   : > { %v2180_v46 = vpop.xlane.xlu2 %2179  ;;  %v2456_v56 = vpop.xlane.xlu0 %2455 }
 0x7b0   : > { %v2472_v17 = vsub.f32 %v4475_v38, %v2456_v56  ;;  %v2198_v50 = vsub.f32 %v4478_v32, %v2180_v46 }
 0x7b2   : > { %v4537_v0 = vpop.eup %3323  ;;  %v2483_v60 = vmul.f32 1.442695, %v2472_v17  ;;  %v2208_v38 = vmul.f32 1.442695, %v2198_v50 }
 0x7b3   : > { %v4539_v15 = vpop.eup %3325  ;;  %v2223_v19 = vsel %vm292_vm0, %v4537_v0, 0.0 }
 0x7b4   : > { %v2493_v11 = vsel %vm292_vm0, %v4539_v15, 0.0  ;;  %2224 = vadd.xlane.f32.xlu0 %v2223_v19  ;;  %v4545_v9 = vpop.eup %3327 }
 0x7b5   : > { %2494 = vadd.xlane.f32.xlu2 %v2493_v11  ;;  %v2496_v43 = vsel %vm292_vm0, %v4545_v9, 0.0 }
 0x7b7   : > { %v2453_v30 = vpop.xlane.xlu2 %2452  ;;  %v2189_v13 = vpop.xlane.xlu0 %2188 }
 0x7b8   : > { %v2471_v55 = vsub.f32 %v4489_v25, %v2453_v30  ;;  %v2201_v25 = vsub.f32 %v4487_v7, %v2189_v13 }
 0x7ba   : > { %v2481_v48 = vmul.f32 1.442695, %v2471_v55  ;;  %v2214_v59 = vmul.f32 1.442695, %v2201_v25 }
 0x7bc   : > { %3329 = vpow2.f32 %v2481_v48  ;;  %2497 = vadd.xlane.f32.xlu0 %v2496_v43 }
 0x7bd   : > { %3331 = vpow2.f32 %v2483_v60 }
 0x7be   : > { %3333 = vpow2.f32 %v2208_v38 }
 0x7bf   : > { %v2183_v44 = vpop.xlane.xlu2 %2182  ;;  %3335 = vpow2.f32 %v2214_v59  ;;  %v2192_v31 = vpop.xlane.xlu0 %2191 }
 0x7c0   : > { %v2402_v3 = vpop.permute.xlu1 %2401  ;;  %v2199_v27 = vsub.f32 %v4499_v41, %v2183_v44  ;;  %v2202_v56 = vsub.f32 %v4497_v45, %v2192_v31 }
 0x7c1   : > { %v2412_v54 = vadd.f32 %v4448_v52, %v2402_v3 }
 0x7c2   : > { %v4553_v61 = vpop.eup %3329  ;;  %v2210_v10 = vmul.f32 1.442695, %v2199_v27  ;;  %v2216_v55 = vmul.f32 1.442695, %v2202_v56 }
 0x7c3   : > { %vm2420_vm14 = vcmp.ge.f32.partialorder %v2412_v54, 0.0  ;;  %v2428_v42 = vmul.f32 0.01, %v2412_v54  ;;  %v2499_v49 = vsel %vm292_vm0, %v4553_v61, 0.0  ;;  %v4561_v14 = vpop.eup %3331 }
 0x7c4   : > { %2500 = vadd.xlane.f32.xlu0 %v2499_v49  ;;  %v2502_v12 = vsel %vm292_vm0, %v4561_v14, 0.0  ;;  %v4569_v20 = vpop.eup %3333  ;;  %3337 = vpow2.f32 %v2210_v10 }
 0x7c5   : > { %v2436_v58 = vsel %vm2420_vm14, %v2412_v54, %v2428_v42  ;;  %v4574_v2 = vpop.eup %3335  ;;  %v2226_v5 = vsel %vm292_vm0, %v4569_v20, 0.0 }
 0x7c6   : > { %v4558_v32 = vadd.f32 %v3407_v22, %v2436_v58  ;;  %v2235_v4 = vsel %vm292_vm0, %v4574_v2, 0.0 }
 0x7c7   : > { %v2186_v52 = vpop.xlane.xlu2 %2185 }
 0x7c8   : > { %v2200_v28 = vsub.f32 %v4508_v8, %v2186_v52  ;;  %v2466_v7 = vsel %vm292_vm0, %v4558_v32, -inf }
 0x7c9   : > { %v2094_v1 = vpop.permute.xlu1 %2093  ;;  %2467 = vmax.xlane.f32.xlu2 %v2466_v7 }
 0x7ca   : > { %v2132_v29 = vadd.f32 %v4446_v47, %v2094_v1  ;;  %v2212_v53 = vmul.f32 1.442695, %v2200_v28 }
 0x7cc   : > { %vm2140_vm15 = vcmp.ge.f32.partialorder %v2132_v29, 0.0  ;;  %v2148_v41 = vmul.f32 0.01, %v2132_v29  ;;  %2503 = vadd.xlane.f32.xlu0 %v2502_v12  ;;  %3339 = vpow2.f32 %v2212_v53 }
 0x7ce   : > { %v2156_v21 = vsel %vm2140_vm15, %v2132_v29, %v2148_v41 }
 0x7cf   : > { %v2462_v8 = vpop.xlane.xlu2 %2461  ;;  %v4572_v40 = vadd.f32 %v4461_v57, %v2156_v21  ;;  %v4583_v57 = vpop.eup %3337 }
 0x7d0   : > { %v2474_v47 = vsub.f32 %v4515_v18, %v2462_v8  ;;  %v2229_v62 = vsel %vm292_vm0, %v4583_v57, 0.0 }
 0x7d1   : > { %2227 = vadd.xlane.f32.xlu2 %v2226_v5  ;;  %v2172_v6 = vsel %vm292_vm0, %v4572_v40, -inf }
 0x7d2   : > { %2173 = vmax.xlane.f32.xlu1 %v2172_v6  ;;  %v2487_v22 = vmul.f32 1.442695, %v2474_v47  ;;  %v4585_v34 = vpop.eup %3339 }
 0x7d3   : > { %v2232_v39 = vsel %vm292_vm0, %v4585_v34, 0.0 }
 0x7d4   : > { %2236 = vadd.xlane.f32.xlu0 %v2235_v4  ;;  %3341 = vpow2.f32 %v2487_v22 }
 0x7d7   : > { %v2465_v37 = vpop.xlane.xlu2 %2464 }
 0x7d8   : > { %v2475_v18 = vsub.f32 %v4519_v33, %v2465_v37 }
 0x7d9   : > { %2230 = vadd.xlane.f32.xlu2 %v2229_v62 }
 0x7da   : > { %v2489_v16 = vmul.f32 1.442695, %v2475_v18  ;;  %2233 = vadd.xlane.f32.xlu1 %v2232_v39  ;;  %v4592_v26 = vpop.eup %3341 }
 0x7db   : > { %v2508_v35 = vsel %vm292_vm0, %v4592_v26, 0.0 }
 0x7dc   : > { %3343 = vpow2.f32 %v2489_v16 }
 0x7e2   : > { %v4596_v51 = vpop.eup %3343  ;;  %2509 = vadd.xlane.f32.xlu1 %v2508_v35 }
 0x7e3   : > { %v2511_v33 = vsel %vm292_vm0, %v4596_v51, 0.0 }
 0x7e4   : > { %2512 = vadd.xlane.f32.xlu0 %v2511_v33 }
 0x7f2   : > { %v2195_v23 = vpop.xlane.xlu0 %2194 }
 0x7f3   : > { %v2203_v36 = vsub.f32 %v4526_v24, %v2195_v23 }
 0x7f4   : > { %v2459_v46 = vpop.xlane.xlu1 %2458 }
 0x7f5   : > { %v2218_v19 = vmul.f32 1.442695, %v2203_v36  ;;  %v2473_v11 = vsub.f32 %v4528_v63, %v2459_v46 }
 0x7f7   : > { %3345 = vpow2.f32 %v2218_v19  ;;  %v2485_v30 = vmul.f32 1.442695, %v2473_v11 }
 0x7f9   : > { %3347 = vpow2.f32 %v2485_v30 }
 0x7fa   : > { %3349 = vpow2.f32 %v2216_v55 }
 0x7fd   : > { %v4603_v17 = vpop.eup %3345 }
 0x7fe   : > { %v2241_v48 = vsel %vm292_vm0, %v4603_v17, 0.0 }
 0x7ff   : > { %2242 = vadd.xlane.f32.xlu1 %v2241_v48  ;;  %v4607_v43 = vpop.eup %3347 }
 0x800   : > { %v2505_v24 = vsel %vm292_vm0, %v4607_v43, 0.0  ;;  %v4611_v63 = vpop.eup %3349 }
 0x801   : > { %2506 = vadd.xlane.f32.xlu2 %v2505_v24  ;;  %v2238_v45 = vsel %vm292_vm0, %v4611_v63, 0.0 }
 0x809   : > { %2239 = vadd.xlane.f32.xlu2 %v2238_v45 }
 0x827   : > { %v2225_v60 = vpop.xlane.xlu0 %2224 }
 0x828   : > { %v2495_v50 = vpop.xlane.xlu2 %2494  ;;  %3351 = vrcp.f32 %v2225_v60  ;;  %v2270_v49 = vand.u32 2147483648, %v2225_v60  ;;  %v2268_v27 = vand.u32 2147483647, %v2225_v60  ;;  %vm2264_vm3 = vweird.f32 %v2225_v60 }
 0x829   : > { %3353 = vrcp.f32 %v2495_v50  ;;  %v2528_v58 = vand.u32 2147483648, %v2495_v50  ;;  %v2526_v28 = vand.u32 2147483647, %v2495_v50  ;;  %vm2522_vm4 = vweird.f32 %v2495_v50 }
 0x82a   : > { %v2271_v10 = vor.u32 1.1754944e-38, %v2270_v49  ;;  %vm2269_vm7 = vcmp.eq.f32.partialorder %v2268_v27, 8.507059e+37 }
 0x82b   : > { %v2529_v12 = vor.u32 1.1754944e-38, %v2528_v58  ;;  %vm2527_vm8 = vcmp.eq.f32.partialorder %v2526_v28, 8.507059e+37 }
 0x82e   : > { %v3352_v13 = vpop.eup %3351 }
 0x82f   : > { %v3354_v44 = vpop.eup %3353  ;;  %v2260_v3 = vmul.f32 %v3352_v13, %v2225_v60  ;;  %v2498_v54 = vpop.xlane.xlu0 %2497  ;;  %vm2265_vm1 = vweird.f32 %v3352_v13 }
 0x830   : > { %v2518_v25 = vmul.f32 %v3354_v44, %v2495_v50  ;;  %3355 = vrcp.f32 %v2498_v54  ;;  %vm2523_vm2 = vweird.f32 %v3354_v44  ;;  %vm2266_vm5 = vmor %vm2264_vm3, %vm2265_vm1  ;;  %v2543_v22 = vand.u32 2147483648, %v2498_v54 }
 0x831   : > { %v2261_v38 = vsub.f32 1.0, %v2260_v3  ;;  %vm2524_vm6 = vmor %vm2522_vm4, %vm2523_vm2  ;;  %v2541_v62 = vand.u32 2147483647, %v2498_v54  ;;  %vm2537_vm10 = vweird.f32 %v2498_v54 }
 0x832   : > { %v2519_v42 = vsub.f32 1.0, %v2518_v25  ;;  %v2544_v31 = vor.u32 1.1754944e-38, %v2543_v22 }
 0x833   : > { %v2262_v59 = vmul.f32 %v3352_v13, %v2261_v38  ;;  %vm2542_vm12 = vcmp.eq.f32.partialorder %v2541_v62, 8.507059e+37 }
 0x834   : > { %v2520_v52 = vmul.f32 %v3354_v44, %v2519_v42 }
 0x835   : > { %v2263_v7 = vadd.f32 %v3352_v13, %v2262_v59 }
 0x836   : > { %v3356_v1 = vpop.eup %3355  ;;  %v2521_v29 = vadd.f32 %v3354_v44, %v2520_v52 }
 0x837   : > { %v2267_v53 = vsel %vm2266_vm5, %v3352_v13, %v2263_v7  ;;  %v2533_v41 = vmul.f32 %v3356_v1, %v2498_v54  ;;  %v2501_v21 = vpop.xlane.xlu0 %2500  ;;  %vm2538_vm9 = vweird.f32 %v3356_v1 }
 0x838   : > { %v2525_v8 = vsel %vm2524_vm6, %v3354_v44, %v2521_v29  ;;  %v2272_v47 = vsel %vm2269_vm7, %v2271_v10, %v2267_v53  ;;  %3357 = vrcp.f32 %v2501_v21  ;;  %vm2539_vm11 = vmor %vm2537_vm10, %vm2538_vm9  ;;  %v2558_v30 = vand.u32 2147483648, %v2501_v21 }
 0x839   : > { %v2530_v5 = vsel %vm2527_vm8, %v2529_v12, %v2525_v8  ;;  %v2534_v6 = vsub.f32 1.0, %v2533_v41  ;;  %v2273_v4 = vmul.f32 %v4537_v0, %v2272_v47  ;;  %vm2552_vm14 = vweird.f32 %v2501_v21 }
 0x83a   : > { %v2531_v37 = vmul.f32 %v4539_v15, %v2530_v5  ;;  %v2559_v13 = vor.u32 1.1754944e-38, %v2558_v30 }
 0x83b   : > { %v2535_v18 = vmul.f32 %v3356_v1, %v2534_v6  ;;  %3087 = vmatmul.msk.f32.vlgmr.msra.gmra.mxu3 %vm292_vm0, %v2273_v4 }
 0x83c   : > { %v2468_v39 = vpop.xlane.xlu2 %2467  ;;  %3078 = vmatmul.msk.f32.vlgmr.msra.gmra.mxu0 %vm292_vm0, %v2531_v37 }
 0x83d   : > { %v2476_v16 = vsub.f32 %v4558_v32, %v2468_v39  ;;  %v2536_v35 = vadd.f32 %v3356_v1, %v2535_v18  ;;  %v2556_v32 = vand.u32 2147483647, %v2501_v21 }
 0x83e   : > { %v3358_v33 = vpop.eup %3357 }
 0x83f   : > { %v2548_v23 = vmul.f32 %v3358_v33, %v2501_v21  ;;  %v2491_v0 = vmul.f32 1.442695, %v2476_v16  ;;  %v2504_v36 = vpop.xlane.xlu0 %2503  ;;  %v2540_v46 = vsel %vm2539_vm11, %v3356_v1, %v2536_v35  ;;  %vm2553_vm13 = vweird.f32 %v3358_v33 }
 0x840   : > { %3359 = vrcp.f32 %v2504_v36  ;;  %v2545_v15 = vsel %vm2542_vm12, %v2544_v31, %v2540_v46  ;;  %vm2554_vm15 = vmor %vm2552_vm14, %vm2553_vm13  ;;  %vm2557_vm1 = vcmp.eq.f32.partialorder %v2556_v32, 8.507059e+37  ;;  %v2573_v42 = vand.u32 2147483648, %v2504_v36 }
 0x841   : > { %v2549_v19 = vsub.f32 1.0, %v2548_v23  ;;  %3361 = vpow2.f32 %v2491_v0  ;;  %v2546_v11 = vmul.f32 %v4545_v9, %v2545_v15  ;;  %v2571_v59 = vand.u32 2147483647, %v2504_v36 }
 0x842   : > { %vm2567_vm3 = vweird.f32 %v2504_v36  ;;  %v2574_v29 = vor.u32 1.1754944e-38, %v2573_v42 }
 0x843   : > { %v2550_v56 = vmul.f32 %v3358_v33, %v2549_v19  ;;  %vm2572_vm5 = vcmp.eq.f32.partialorder %v2571_v59, 8.507059e+37 }
 0x844   : > { %v2228_v55 = vpop.xlane.xlu2 %2227  ;;  %3079 = vmatmul.msk.f32.gmra.mxu0 %vm292_vm0, %v2546_v11 }
 0x845   : > { %3363 = vrcp.f32 %v2228_v55  ;;  %v2174_v48 = vpop.xlane.xlu1 %2173  ;;  %v2551_v24 = vadd.f32 %v3358_v33, %v2550_v56  ;;  %v2285_v12 = vand.u32 2147483648, %v2228_v55  ;;  %v2283_v53 = vand.u32 2147483647, %v2228_v55 }
 0x846   : > { %v3360_v45 = vpop.eup %3359  ;;  %v2196_v60 = vsub.f32 %v4572_v40, %v2174_v48  ;;  %vm2279_vm7 = vweird.f32 %v2228_v55 }
 0x847   : > { %v4623_v50 = vpop.eup %3361  ;;  %v2563_v44 = vmul.f32 %v3360_v45, %v2504_v36  ;;  %v2555_v9 = vsel %vm2554_vm15, %v3358_v33, %v2551_v24  ;;  %vm2568_vm2 = vweird.f32 %v3360_v45  ;;  %v4629_v28 = vpop.xlane.xlu0 %2236  ;;  %v2286_v22 = vor.u32 1.1754944e-38, %v2285_v12 }
 0x848   : > { %v2204_v3 = vmul.f32 1.442695, %v2196_v60  ;;  %v2514_v25 = vsel %vm292_vm0, %v4623_v50, 0.0  ;;  %v2560_v38 = vsel %vm2557_vm1, %v2559_v13, %v2555_v9  ;;  %vm2569_vm4 = vmor %vm2567_vm3, %vm2568_vm2  ;;  %vm2284_vm9 = vcmp.eq.f32.partialorder %v2283_v53, 8.507059e+37 }
 0x849   : > { %v2564_v54 = vsub.f32 1.0, %v2563_v44  ;;  %2515 = vadd.xlane.f32.xlu2 %v2514_v25  ;;  %v2561_v49 = vmul.f32 %v4553_v61, %v2560_v38 }
 0x84a   : > { %3365 = vpow2.f32 %v2204_v3  ;;  %v2330_v3 = vand.u32 2147483648, %v4629_v28 }
 0x84b   : > { %v3364_v58 = vpop.eup %3363  ;;  %v2565_v40 = vmul.f32 %v3360_v45, %v2564_v54 }
 0x84c   : > { %v2275_v27 = vmul.f32 %v3364_v58, %v2228_v55  ;;  %v2231_v52 = vpop.xlane.xlu2 %2230  ;;  %3080 = vmatmul.msk.f32.gmra.mxu0 %vm292_vm0, %v2561_v49  ;;  %vm2280_vm6 = vweird.f32 %v3364_v58  ;;  %v2331_v38 = vor.u32 1.1754944e-38, %v2330_v3 }
 0x84d   : > { %3367 = vrcp.f32 %v2231_v52  ;;  %v2234_v7 = vpop.xlane.xlu1 %2233  ;;  %v2566_v1 = vadd.f32 %v3360_v45, %v2565_v40  ;;  %vm2281_vm8 = vmor %vm2279_vm7, %vm2280_vm6  ;;  %v2300_v31 = vand.u32 2147483648, %v2231_v52  ;;  %v2298_v36 = vand.u32 2147483647, %v2231_v52 }
 0x84e   : > { %v2276_v10 = vsub.f32 1.0, %v2275_v27  ;;  %3369 = vrcp.f32 %v2234_v7  ;;  %vm2294_vm11 = vweird.f32 %v2231_v52  ;;  %v2315_v48 = vand.u32 2147483648, %v2234_v7 }
 0x84f   : > { %v2570_v61 = vsel %vm2569_vm4, %v3360_v45, %v2566_v1  ;;  %3371 = vrcp.f32 %v4629_v28  ;;  %v2301_v11 = vor.u32 1.1754944e-38, %v2300_v31  ;;  %vm2299_vm13 = vcmp.eq.f32.partialorder %v2298_v36, 8.507059e+37 }
 0x850   : > { %v4631_v41 = vpop.eup %3365  ;;  %v2277_v21 = vmul.f32 %v3364_v58, %v2276_v10  ;;  %v2575_v8 = vsel %vm2572_vm5, %v2574_v29, %v2570_v61  ;;  %vm2309_vm15 = vweird.f32 %v2234_v7  ;;  %v2313_v24 = vand.u32 2147483647, %v2234_v7 }
 0x851   : > { %v2220_v47 = vsel %vm292_vm0, %v4631_v41, 0.0  ;;  %v2576_v5 = vmul.f32 %v4561_v14, %v2575_v8  ;;  %v2316_v13 = vor.u32 1.1754944e-38, %v2315_v48  ;;  %vm2324_vm4 = vweird.f32 %v4629_v28 }
 0x852   : > { %2221 = vadd.xlane.f32.xlu0 %v2220_v47  ;;  %v2278_v6 = vadd.f32 %v3364_v58, %v2277_v21  ;;  %vm2314_vm2 = vcmp.eq.f32.partialorder %v2313_v24, 8.507059e+37 }
 0x853   : > { %v3368_v4 = vpop.eup %3367 }
 0x854   : > { %v3370_v37 = vpop.eup %3369  ;;  %v2290_v18 = vmul.f32 %v3368_v4, %v2231_v52  ;;  %3081 = vmatmul.msk.f32.gmra.mxu0 %vm292_vm0, %v2576_v5  ;;  %v2282_v62 = vsel %vm2281_vm8, %v3364_v58, %v2278_v6  ;;  %vm2295_vm10 = vweird.f32 %v3368_v4 }
 0x855   : > { %v2305_v39 = vmul.f32 %v3370_v37, %v2234_v7  ;;  %v2287_v16 = vsel %vm2284_vm9, %v2286_v22, %v2282_v62  ;;  %v3372_v35 = vpop.eup %3371  ;;  %vm2296_vm12 = vmor %vm2294_vm11, %vm2295_vm10  ;;  %vm2310_vm14 = vweird.f32 %v3370_v37  ;;  %v2510_v42 = vpop.xlane.xlu1 %2509 }
 0x856   : > { %v2291_v33 = vsub.f32 1.0, %v2290_v18  ;;  %v2288_v14 = vmul.f32 %v4569_v20, %v2287_v16  ;;  %v2320_v46 = vmul.f32 %v3372_v35, %v4629_v28  ;;  %vm2311_vm1 = vmor %vm2309_vm15, %vm2310_vm14  ;;  %vm2325_vm3 = vweird.f32 %v3372_v35 }
 0x857   : > { %v2306_v23 = vsub.f32 1.0, %v2305_v39  ;;  %vm2326_vm5 = vmor %vm2324_vm4, %vm2325_vm3  ;;  %3373 = vrcp.f32 %v2510_v42  ;;  %v4650_v40 = vpop.xlane.xlu0 %2512 }
 0x858   : > { %v2292_v0 = vmul.f32 %v3368_v4, %v2291_v33  ;;  %3088 = vmatmul.msk.f32.gmra.mxu3 %vm292_vm0, %v2288_v14  ;;  %v2321_v30 = vsub.f32 1.0, %v2320_v46  ;;  %vm2612_vm15 = vweird.f32 %v4650_v40 }
 0x859   : > { %v2307_v15 = vmul.f32 %v3370_v37, %v2306_v23 }
 0x85a   : > { %v2293_v19 = vadd.f32 %v3368_v4, %v2292_v0  ;;  %v2322_v45 = vmul.f32 %v3372_v35, %v2321_v30  ;;  %v2601_v0 = vand.u32 2147483647, %v2510_v42 }
 0x85b   : > { %v2308_v32 = vadd.f32 %v3370_v37, %v2307_v15 }
 0x85c   : > { %v2297_v56 = vsel %vm2296_vm12, %v3368_v4, %v2293_v19  ;;  %v2323_v9 = vadd.f32 %v3372_v35, %v2322_v45  ;;  %vm2597_vm12 = vweird.f32 %v2510_v42  ;;  %v2618_v45 = vand.u32 2147483648, %v4650_v40 }
 0x85d   : > { %v2302_v55 = vsel %vm2299_vm13, %v2301_v11, %v2297_v56  ;;  %v2312_v60 = vsel %vm2311_vm1, %v3370_v37, %v2308_v32  ;;  %v3374_v59 = vpop.eup %3373 }
 0x85e   : > { %v2303_v20 = vmul.f32 %v4583_v57, %v2302_v55  ;;  %v2317_v44 = vsel %vm2314_vm2, %v2316_v13, %v2312_v60  ;;  %v2328_v57 = vand.u32 2147483647, %v4629_v28  ;;  %v2327_v25 = vsel %vm2326_vm5, %v3372_v35, %v2323_v9 }
 0x85f   : > { %v2318_v54 = vmul.f32 %v4585_v34, %v2317_v44  ;;  %v2593_v52 = vmul.f32 %v3374_v59, %v2510_v42  ;;  %vm2598_vm10 = vweird.f32 %v3374_v59  ;;  %v2603_v35 = vand.u32 2147483648, %v2510_v42 }
 0x860   : > { %3089 = vmatmul.msk.f32.gmra.mxu3 %vm292_vm0, %v2303_v20  ;;  %vm2329_vm6 = vcmp.eq.f32.partialorder %v2328_v57, 8.507059e+37  ;;  %vm4665_vm13 = vmor %vm2597_vm12, %vm2598_vm10  ;;  %vm2602_vm2 = vcmp.eq.f32.partialorder %v2601_v0, 8.507059e+37  ;;  %v2616_v44 = vand.u32 2147483647, %v4650_v40 }
 0x861   : > { %v2332_v49 = vsel %vm2329_vm6, %v2331_v38, %v2327_v25  ;;  %v2594_v7 = vsub.f32 1.0, %v2593_v52  ;;  %v2604_v30 = vor.u32 1.1754944e-38, %v2603_v35  ;;  %v2619_v38 = vor.u32 1.1754944e-38, %v2618_v45 }
 0x862   : > { %v2333_v58 = vmul.f32 %v4574_v2, %v2332_v49  ;;  %vm2617_vm10 = vcmp.eq.f32.partialorder %v2616_v44, 8.507059e+37 }
 0x863   : > { %v2595_v61 = vmul.f32 %v3374_v59, %v2594_v7 }
 0x865   : > { %v2596_v18 = vadd.f32 %v3374_v59, %v2595_v61 }
 0x867   : > { %v2600_v15 = vsel %vm4665_vm13, %v3374_v59, %v2596_v18  ;;  %v4700_v18 = vpop.f32.mrf.mxu0 }
 0x868   : > { %3090 = vmatmul.msk.f32.gmra.mxu3 %vm292_vm0, %v2318_v54  ;;  %v2605_v32 = vsel %vm2602_vm2, %v2604_v30, %v2600_v15 }
 0x869   : > { %v2606_v9 = vmul.f32 %v4592_v26, %v2605_v32 }
 0x870   : > { %3091 = vmatmul.msk.f32.gmra.mxu3 %vm292_vm0, %v2333_v58 }
 0x872   : > { %v4652_v34 = vpop.xlane.xlu1 %2242 }
 0x873   : > { %v2360_v60 = vand.u32 2147483648, %v4652_v34  ;;  %v2358_v54 = vand.u32 2147483647, %v4652_v34 }
 0x874   : > { %v2507_v27 = vpop.xlane.xlu2 %2506 }
 0x875   : > { %3375 = vrcp.f32 %v2507_v27  ;;  %v2588_v21 = vand.u32 2147483648, %v2507_v27  ;;  %v2586_v5 = vand.u32 2147483647, %v2507_v27  ;;  %vm2582_vm8 = vweird.f32 %v2507_v27 }
 0x876   : > { %3377 = vrcp.f32 %v4650_v40  ;;  %v2361_v42 = vor.u32 1.1754944e-38, %v2360_v60 }
 0x877   : > { %3379 = vrcp.f32 %v4652_v34  ;;  %v2589_v37 = vor.u32 1.1754944e-38, %v2588_v21  ;;  %vm2587_vm11 = vcmp.eq.f32.partialorder %v2586_v5, 8.507059e+37 }
 0x87b   : > { %v3376_v28 = vpop.eup %3375 }
 0x87c   : > { %v4656_v1 = vpop.eup %3377  ;;  %v2578_v29 = vmul.f32 %v3376_v28, %v2507_v27  ;;  %v2240_v2 = vpop.xlane.xlu2 %2239  ;;  %vm2583_vm7 = vweird.f32 %v3376_v28 }
 0x87d   : > { %v4658_v10 = vpop.eup %3379  ;;  %3381 = vrcp.f32 %v2240_v2  ;;  %v2608_v53 = vmul.f32 %v4656_v1, %v4650_v40  ;;  %vm2584_vm9 = vmor %vm2582_vm8, %vm2583_vm7  ;;  %v2345_v46 = vand.u32 2147483648, %v2240_v2  ;;  %v2343_v56 = vand.u32 2147483647, %v2240_v2 }
 0x87e   : > { %v2579_v12 = vsub.f32 1.0, %v2578_v29  ;;  %v2350_v47 = vmul.f32 %v4658_v10, %v4652_v34  ;;  %vm2339_vm1 = vweird.f32 %v2240_v2  ;;  %vm2613_vm4 = vweird.f32 %v4656_v1 }
 0x87f   : > { %v2609_v22 = vsub.f32 1.0, %v2608_v53  ;;  %v2346_v55 = vor.u32 1.1754944e-38, %v2345_v46  ;;  %vm2344_vm5 = vcmp.eq.f32.partialorder %v2343_v56, 8.507059e+37  ;;  %vm2355_vm6 = vweird.f32 %v4658_v10  ;;  %vm2614_vm8 = vmor %vm2612_vm15, %vm2613_vm4 }
 0x880   : > { %v2580_v8 = vmul.f32 %v3376_v28, %v2579_v12  ;;  %v2351_v62 = vsub.f32 1.0, %v2350_v47  ;;  %vm2354_vm7 = vweird.f32 %v4652_v34 }
 0x881   : > { %v2610_v36 = vmul.f32 %v4656_v1, %v2609_v22 }
 0x882   : > { %v2581_v6 = vadd.f32 %v3376_v28, %v2580_v8  ;;  %v2352_v19 = vmul.f32 %v4658_v10, %v2351_v62 }
 0x883   : > { %v3382_v4 = vpop.eup %3381  ;;  %v2611_v48 = vadd.f32 %v4656_v1, %v2610_v36 }
 0x884   : > { %v2335_v39 = vmul.f32 %v3382_v4, %v2240_v2  ;;  %v2585_v16 = vsel %vm2584_vm9, %v3376_v28, %v2581_v6  ;;  %vm2340_vm14 = vweird.f32 %v3382_v4  ;;  %v2353_v24 = vadd.f32 %v4658_v10, %v2352_v19  ;;  %vm2356_vm9 = vmor %vm2354_vm7, %vm2355_vm6 }
 0x885   : > { %v2590_v33 = vsel %vm2587_vm11, %v2589_v37, %v2585_v16  ;;  %vm2341_vm3 = vmor %vm2339_vm1, %vm2340_vm14  ;;  %v2615_v57 = vsel %vm2614_vm8, %v4656_v1, %v2611_v48  ;;  %vm2359_vm11 = vcmp.eq.f32.partialorder %v2358_v54, 8.507059e+37 }
 0x886   : > { %v2336_v31 = vsub.f32 1.0, %v2335_v39  ;;  %v2591_v23 = vmul.f32 %v4607_v43, %v2590_v33  ;;  %v2357_v25 = vsel %vm2356_vm9, %v4658_v10, %v2353_v24  ;;  %v2620_v26 = vsel %vm2617_vm10, %v2619_v38, %v2615_v57  ;;  %v2811_v38 = vld [vmem:[#allocation2 + $0x238] sm:$0xff] }
 0x887   : > { %v2621_v49 = vmul.f32 %v4596_v51, %v2620_v26  ;;  %v2810_v26 = vld [vmem:[#allocation2 + $0x230] sm:$0xff] }
 0x888   : > { %v2337_v11 = vmul.f32 %v3382_v4, %v2336_v31  ;;  %3082 = vmatmul.msk.f32.gmra.mxu0 %vm292_vm0, %v2591_v23 }
 0x88a   : > { %v2338_v43 = vadd.f32 %v3382_v4, %v2337_v11 }
 0x88c   : > { %v2342_v20 = vsel %vm2341_vm3, %v3382_v4, %v2338_v43 }
 0x88d   : > { %v2347_v13 = vsel %vm2344_vm5, %v2346_v55, %v2342_v20  ;;  %vm2840_vm5 = vcmask 74752  }
 0x88e   : > { %v2348_v3 = vmul.f32 %v4611_v63, %v2347_v13  ;;  %v2362_v63 = vsel %vm2359_vm11, %v2361_v42, %v2357_v25  ;;  %v3408_v42 = vld [vmem:[%s3956_s30] sm:$0x3] }
 0x88f   : > { %v2363_v58 = vmul.f32 %v4603_v17, %v2362_v63  ;;  %v2809_v63 = vld [vmem:[#allocation2 + $0x228] sm:$0xff] }
 0x890   : > { %3083 = vmatmul.msk.f32.gmra.mxu0 %vm292_vm0, %v2606_v9  ;;  %3092 = vmatmul.msk.f32.gmra.mxu3 %vm292_vm0, %v2348_v3 }
 0x898   : > { %3084 = vmatmul.msk.f32.gmra.mxu0 %vm292_vm0, %v2621_v49  ;;  %3093 = vmatmul.msk.f32.gmra.mxu3 %vm292_vm0, %v2363_v58  ;;  %v2808_v49 = vld [vmem:[#allocation2 + $0x220] sm:$0xff]  ;;  %v2807_v58 = vld [vmem:[#allocation2 + $0x218] sm:$0xff] }
 0x8bc   : > { %v2516_v40 = vpop.xlane.xlu2 %2515 }
 0x8bd   : > { %3383 = vrcp.f32 %v2516_v40  ;;  %v2633_v28 = vand.u32 2147483648, %v2516_v40  ;;  %v2631_v1 = vand.u32 2147483647, %v2516_v40  ;;  %vm2627_vm13 = vweird.f32 %v2516_v40 }
 0x8be   : > { %v2754_v39 = vpop.f32.mrf.mxu3 }
 0x8bf   : > { %v2634_v2 = vor.u32 1.1754944e-38, %v2633_v28  ;;  %vm2632_vm15 = vcmp.eq.f32.partialorder %v2631_v1, 8.507059e+37 }
 0x8c3   : > { %v3384_v59 = vpop.eup %3383 }
 0x8c4   : > { %v2623_v27 = vmul.f32 %v3384_v59, %v2516_v40  ;;  %vm2628_vm12 = vweird.f32 %v3384_v59  ;;  %v2806_v40 = vld [vmem:[#allocation2 + $0x210] sm:$0xff] }
 0x8c5   : > { %v2222_v34 = vpop.xlane.xlu0 %2221  ;;  %vm2629_vm14 = vmor %vm2627_vm13, %vm2628_vm12 }
 0x8c6   : > { %3385 = vrcp.f32 %v2222_v34  ;;  %v2624_v52 = vsub.f32 1.0, %v2623_v27  ;;  %v2255_v21 = vand.u32 2147483648, %v2222_v34  ;;  %v2253_v47 = vand.u32 2147483647, %v2222_v34  ;;  %v2804_v27 = vld [vmem:[#allocation2 + $0x200] sm:$0xff] }
 0x8c7   : > { %vm2249_vm2 = vweird.f32 %v2222_v34 }
 0x8c8   : > { %v2625_v7 = vmul.f32 %v3384_v59, %v2624_v52  ;;  %v2256_v6 = vor.u32 1.1754944e-38, %v2255_v21  ;;  %vm2254_vm4 = vcmp.eq.f32.partialorder %v2253_v47, 8.507059e+37  ;;  %v2837_v52 = vld [vmem:[#allocation2 + $0x240] sm:$0xff] }
 0x8ca   : > { %v2626_v29 = vadd.f32 %v3384_v59, %v2625_v7  ;;  %v2838_v7 = vperm.slane %v2837_v52, 0 }
 0x8cc   : > { %v3386_v51 = vpop.eup %3385  ;;  %v2630_v10 = vsel %vm2629_vm14, %v3384_v59, %v2626_v29  ;;  %v2805_v59 = vld [vmem:[#allocation2 + $0x208] sm:$0xff] }
 0x8cd   : > { %v2245_v17 = vmul.f32 %v3386_v51, %v2222_v34  ;;  %v2635_v12 = vsel %vm2632_vm15, %v2634_v2, %v2630_v10  ;;  %vm2250_vm1 = vweird.f32 %v3386_v51 }
 0x8ce   : > { %v2636_v53 = vmul.f32 %v4623_v50, %v2635_v12  ;;  %vm2251_vm3 = vmor %vm2249_vm2, %vm2250_vm1  ;;  %v1981_v50 = vpop.f32.mrf.mxu0 }
 0x8cf   : > { %v2246_v61 = vsub.f32 1.0, %v2245_v17  ;;  %v1982_v28 = vadd.f32 %v1981_v50, %v4700_v18 }
 0x8d0   : > { %3085 = vmatmul.msk.f32.gmra.mxu0 %vm292_vm0, %v2636_v53 }
 0x8d1   : > { %v2247_v8 = vmul.f32 %v3386_v51, %v2246_v61 }
 0x8d3   : > { %v2248_v5 = vadd.f32 %v3386_v51, %v2247_v8 }
 0x8d5   : > { %v2252_v4 = vsel %vm2251_vm3, %v3386_v51, %v2248_v5 }
 0x8d6   : > { %v2257_v22 = vsel %vm2254_vm4, %v2256_v6, %v2252_v4  ;;  %v2686_v62 = vpop.f32.mrf.mxu0 }
 0x8d7   : > { %v2258_v37 = vmul.f32 %v4631_v41, %v2257_v22 }
 0x8d9   : > { %3086 = vmatmul.msk.f32.vlgmr.msrb.gmra.mxu0 %vm292_vm0, %v2258_v37 }
 0x8db   : > { %v2757_v35 = vpop.f32.mrf.mxu3 }
 0x8de   : > { %v2689_v16 = vpop.f32.mrf.mxu0 }
 0x8df   : > { %v2755_v44 = vadd.f32 %v2754_v39, %v2689_v16 }
 0x8e1   : > { %v2776_v57 = vmax.f32 %v2755_v44, 0.0 }
 0x8e3   : > { %v2760_v31 = vpop.f32.mrf.mxu3 }
 0x8e6   : > { %v2692_v33 = vpop.f32.mrf.mxu0 }
 0x8e7   : > { %v2758_v45 = vadd.f32 %v2757_v35, %v2692_v33 }
 0x8e9   : > { %v2777_v3 = vmax.f32 %v2758_v45, 0.0 }
 0x8eb   : > { %v2763_v14 = vpop.f32.mrf.mxu3 }
 0x8ee   : > { %v2695_v23 = vpop.f32.mrf.mxu0 }
 0x8ef   : > { %v2761_v20 = vadd.f32 %v2760_v31, %v2695_v23 }
 0x8f1   : > { %v2778_v9 = vmax.f32 %v2761_v20, 0.0 }
 0x8f3   : > { %v2766_v36 = vpop.f32.mrf.mxu3 }
 0x905   : > { %v2698_v0 = vpop.f32.mrf.mxu0 }
 0x906   : > { %v2764_v32 = vadd.f32 %v2763_v14, %v2698_v0 }
 0x908   : > { %v2779_v60 = vmax.f32 %v2764_v32, 0.0 }
 0x90d   : > { %v2701_v46 = vpop.f32.mrf.mxu0 }
 0x90e   : > { %v2767_v43 = vadd.f32 %v2766_v36, %v2701_v46 }
 0x910   : > { %v2780_v24 = vmax.f32 %v2767_v43, 0.0 }
 0x913   : > { %v2769_v15 = vpop.f32.mrf.mxu3 }
 0x915   : > { %v2704_v19 = vpop.f32.mrf.mxu0 }
 0x916   : > { %v2770_v56 = vadd.f32 %v2769_v15, %v2704_v19 }
 0x918   : > { %v2781_v48 = vmax.f32 %v2770_v56, 0.0 }
 0x91b   : > { %v2772_v11 = vpop.f32.mrf.mxu3 }
 0x94d   : > { %v2707_v41 = vpop.f32.mrf.mxu0 }
 0x94e   : > { %v2773_v30 = vadd.f32 %v2772_v11, %v2707_v41 }
 0x950   : > { %v2782_v55 = vmax.f32 %v2773_v30, 0.0 }
 0x952   : > { %2791 = vmatpush.msra.mxu2 %v2782_v55 }
 0x954   : > { %2792 = vmatpush.msra.mxu2 %v2781_v48 }
 0x956   : > { %2793 = vmatpush.msra.mxu2 %v2780_v24  ;;  %v2751_v13 = vpop.f32.mrf.mxu0 }
 0x957   : > { %v2752_v54 = vadd.f32 %v2751_v13, %v2686_v62 }
 0x958   : > { %2794 = vmatpush.msra.mxu2 %v2779_v60 }
 0x959   : > { %v2775_v25 = vmax.f32 %v2752_v54, 0.0 }
 0x95a   : > { %2795 = vmatpush.msra.mxu2 %v2778_v9 }
 0x95c   : > { %2796 = vmatpush.msra.mxu2 %v2777_v3 }
 0x95e   : > { %2797 = vmatpush.msra.mxu2 %v2776_v57 }
 0x960   : > { %2798 = vmatpush.msra.mxu2 %v2775_v25 }
 0x961   : > { %3094 = vmatmul.msk.f32.vlgmr.msra.gmra.mxu2 %vm292_vm0, %v3408_v42 }
 0x962   : > { %2823 = vmatpush.msrb.mxu2 %v2811_v38 }
 0x964   : > { %2824 = vmatpush.msrb.mxu2 %v2810_v26 }
 0x966   : > { %2825 = vmatpush.msrb.mxu2 %v2809_v63 }
 0x968   : > { %2826 = vmatpush.msrb.mxu2 %v2808_v49 }
 0x96a   : > { %2827 = vmatpush.msrb.mxu2 %v2807_v58 }
 0x96c   : > { %2828 = vmatpush.msrb.mxu2 %v2806_v40 }
 0x96e   : > { %2829 = vmatpush.msrb.mxu2 %v2805_v59 }
 0x970   : > { %2830 = vmatpush.msrb.mxu2 %v2804_v27 }
 0x9e4   : > { %v2800_v34 = vpop.f32.mrf.mxu2 }
 0x9e5   : > { %3095 = vmatmul.msk.f32.vlgmr.msrb.gmra.mxu2 %vm292_vm0, %v2800_v34 }
 0xa68   : > { %v2832_v1 = vpop.f32.mrf.mxu2 }
 0xa69   : > { %v2835_v29 = vadd.f32 %v2832_v1, %v1982_v28 }
 0xa6b   : > { %v2839_v51 = vadd.f32 %v2838_v7, %v2835_v29 }
 0xa6d   : > { %v2841_v2 = vsel %vm2840_vm5, %v2839_v51, -inf }
 0xa6e   : > { %2842 = vmax.xlane.f32.xlu1 %v2841_v2 }
 0xae1   : > { %v2843_v17 = vpop.xlane.xlu1 %2842 }
 0xae2   : > { %v2844_v10 = vsub.f32 %v2839_v51, %v2843_v17 }
 0xae4   : > { %v2845_v12 = vmul.f32 1.442695, %v2844_v10 }
 0xae6   : > { %3387 = vpow2.f32 %v2845_v12 }
 0xaec   : > { %v3388_v61 = vpop.eup %3387 }
 0xaed   : > { %v2847_v53 = vsel %vm2840_vm5, %v3388_v61, 0.0 }
 0xaee   : > { %2848 = vadd.xlane.f32.xlu2 %v2847_v53 }
 0xb61   : > { %v2849_v21 = vpop.xlane.xlu2 %2848 }
 0xb62   : > { %3389 = vrcp.f32 %v2849_v21  ;;  %v2861_v6 = vand.u32 2147483648, %v2849_v21  ;;  %v2859_v22 = vand.u32 2147483647, %v2849_v21  ;;  %vm2855_vm6 = vweird.f32 %v2849_v21 }
 0xb64   : > { %v2862_v18 = vor.u32 1.1754944e-38, %v2861_v6  ;;  %vm2860_vm8 = vcmp.eq.f32.partialorder %v2859_v22, 8.507059e+37 }
 0xb68   : > { %v3390_v8 = vpop.eup %3389 }
 0xb69   : > { %v2851_v47 = vmul.f32 %v3390_v8, %v2849_v21  ;;  %vm2856_vm0 = vweird.f32 %v3390_v8 }
 0xb6a   : > { %vm2857_vm7 = vmor %vm2855_vm6, %vm2856_vm0 }
 0xb6b   : > { %v2852_v5 = vsub.f32 1.0, %v2851_v47 }
 0xb6d   : > { %v2853_v4 = vmul.f32 %v3390_v8, %v2852_v5 }
 0xb6f   : > { %v2854_v37 = vadd.f32 %v3390_v8, %v2853_v4 }
 0xb71   : > { %v2858_v50 = vsel %vm2857_vm7, %v3390_v8, %v2854_v37 }
 0xb72   : > { %v2863_v62 = vsel %vm2860_vm8, %v2862_v18, %v2858_v50 }
 0xb73   : > { %v2864_v39 = vmul.f32 %v3388_v61, %v2863_v62 }
 0xb75   : > { %2865 = vst.msk [vmem:[%s236_s11] sm:$0x3] %vm2840_vm5, %v2864_v39 }
 0xb76   : > { %3466 = shalt.err (!%p3463_p9)
}
 0xb77   : > { %3113 = dma.vmem_to_hbm [thread:$0]  (%p3577_p5), %s2880_s12, 32, %s2882_s13, %s2867_s19  }
 0xb78 PF: > { %p3125_p10 = scmp.ge.s32.totalorder %s3505_s18, 2  ;;  %s2893_s30 = sand.u32 1, %s3493_s15  }
 0xb79   : > { %s2894_s5 = scalar_lea.sflag [#allocation4], %s2893_s30 }
 0xb7a   : > { %p3120_p11 = pnand %p3125_p10, %p3581_p6 }
 0xb7c   : > { %p3121_p12 = pneg %p3120_p11 }
 0xb7e   : > { %3488 = dma.done.wait (%p3121_p12), %s2894_s5, 32  }
 0xb7f   : > { %3490 = vsyncadd (%p3121_p12), %s2894_s5, 4294967264  ;;  %p15_p13 = scmp.ge.s32.totalorder %s3564_s21, 4   ;;  %s4758_s15 = smov %s3497_s16 }
 0xb80   : > { %s4759_s16 = smov %s3501_s17  ;;  %s4760_s17 = smov %s3575_s24 }
 0xb81   : > { %s4761_s18 = smov %s3564_s21  ;;  %17 = sbr.rel (!%p15_p13) target bundleno = 4 (0x4), region = 91 }
 0xb86   :  { %2900 = vsyncpa [#allocation3], 1 }
 0xb87   :  { %2902 = vsyncpa [#allocation3 + $0x1], 1 }
 0xb88   :  { %2903 = vsyncpa [#allocation4], 1 }
 0xb89   :  { %2905 = vsyncpa [#allocation4 + $0x1], 1 }

</bundles_post_ra>
